<compile_context>
chip_gen: v7x
topology: tpu7x:2x2x1
jax: 0.10.0
libtpu: 0.0.40
codegen_flags: <defaults>
</compile_context>

<pallas_src>
import functools

import jax
import jax.numpy as jnp
from jax.experimental import pallas as pl
from jax.experimental.pallas import tpu as pltpu

_LANE = 128


def _round_up(v, m):
    return ((v + m - 1) // m) * m


def _pad2(a, rows, cols):
    return jnp.pad(a, ((0, rows - a.shape[0]), (0, cols - a.shape[1])))


def _vmem_cap_bytes():
    try:
        info = pltpu.get_tpu_info()
        return int(getattr(info, "vmem_capacity_bytes", 64 << 20))
    except Exception:
        return 64 << 20


def _vmem_limit(*byte_counts):
    """Scoped VMEM limit sized from actual buffers (x2 for double-buffering) + slack,
    capped at 75% of this generation's physical VMEM (v7x 64MiB -> ~48, v5e/v6e -> ~96)."""
    cap = int(0.75 * _vmem_cap_bytes())
    need = 2 * int(sum(byte_counts)) + (4 << 20)
    return int(min(max(need, 16 << 20), cap))


# ----------------------------- Pallas kernels ------------------------------ #

def _encoder_layer_kernel(a_ref, x_ref, w_ref, b_ref, o_ref, xw_ref,
                          *, apply_relu, n_pad):
    """One row-tile of a fused hetero-GCN layer.

    Step 0 computes the per-edge-type feature transforms into a resident VMEM
    scratch:  xw = [[X@Wa], [X@Wb]]  (2N, C) bf16.
    Every step then does one MXU matmul against the streamed adjacency tile:

        out_tile = [A1 | A2]_tile @ xw + (ba + bb)    (optionally relu)
    """
    @pl.when(pl.program_id(0) == 0)
    def _():
        x = x_ref[...]
        xw_ref[pl.ds(0, n_pad), :] = jnp.dot(
            x, w_ref[0], preferred_element_type=jnp.float32).astype(xw_ref.dtype)
        xw_ref[pl.ds(n_pad, n_pad), :] = jnp.dot(
            x, w_ref[1], preferred_element_type=jnp.float32).astype(xw_ref.dtype)

    acc = jnp.dot(a_ref[...], xw_ref[...], preferred_element_type=jnp.float32)
    acc = acc + b_ref[...]
    if apply_relu:
        acc = jnp.maximum(acc, 0.0)
    o_ref[...] = acc.astype(o_ref.dtype)


def _decode_kernel(zf_ref, w1_ref, b1_ref, w2_ref, b2_ref, o_ref):
    """Edge decoder on a lane-tile of edges (edges on the lane axis).

    The reversed-concat branch is folded into the weights: w1_ref stacks
    [W1 ; W1_swapped-halves], so a single bf16 MXU matmul produces both branches'
    hidden activations.  W2 (out_c -> 1) is a VPU/XLU reduction.

      h   = relu(W1comb @ zf + b1comb)            (4C, TE)
      s   = sum_c(w2comb[c] * h[c, :])            (1, TE)   == sf_raw + sr_raw
      out = 0.5 * s + b2                          (1, TE)   == (sf + sr) / 2
      store lane-dense (2, TE): row0 = -out, row1 = +out
    """
    h = jnp.dot(w1_ref[...], zf_ref[...], preferred_element_type=jnp.float32)
    h = jnp.maximum(h + b1_ref[...], 0.0)
    s = jnp.sum(h * w2_ref[...], axis=0, keepdims=True)
    out = 0.5 * s + b2_ref[...]
    o_ref[...] = jnp.concatenate([-out, out], axis=0)


# ------------------------------ call wrappers ------------------------------ #

def _encoder_layer(acat_bf, x_bf, w_stack_bf, bias, *, apply_relu, out_dtype, tile_m):
    """Fused hetero GCN layer.  acat (N, 2N) bf16, x (N, Cin) bf16, w (2, Cin, C) bf16."""
    n_pad, k = acat_bf.shape                       # k == 2 * n_pad
    cin = x_bf.shape[1]
    c = w_stack_bf.shape[2]
    assert n_pad % tile_m == 0
    out_isz = jnp.dtype(out_dtype).itemsize
    vb = _vmem_limit(tile_m * k * 2,               # streamed A tile (bf16)
                     n_pad * cin * 2,              # resident X
                     2 * cin * c * 2,              # resident W stack
                     c * 4,                        # bias
                     tile_m * c * out_isz,         # out tile
                     k * c * 2)                    # XW scratch
    kernel = functools.partial(_encoder_layer_kernel, apply_relu=apply_relu, n_pad=n_pad)
    return pl.pallas_call(
        kernel,
        out_shape=jax.ShapeDtypeStruct((n_pad, c), out_dtype),
        grid=(n_pad // tile_m,),
        in_specs=[
            pl.BlockSpec((tile_m, k), lambda i: (i, 0)),      # stream row-tiles of [A1|A2]
            pl.BlockSpec((n_pad, cin), lambda i: (0, 0)),     # X: VMEM-resident
            pl.BlockSpec((2, cin, c), lambda i: (0, 0, 0)),   # W stack: resident
            pl.BlockSpec((1, c), lambda i: (0, 0)),           # summed bias: resident
        ],
        out_specs=pl.BlockSpec((tile_m, c), lambda i: (i, 0)),
        scratch_shapes=[pltpu.VMEM((k, c), jnp.bfloat16)],
        compiler_params=pltpu.CompilerParams(
            # "arbitrary": the XW scratch (filled at step 0) must persist across
            # all row tiles, so the axis must run sequentially on one core.
            dimension_semantics=("arbitrary",),
            vmem_limit_bytes=vb,
        ),
    )(acat_bf, x_bf, w_stack_bf, bias)


def _decode(zf_t_bf, w1_comb_bf, b1_comb, w2_comb, b2, *, tile_e):
    """zf (4C, E) bf16 -> (2, E) f32 with row0 = -out, row1 = out."""
    four_c, e_pad = zf_t_bf.shape
    assert e_pad % tile_e == 0
    vb = _vmem_limit(four_c * tile_e * 2, w1_comb_bf.size * 2,
                     b1_comb.size * 4, w2_comb.size * 4, 2 * tile_e * 4)
    return pl.pallas_call(
        _decode_kernel,
        out_shape=jax.ShapeDtypeStruct((2, e_pad), jnp.float32),
        grid=(e_pad // tile_e,),
        in_specs=[
            pl.BlockSpec((four_c, tile_e), lambda j: (0, j)),   # streamed edge tile
            pl.BlockSpec((four_c, four_c), lambda j: (0, 0)),   # combined W1: resident
            pl.BlockSpec((four_c, 1), lambda j: (0, 0)),
            pl.BlockSpec((four_c, 1), lambda j: (0, 0)),
            pl.BlockSpec((1, 1), lambda j: (0, 0)),
        ],
        out_specs=pl.BlockSpec((2, tile_e), lambda j: (0, j)),
        compiler_params=pltpu.CompilerParams(
            dimension_semantics=("parallel",),
            vmem_limit_bytes=vb,
        ),
    )(zf_t_bf, w1_comb_bf, b1_comb, w2_comb, b2)


# ------------------------------- JAX glue ---------------------------------- #

def gcn_norm_dense(edge_index, num_nodes):
    """PyG gcn_norm (add_self_loops=False) materialized as a dense [dst, src] matrix."""
    row, col = edge_index[0], edge_index[1]            # row = source, col = target
    deg = jnp.zeros((num_nodes,), jnp.float32).at[col].add(1.0)
    dinv = jnp.where(deg > 0, 1.0 / jnp.sqrt(deg), 0.0)
    norm = dinv[row] * dinv[col]
    return jnp.zeros((num_nodes, num_nodes), jnp.float32).at[col, row].add(norm)


def init_params(key, in_channels, hidden_channels, out_channels):
    ks = jax.random.split(key, 12)
    s = 0.1
    n = lambda k, shp: s * jax.random.normal(k, shp, jnp.float32)
    p = {}
    # encoder: one GCNConv per (layer, edge type); weights stored (in, out)
    p['w1a'] = n(ks[0], (in_channels, hidden_channels))
    p['b1a'] = n(ks[1], (1, hidden_channels))
    p['w1b'] = n(ks[2], (in_channels, hidden_channels))
    p['b1b'] = n(ks[3], (1, hidden_channels))
    p['w2a'] = n(ks[4], (hidden_channels, out_channels))
    p['b2a'] = n(ks[5], (1, out_channels))
    p['w2b'] = n(ks[6], (hidden_channels, out_channels))
    p['b2b'] = n(ks[7], (1, out_channels))
    # decoder: W1 = Linear(2*out, out) stored torch-style (out, 2*out); W2 = Linear(out, 1)
    p['dw1'] = n(ks[8], (out_channels, 2 * out_channels))
    p['db1'] = n(ks[9], (out_channels, 1))
    p['dw2'] = n(ks[10], (out_channels, 1))
    p['db2'] = n(ks[11], (1, 1))
    return p


def net_forward(params, x, a1, a2, edge_label_index, *, tile_m=512, tile_e=512):
    n, in_c = x.shape
    hid_c = params['w1a'].shape[1]
    out_c = params['w2a'].shape[1]
    e = edge_label_index.shape[1]

    # ---- padded, lane-dense sizes ----
    cin_p = _round_up(in_c, _LANE)
    hid_p = _round_up(hid_c, _LANE)
    out_p = _round_up(out_c, _LANE)
    n_p = _round_up(n, _LANE)
    tile_m = min(tile_m, n_p)
    n_p = _round_up(n_p, tile_m)
    tile_e = min(tile_e, _round_up(e, _LANE))
    e_p = _round_up(e, tile_e)

    # ---- padded / bf16 encoder operands (zero padding keeps the math exact) ----
    x_bf = _pad2(x, n_p, cin_p).astype(jnp.bfloat16)
    acat_bf = jnp.concatenate(
        [_pad2(a1, n_p, n_p), _pad2(a2, n_p, n_p)], axis=1).astype(jnp.bfloat16)  # (N, 2N)

    w1s = jnp.stack([_pad2(params['w1a'], cin_p, hid_p),
                     _pad2(params['w1b'], cin_p, hid_p)]).astype(jnp.bfloat16)
    w2s = jnp.stack([_pad2(params['w2a'], hid_p, out_p),
                     _pad2(params['w2b'], hid_p, out_p)]).astype(jnp.bfloat16)
    b1 = _pad2(params['b1a'] + params['b1b'], 1, hid_p)   # summed per-layer biases
    b2 = _pad2(params['b2a'] + params['b2b'], 1, out_p)

    # ---- encoder (one fused pallas_call per layer) ----
    h = _encoder_layer(acat_bf, x_bf, w1s, b1, apply_relu=True,
                       out_dtype=jnp.bfloat16, tile_m=tile_m)          # (Np, Hp) bf16
    z = _encoder_layer(acat_bf, h, w2s, b2, apply_relu=False,
                       out_dtype=jnp.float32, tile_m=tile_m)           # (Np, Op) f32

    # ---- decoder prep: row gather on row-major z + ONE transpose ----
    # key = ('paper','cites','paper') -> z1 = z2 = z['paper'] = z
    eli = jnp.pad(edge_label_index, ((0, 0), (0, e_p - e)))            # pad with node 0
    z1 = z[eli[0]]                                                     # (Ep, Op)
    z2 = z[eli[1]]
    zf_t = jnp.concatenate([z1, z2], axis=1).T.astype(jnp.bfloat16)    # (2*Op, Ep) bf16

    # ---- decoder weights: fold the reversed-concat branch into stacked W1 ----
    oc = out_c
    dw1 = params['dw1']
    w1f = jnp.zeros((out_p, 2 * out_p), jnp.float32)
    w1f = w1f.at[:oc, :oc].set(dw1[:, :oc]).at[:oc, out_p:out_p + oc].set(dw1[:, oc:])
    w1r = jnp.zeros((out_p, 2 * out_p), jnp.float32)
    w1r = w1r.at[:oc, :oc].set(dw1[:, oc:]).at[:oc, out_p:out_p + oc].set(dw1[:, :oc])
    w1_comb = jnp.concatenate([w1f, w1r], axis=0).astype(jnp.bfloat16)  # (2Op, 2Op)
    b1d = jnp.zeros((out_p, 1), jnp.float32).at[:oc].set(params['db1'])
    b1_comb = jnp.concatenate([b1d, b1d], axis=0)                       # (2Op, 1)
    w2d = jnp.zeros((out_p, 1), jnp.float32).at[:oc].set(params['dw2'])
    w2_comb = jnp.concatenate([w2d, w2d], axis=0)                       # (2Op, 1)

    out2e = _decode(zf_t, w1_comb, b1_comb, w2_comb, params['db2'], tile_e=tile_e)  # (2, Ep)

    # torch.hstack((-out, out)).T : .T on 1-D is a no-op -> shape (2E,)
    return out2e[:, :e].reshape(-1)


def reference_forward(params, x, a1, a2, eli):
    """Pure-JAX reference mirroring the kernels' bf16-in / f32-accumulate precision."""
    def conv(h, wa, ba, wb, bb):
        h_bf = h.astype(jnp.bfloat16)
        xwa = jnp.dot(h_bf, wa.astype(jnp.bfloat16),
                      preferred_element_type=jnp.float32).astype(jnp.bfloat16)
        xwb = jnp.dot(h_bf, wb.astype(jnp.bfloat16),
                      preferred_element_type=jnp.float32).astype(jnp.bfloat16)
        agg = (jnp.dot(a1.astype(jnp.bfloat16), xwa, preferred_element_type=jnp.float32)
               + jnp.dot(a2.astype(jnp.bfloat16), xwb, preferred_element_type=jnp.float32))
        return agg + ba + bb

    h = jnp.maximum(conv(x, params['w1a'], params['b1a'], params['w1b'], params['b1b']), 0.0)
    z = conv(h, params['w2a'], params['b2a'], params['w2b'], params['b2b'])

    z1, z2 = z[eli[0]], z[eli[1]]

    def mlp(a, b):
        cat = jnp.concatenate([a, b], axis=1).astype(jnp.bfloat16)        # (E, 2*out)
        hh = jnp.maximum(jnp.dot(cat, params['dw1'].T.astype(jnp.bfloat16),
                                 preferred_element_type=jnp.float32) + params['db1'].T, 0.0)
        return hh @ params['dw2'] + params['db2']                          # (E, 1)

    out = (0.5 * (mlp(z1, z2) + mlp(z2, z1)))[:, 0]
    return jnp.concatenate([-out, out], axis=0)


if __name__ == "__main__":
    rng = jax.random.PRNGKey(0)
    num_nodes, in_c, hid_c, out_c = 256, 32, 64, 32
    num_edges, num_label_edges = 1024, 256

    k_x, k_e, k_el, k_p = jax.random.split(rng, 4)
    x = jax.random.normal(k_x, (num_nodes, in_c), jnp.float32)
    ei_cites = jax.random.randint(k_e, (2, num_edges), 0, num_nodes)
    ei_rev = jnp.stack([ei_cites[1], ei_cites[0]])        # ('paper','rev_cites','paper')
    edge_label_index = jax.random.randint(k_el, (2, num_label_edges), 0, num_nodes)

    params = init_params(k_p, in_c, hid_c, out_c)

    # Dense normalized adjacencies for both edge types (demo-scale; see sparse TODO).
    a1 = gcn_norm_dense(ei_cites, num_nodes)
    a2 = gcn_norm_dense(ei_rev, num_nodes)

    fwd = jax.jit(net_forward)
    out = jax.block_until_ready(fwd(params, x, a1, a2, edge_label_index))

    ref = reference_forward(params, x, a1, a2, edge_label_index)
    assert out.shape == (2 * num_label_edges,)
    assert jnp.allclose(out, ref, atol=2e-3, rtol=2e-2), float(jnp.max(jnp.abs(out - ref)))
    print("KERNEL_OK")
</pallas_src>

<mosaic_0001>
module attributes {stable_mosaic.version = 11 : i64} {
  func.func @_encoder_layer_kernel(%arg0: i32, %arg1: memref<256x512xbf16, #tpu.memory_space<vmem>>, %arg2: memref<256x128xbf16, #tpu.memory_space<vmem>>, %arg3: memref<2x128x128xbf16, #tpu.memory_space<vmem>>, %arg4: memref<1x128xf32, #tpu.memory_space<vmem>>, %arg5: memref<256x128xbf16, #tpu.memory_space<vmem>>, %arg6: memref<512x128xbf16, #tpu.memory_space<vmem>>) attributes {dimension_semantics = [#tpu.dimension_semantics<arbitrary>], iteration_bounds = array<i64: 1>, scalar_prefetch = 0 : i64, scratch_operands = 1 : i64, tpu.core_type = #tpu.core_type<tc>, window_params = [{transform_indices = @transform_0, window_bounds = array<i64: 256, 512>}, {pipeline_mode = #tpu.pipeline_mode<synchronous>, transform_indices = @transform_1, window_bounds = array<i64: 256, 128>}, {pipeline_mode = #tpu.pipeline_mode<synchronous>, transform_indices = @transform_2, window_bounds = array<i64: 2, 128, 128>}, {pipeline_mode = #tpu.pipeline_mode<synchronous>, transform_indices = @transform_3, window_bounds = array<i64: 1, 128>}, {transform_indices = @transform_4, window_bounds = array<i64: 256, 128>}]} {
    %c0_i32 = arith.constant 0 : i32
    %0 = arith.cmpi eq, %arg0, %c0_i32 : i32
    %1 = arith.extui %0 : i1 to i32
    %c0_i32_0 = arith.constant 0 : i32
    %2 = arith.cmpi ne, %1, %c0_i32_0 : i32
    scf.if %2 {
      %c0_9 = arith.constant 0 : index
      %c0_10 = arith.constant 0 : index
      %13 = vector.load %arg2[%c0_9, %c0_10] : memref<256x128xbf16, #tpu.memory_space<vmem>>, vector<256x128xbf16>
      %c0_11 = arith.constant 0 : index
      %c0_12 = arith.constant 0 : index
      %c0_13 = arith.constant 0 : index
      %14 = vector.load %arg3[%c0_11, %c0_12, %c0_13] : memref<2x128x128xbf16, #tpu.memory_space<vmem>>, vector<1x128x128xbf16>
      %15 = vector.shape_cast %14 : vector<1x128x128xbf16> to vector<128x128xbf16>
      %cst_14 = arith.constant dense<0.000000e+00> : vector<256x128xf32>
      %16 = tpu.matmul %13, %15, %cst_14 {dimension_numbers = #tpu.dot_dimension_numbers<[1], [0], [0], [1], [0, 0, 1, 1], [], []>} : vector<256x128xbf16>, vector<128x128xbf16>, vector<256x128xf32> -> vector<256x128xf32>
      %17 = arith.truncf %16 : vector<256x128xf32> to vector<256x128xbf16>
      %c0_15 = arith.constant 0 : index
      %c0_16 = arith.constant 0 : index
      %18 = vector.load %arg6[%c0_15, %c0_16] : memref<512x128xbf16, #tpu.memory_space<vmem>>, vector<256x128xbf16>
      tpu.vector_store %arg6[%c0_15, %c0_16], %17 {strides = array<i32>} : memref<512x128xbf16, #tpu.memory_space<vmem>>, vector<256x128xbf16>,
      %c1 = arith.constant 1 : index
      %c0_17 = arith.constant 0 : index
      %c0_18 = arith.constant 0 : index
      %19 = vector.load %arg3[%c1, %c0_17, %c0_18] : memref<2x128x128xbf16, #tpu.memory_space<vmem>>, vector<1x128x128xbf16>
      %20 = vector.shape_cast %19 : vector<1x128x128xbf16> to vector<128x128xbf16>
      %cst_19 = arith.constant dense<0.000000e+00> : vector<256x128xf32>
      %21 = tpu.matmul %13, %20, %cst_19 {dimension_numbers = #tpu.dot_dimension_numbers<[1], [0], [0], [1], [0, 0, 1, 1], [], []>} : vector<256x128xbf16>, vector<128x128xbf16>, vector<256x128xf32> -> vector<256x128xf32>
      %22 = arith.truncf %21 : vector<256x128xf32> to vector<256x128xbf16>
      %c256 = arith.constant 256 : index
      %c0_20 = arith.constant 0 : index
      %23 = vector.load %arg6[%c256, %c0_20] : memref<512x128xbf16, #tpu.memory_space<vmem>>, vector<256x128xbf16>
      tpu.vector_store %arg6[%c256, %c0_20], %22 {strides = array<i32>} : memref<512x128xbf16, #tpu.memory_space<vmem>>, vector<256x128xbf16>,
    } else {
    }
    %c0 = arith.constant 0 : index
    %c0_1 = arith.constant 0 : index
    %3 = vector.load %arg1[%c0, %c0_1] : memref<256x512xbf16, #tpu.memory_space<vmem>>, vector<256x512xbf16>
    %c0_2 = arith.constant 0 : index
    %c0_3 = arith.constant 0 : index
    %4 = vector.load %arg6[%c0_2, %c0_3] : memref<512x128xbf16, #tpu.memory_space<vmem>>, vector<512x128xbf16>
    %cst = arith.constant dense<0.000000e+00> : vector<256x128xf32>
    %5 = tpu.matmul %3, %4, %cst {dimension_numbers = #tpu.dot_dimension_numbers<[1], [0], [0], [1], [0, 0, 1, 1], [], []>} : vector<256x512xbf16>, vector<512x128xbf16>, vector<256x128xf32> -> vector<256x128xf32>
    %c0_4 = arith.constant 0 : index
    %c0_5 = arith.constant 0 : index
    %6 = vector.load %arg4[%c0_4, %c0_5] : memref<1x128xf32, #tpu.memory_space<vmem>>, vector<1x128xf32>
    %7 = vector.broadcast %6 : vector<1x128xf32> to vector<256x128xf32>
    %8 = arith.addf %5, %7 : vector<256x128xf32>
    %cst_6 = arith.constant 0.000000e+00 : f32
    %9 = vector.broadcast %cst_6 : f32 to vector<256x128xf32>
    %10 = arith.maximumf %8, %9 : vector<256x128xf32>
    %11 = arith.truncf %10 : vector<256x128xf32> to vector<256x128xbf16>
    %c0_7 = arith.constant 0 : index
    %c0_8 = arith.constant 0 : index
    %12 = vector.load %arg5[%c0_7, %c0_8] : memref<256x128xbf16, #tpu.memory_space<vmem>>, vector<256x128xbf16>
    tpu.vector_store %arg5[%c0_7, %c0_8], %11 {strides = array<i32>} : memref<256x128xbf16, #tpu.memory_space<vmem>>, vector<256x128xbf16>,
    return
  }
  func.func @transform_0(%arg0: i32) -> (i32, i32) {
    %c0_i32 = arith.constant 0 : i32
    %c0_i32_0 = arith.constant 0 : i32
    return %arg0, %c0_i32 : i32, i32
  }
  func.func @transform_1(%arg0: i32) -> (i32, i32) {
    %c0_i32 = arith.constant 0 : i32
    %c0_i32_0 = arith.constant 0 : i32
    %c0_i32_1 = arith.constant 0 : i32
    return %c0_i32, %c0_i32_0 : i32, i32
  }
  func.func @transform_2(%arg0: i32) -> (i32, i32, i32) {
    %c0_i32 = arith.constant 0 : i32
    %c0_i32_0 = arith.constant 0 : i32
    %c0_i32_1 = arith.constant 0 : i32
    %c0_i32_2 = arith.constant 0 : i32
    return %c0_i32, %c0_i32_0, %c0_i32_1 : i32, i32, i32
  }
  func.func @transform_3(%arg0: i32) -> (i32, i32) {
    %c0_i32 = arith.constant 0 : i32
    %c0_i32_0 = arith.constant 0 : i32
    %c0_i32_1 = arith.constant 0 : i32
    return %c0_i32, %c0_i32_0 : i32, i32
  }
  func.func @transform_4(%arg0: i32) -> (i32, i32) {
    %c0_i32 = arith.constant 0 : i32
    %c0_i32_0 = arith.constant 0 : i32
    return %arg0, %c0_i32 : i32, i32
  }
}

module attributes {stable_mosaic.version = 11 : i64} {
  func.func @_encoder_layer_kernel(%arg0: i32, %arg1: memref<256x512xbf16, #tpu.memory_space<vmem>>, %arg2: memref<256x128xbf16, #tpu.memory_space<vmem>>, %arg3: memref<2x128x128xbf16, #tpu.memory_space<vmem>>, %arg4: memref<1x128xf32, #tpu.memory_space<vmem>>, %arg5: memref<256x128xf32, #tpu.memory_space<vmem>>, %arg6: memref<512x128xbf16, #tpu.memory_space<vmem>>) attributes {dimension_semantics = [#tpu.dimension_semantics<arbitrary>], iteration_bounds = array<i64: 1>, scalar_prefetch = 0 : i64, scratch_operands = 1 : i64, tpu.core_type = #tpu.core_type<tc>, window_params = [{transform_indices = @transform_0, window_bounds = array<i64: 256, 512>}, {pipeline_mode = #tpu.pipeline_mode<synchronous>, transform_indices = @transform_1, window_bounds = array<i64: 256, 128>}, {pipeline_mode = #tpu.pipeline_mode<synchronous>, transform_indices = @transform_2, window_bounds = array<i64: 2, 128, 128>}, {pipeline_mode = #tpu.pipeline_mode<synchronous>, transform_indices = @transform_3, window_bounds = array<i64: 1, 128>}, {transform_indices = @transform_4, window_bounds = array<i64: 256, 128>}]} {
    %c0_i32 = arith.constant 0 : i32
    %0 = arith.cmpi eq, %arg0, %c0_i32 : i32
    %1 = arith.extui %0 : i1 to i32
    %c0_i32_0 = arith.constant 0 : i32
    %2 = arith.cmpi ne, %1, %c0_i32_0 : i32
    scf.if %2 {
      %c0_8 = arith.constant 0 : index
      %c0_9 = arith.constant 0 : index
      %10 = vector.load %arg2[%c0_8, %c0_9] : memref<256x128xbf16, #tpu.memory_space<vmem>>, vector<256x128xbf16>
      %c0_10 = arith.constant 0 : index
      %c0_11 = arith.constant 0 : index
      %c0_12 = arith.constant 0 : index
      %11 = vector.load %arg3[%c0_10, %c0_11, %c0_12] : memref<2x128x128xbf16, #tpu.memory_space<vmem>>, vector<1x128x128xbf16>
      %12 = vector.shape_cast %11 : vector<1x128x128xbf16> to vector<128x128xbf16>
      %cst_13 = arith.constant dense<0.000000e+00> : vector<256x128xf32>
      %13 = tpu.matmul %10, %12, %cst_13 {dimension_numbers = #tpu.dot_dimension_numbers<[1], [0], [0], [1], [0, 0, 1, 1], [], []>} : vector<256x128xbf16>, vector<128x128xbf16>, vector<256x128xf32> -> vector<256x128xf32>
      %14 = arith.truncf %13 : vector<256x128xf32> to vector<256x128xbf16>
      %c0_14 = arith.constant 0 : index
      %c0_15 = arith.constant 0 : index
      %15 = vector.load %arg6[%c0_14, %c0_15] : memref<512x128xbf16, #tpu.memory_space<vmem>>, vector<256x128xbf16>
      tpu.vector_store %arg6[%c0_14, %c0_15], %14 {strides = array<i32>} : memref<512x128xbf16, #tpu.memory_space<vmem>>, vector<256x128xbf16>,
      %c1 = arith.constant 1 : index
      %c0_16 = arith.constant 0 : index
      %c0_17 = arith.constant 0 : index
      %16 = vector.load %arg3[%c1, %c0_16, %c0_17] : memref<2x128x128xbf16, #tpu.memory_space<vmem>>, vector<1x128x128xbf16>
      %17 = vector.shape_cast %16 : vector<1x128x128xbf16> to vector<128x128xbf16>
      %cst_18 = arith.constant dense<0.000000e+00> : vector<256x128xf32>
      %18 = tpu.matmul %10, %17, %cst_18 {dimension_numbers = #tpu.dot_dimension_numbers<[1], [0], [0], [1], [0, 0, 1, 1], [], []>} : vector<256x128xbf16>, vector<128x128xbf16>, vector<256x128xf32> -> vector<256x128xf32>
      %19 = arith.truncf %18 : vector<256x128xf32> to vector<256x128xbf16>
      %c256 = arith.constant 256 : index
      %c0_19 = arith.constant 0 : index
      %20 = vector.load %arg6[%c256, %c0_19] : memref<512x128xbf16, #tpu.memory_space<vmem>>, vector<256x128xbf16>
      tpu.vector_store %arg6[%c256, %c0_19], %19 {strides = array<i32>} : memref<512x128xbf16, #tpu.memory_space<vmem>>, vector<256x128xbf16>,
    } else {
    }
    %c0 = arith.constant 0 : index
    %c0_1 = arith.constant 0 : index
    %3 = vector.load %arg1[%c0, %c0_1] : memref<256x512xbf16, #tpu.memory_space<vmem>>, vector<256x512xbf16>
    %c0_2 = arith.constant 0 : index
    %c0_3 = arith.constant 0 : index
    %4 = vector.load %arg6[%c0_2, %c0_3] : memref<512x128xbf16, #tpu.memory_space<vmem>>, vector<512x128xbf16>
    %cst = arith.constant dense<0.000000e+00> : vector<256x128xf32>
    %5 = tpu.matmul %3, %4, %cst {dimension_numbers = #tpu.dot_dimension_numbers<[1], [0], [0], [1], [0, 0, 1, 1], [], []>} : vector<256x512xbf16>, vector<512x128xbf16>, vector<256x128xf32> -> vector<256x128xf32>
    %c0_4 = arith.constant 0 : index
    %c0_5 = arith.constant 0 : index
    %6 = vector.load %arg4[%c0_4, %c0_5] : memref<1x128xf32, #tpu.memory_space<vmem>>, vector<1x128xf32>
    %7 = vector.broadcast %6 : vector<1x128xf32> to vector<256x128xf32>
    %8 = arith.addf %5, %7 : vector<256x128xf32>
    %c0_6 = arith.constant 0 : index
    %c0_7 = arith.constant 0 : index
    %9 = vector.load %arg5[%c0_6, %c0_7] : memref<256x128xf32, #tpu.memory_space<vmem>>, vector<256x128xf32>
    tpu.vector_store %arg5[%c0_6, %c0_7], %8 {strides = array<i32>} : memref<256x128xf32, #tpu.memory_space<vmem>>, vector<256x128xf32>,
    return
  }
  func.func @transform_0(%arg0: i32) -> (i32, i32) {
    %c0_i32 = arith.constant 0 : i32
    %c0_i32_0 = arith.constant 0 : i32
    return %arg0, %c0_i32 : i32, i32
  }
  func.func @transform_1(%arg0: i32) -> (i32, i32) {
    %c0_i32 = arith.constant 0 : i32
    %c0_i32_0 = arith.constant 0 : i32
    %c0_i32_1 = arith.constant 0 : i32
    return %c0_i32, %c0_i32_0 : i32, i32
  }
  func.func @transform_2(%arg0: i32) -> (i32, i32, i32) {
    %c0_i32 = arith.constant 0 : i32
    %c0_i32_0 = arith.constant 0 : i32
    %c0_i32_1 = arith.constant 0 : i32
    %c0_i32_2 = arith.constant 0 : i32
    return %c0_i32, %c0_i32_0, %c0_i32_1 : i32, i32, i32
  }
  func.func @transform_3(%arg0: i32) -> (i32, i32) {
    %c0_i32 = arith.constant 0 : i32
    %c0_i32_0 = arith.constant 0 : i32
    %c0_i32_1 = arith.constant 0 : i32
    return %c0_i32, %c0_i32_0 : i32, i32
  }
  func.func @transform_4(%arg0: i32) -> (i32, i32) {
    %c0_i32 = arith.constant 0 : i32
    %c0_i32_0 = arith.constant 0 : i32
    return %arg0, %c0_i32 : i32, i32
  }
}

module attributes {stable_mosaic.version = 11 : i64} {
  func.func @_decode_kernel(%arg0: i32, %arg1: memref<256x256xbf16, #tpu.memory_space<vmem>>, %arg2: memref<256x256xbf16, #tpu.memory_space<vmem>>, %arg3: memref<256x1xf32, #tpu.memory_space<vmem>>, %arg4: memref<256x1xf32, #tpu.memory_space<vmem>>, %arg5: memref<1x1xf32, #tpu.memory_space<vmem>>, %arg6: memref<2x256xf32, #tpu.memory_space<vmem>>) attributes {dimension_semantics = [#tpu.dimension_semantics<parallel>], iteration_bounds = array<i64: 1>, scalar_prefetch = 0 : i64, scratch_operands = 0 : i64, tpu.core_type = #tpu.core_type<tc>, window_params = [{transform_indices = @transform_0, window_bounds = array<i64: 256, 256>}, {pipeline_mode = #tpu.pipeline_mode<synchronous>, transform_indices = @transform_1, window_bounds = array<i64: 256, 256>}, {pipeline_mode = #tpu.pipeline_mode<synchronous>, transform_indices = @transform_2, window_bounds = array<i64: 256, 1>}, {pipeline_mode = #tpu.pipeline_mode<synchronous>, transform_indices = @transform_3, window_bounds = array<i64: 256, 1>}, {pipeline_mode = #tpu.pipeline_mode<synchronous>, transform_indices = @transform_4, window_bounds = array<i64: 1, 1>}, {transform_indices = @transform_5, window_bounds = array<i64: 2, 256>}]} {
    %c0 = arith.constant 0 : index
    %c0_0 = arith.constant 0 : index
    %0 = vector.load %arg2[%c0, %c0_0] : memref<256x256xbf16, #tpu.memory_space<vmem>>, vector<256x256xbf16>
    %c0_1 = arith.constant 0 : index
    %c0_2 = arith.constant 0 : index
    %1 = vector.load %arg1[%c0_1, %c0_2] : memref<256x256xbf16, #tpu.memory_space<vmem>>, vector<256x256xbf16>
    %cst = arith.constant dense<0.000000e+00> : vector<256x256xf32>
    %2 = tpu.matmul %0, %1, %cst {dimension_numbers = #tpu.dot_dimension_numbers<[1], [0], [0], [1], [0, 0, 1, 1], [], []>} : vector<256x256xbf16>, vector<256x256xbf16>, vector<256x256xf32> -> vector<256x256xf32>
    %c0_3 = arith.constant 0 : index
    %c0_4 = arith.constant 0 : index
    %3 = vector.load %arg3[%c0_3, %c0_4] : memref<256x1xf32, #tpu.memory_space<vmem>>, vector<256x1xf32>
    %4 = vector.broadcast %3 : vector<256x1xf32> to vector<256x256xf32>
    %5 = arith.addf %2, %4 : vector<256x256xf32>
    %cst_5 = arith.constant 0.000000e+00 : f32
    %6 = vector.broadcast %cst_5 : f32 to vector<256x256xf32>
    %7 = arith.maximumf %5, %6 : vector<256x256xf32>
    %c0_6 = arith.constant 0 : index
    %c0_7 = arith.constant 0 : index
    %8 = vector.load %arg4[%c0_6, %c0_7] : memref<256x1xf32, #tpu.memory_space<vmem>>, vector<256x1xf32>
    %9 = vector.broadcast %8 : vector<256x1xf32> to vector<256x256xf32>
    %10 = arith.mulf %7, %9 : vector<256x256xf32>
    %cst_8 = arith.constant dense<0.000000e+00> : vector<256xf32>
    %11 = vector.multi_reduction <add>, %10, %cst_8 [0] : vector<256x256xf32> to vector<256xf32>
    %12 = vector.shape_cast %11 : vector<256xf32> to vector<1x256xf32>
    %cst_9 = arith.constant 5.000000e-01 : f32
    %13 = vector.broadcast %cst_9 : f32 to vector<1x256xf32>
    %14 = arith.mulf %13, %12 : vector<1x256xf32>
    %c0_10 = arith.constant 0 : index
    %c0_11 = arith.constant 0 : index
    %15 = vector.load %arg5[%c0_10, %c0_11] : memref<1x1xf32, #tpu.memory_space<vmem>>, vector<1x1xf32>
    %16 = vector.broadcast %15 : vector<1x1xf32> to vector<1x256xf32>
    %17 = arith.addf %14, %16 : vector<1x256xf32>
    %cst_12 = arith.constant 0.000000e+00 : f32
    %18 = vector.broadcast %cst_12 : f32 to vector<1x256xf32>
    %19 = arith.subf %18, %17 : vector<1x256xf32>
    %20 = tpu.concatenate %19, %17 in 0 : vector<1x256xf32>, vector<1x256xf32> -> vector<2x256xf32>
    %c0_13 = arith.constant 0 : index
    %c0_14 = arith.constant 0 : index
    %21 = vector.load %arg6[%c0_13, %c0_14] : memref<2x256xf32, #tpu.memory_space<vmem>>, vector<2x256xf32>
    tpu.vector_store %arg6[%c0_13, %c0_14], %20 {strides = array<i32>} : memref<2x256xf32, #tpu.memory_space<vmem>>, vector<2x256xf32>,
    return
  }
  func.func @transform_0(%arg0: i32) -> (i32, i32) {
    %c0_i32 = arith.constant 0 : i32
    %c0_i32_0 = arith.constant 0 : i32
    return %c0_i32, %arg0 : i32, i32
  }
  func.func @transform_1(%arg0: i32) -> (i32, i32) {
    %c0_i32 = arith.constant 0 : i32
    %c0_i32_0 = arith.constant 0 : i32
    %c0_i32_1 = arith.constant 0 : i32
    return %c0_i32, %c0_i32_0 : i32, i32
  }
  func.func @transform_2(%arg0: i32) -> (i32, i32) {
    %c0_i32 = arith.constant 0 : i32
    %c0_i32_0 = arith.constant 0 : i32
    %c0_i32_1 = arith.constant 0 : i32
    return %c0_i32, %c0_i32_0 : i32, i32
  }
  func.func @transform_3(%arg0: i32) -> (i32, i32) {
    %c0_i32 = arith.constant 0 : i32
    %c0_i32_0 = arith.constant 0 : i32
    %c0_i32_1 = arith.constant 0 : i32
    return %c0_i32, %c0_i32_0 : i32, i32
  }
  func.func @transform_4(%arg0: i32) -> (i32, i32) {
    %c0_i32 = arith.constant 0 : i32
    %c0_i32_0 = arith.constant 0 : i32
    %c0_i32_1 = arith.constant 0 : i32
    return %c0_i32, %c0_i32_0 : i32, i32
  }
  func.func @transform_5(%arg0: i32) -> (i32, i32) {
    %c0_i32 = arith.constant 0 : i32
    %c0_i32_0 = arith.constant 0 : i32
    return %c0_i32, %arg0 : i32, i32
  }
}

</mosaic_0001>

<bundles_post_ra>
// kernel: net_forward.3
= control target key start
LH: loop header
LB: loop body
LE: loop exit
PB: predicated region body
PF: predicated region fallthrough
CT: control target
= control target key end

     0   :  { %s2889_s2 = inlined_call_operand.vmem [shape: bf16[2,128,128], index: 2, kind: input, shape index: {}]   ;;  %s2890_s1 = inlined_call_operand.vmem [shape: bf16[256,128], index: 1, kind: input, shape index: {}]   ;;  %s2891_s0 = inlined_call_operand.vmem [shape: bf16[256,512], index: 0, kind: input, shape index: {}]   ;;  %s2892_s3 = inlined_call_operand.vmem [shape: f32[1,128], index: 3, kind: input, shape index: {}]   ;;  %s2893_s4 = inlined_call_operand.vmem [shape: bf16[256,128], index: 4, kind: output, shape index: {}]  }
   0x1   :  { %v2246_v0 = vld [vmem:[%s2889_s2] sm:$0xff]   ;;  %v2248_v2 = vld [vmem:[%s2889_s2 + $0x8] sm:$0xff]   ;;  %v2250_v4 = vld [vmem:[%s2889_s2 + $0x10] sm:$0xff]  }
   0x2   :  { %v2247_v1 = vld [vmem:[%s2889_s2 + $0x40] sm:$0xff]   ;;  %2150 = vmatprep.subr.bf16.mxu0 %v2246_v0  ;;  %v2249_v3 = vld [vmem:[%s2889_s2 + $0x48] sm:$0xff]   ;;  %v2251_v5 = vld [vmem:[%s2889_s2 + $0x50] sm:$0xff]  }
   0x3   :  { %2198 = vmatprep.subr.bf16.mxu1 %v2247_v1  ;;  %2151 = vmatpush3.bf16.msra.mxu0 %v2246_v0  ;;  %v2252_v6 = vld [vmem:[%s2889_s2 + $0x18] sm:$0xff]   ;;  %v2254_v8 = vld [vmem:[%s2889_s2 + $0x20] sm:$0xff]   ;;  %v2256_v10 = vld [vmem:[%s2889_s2 + $0x28] sm:$0xff]  }
   0x4   :  { %2199 = vmatpush3.bf16.msra.mxu1 %v2247_v1  ;;  %2152 = vmatprep.subr.bf16.mxu0 %v2248_v2  ;;  %v2253_v7 = vld [vmem:[%s2889_s2 + $0x58] sm:$0xff]   ;;  %v2255_v9 = vld [vmem:[%s2889_s2 + $0x60] sm:$0xff]   ;;  %v2257_v12 = vld [vmem:[%s2889_s2 + $0x68] sm:$0xff]  }
   0x5   :  { %2200 = vmatprep.subr.bf16.mxu1 %v2249_v3  ;;  %v2262_v11 = vld [vmem:[%s2890_s1] sm:$0xff]   ;;  %v2258_v13 = vld [vmem:[%s2889_s2 + $0x30] sm:$0xff]   ;;  %v2260_v15 = vld [vmem:[%s2889_s2 + $0x38] sm:$0xff]  }
   0x6   :  { %2166 = vmatprep.mubr.bf16.mxu0 %v2262_v11  ;;  %2214 = vmatprep.mubr.bf16.mxu1 %v2262_v11  ;;  %v2259_v14 = vld [vmem:[%s2889_s2 + $0x70] sm:$0xff]   ;;  %v2261_v16 = vld [vmem:[%s2889_s2 + $0x78] sm:$0xff]   ;;  %v2263_v17 = vld [vmem:[%s2890_s1 + $0x8] sm:$0xff]  }
   0x7   :  { %2153 = vmatpush3.bf16.msra.mxu0 %v2248_v2  ;;  %v2264_v18 = vld [vmem:[%s2890_s1 + $0x10] sm:$0xff]   ;;  %v2265_v19 = vld [vmem:[%s2890_s1 + $0x18] sm:$0xff]   ;;  %v2266_v20 = vld [vmem:[%s2890_s1 + $0x20] sm:$0xff]  }
   0x8   :  { %2201 = vmatpush3.bf16.msra.mxu1 %v2249_v3  ;;  %2154 = vmatprep.subr.bf16.mxu0 %v2250_v4  ;;  %v2267_v21 = vld [vmem:[%s2890_s1 + $0x28] sm:$0xff]   ;;  %v2268_v22 = vld [vmem:[%s2890_s1 + $0x30] sm:$0xff]   ;;  %v2269_v23 = vld [vmem:[%s2890_s1 + $0x38] sm:$0xff]  }
   0x9   :  { %2202 = vmatprep.subr.bf16.mxu1 %v2251_v5  ;;  %v2270_v24 = vld [vmem:[%s2890_s1 + $0x40] sm:$0xff]   ;;  %v2271_v25 = vld [vmem:[%s2890_s1 + $0x48] sm:$0xff]   ;;  %v2272_v26 = vld [vmem:[%s2890_s1 + $0x50] sm:$0xff]  }
   0xa   :  { %v2273_v27 = vld [vmem:[%s2890_s1 + $0x58] sm:$0xff]   ;;  %v2274_v28 = vld [vmem:[%s2890_s1 + $0x60] sm:$0xff]   ;;  %v2275_v29 = vld [vmem:[%s2890_s1 + $0x68] sm:$0xff]  }
   0xb   :  { %2155 = vmatpush3.bf16.msra.mxu0 %v2250_v4  ;;  %v2276_v30 = vld [vmem:[%s2890_s1 + $0x70] sm:$0xff]   ;;  %v2277_v31 = vld [vmem:[%s2890_s1 + $0x78] sm:$0xff]  }
   0xc   :  { %2203 = vmatpush3.bf16.msra.mxu1 %v2251_v5  ;;  %2156 = vmatprep.subr.bf16.mxu0 %v2252_v6  ;;  %v2280_v32 = vld [vmem:[%s2891_s0 + $0x4] ss:$16 sps:$4 sm:$0xff]   ;;  %v2283_v33 = vld [vmem:[%s2891_s0 + $0xc] ss:$16 sps:$4 sm:$0xff]  }
   0xd   :  { %2204 = vmatprep.subr.bf16.mxu1 %v2253_v7 }
   0xf   :  { %2157 = vmatpush3.bf16.msra.mxu0 %v2252_v6 }
  0x10   :  { %2205 = vmatpush3.bf16.msra.mxu1 %v2253_v7  ;;  %2158 = vmatprep.subr.bf16.mxu0 %v2254_v8 }
  0x11   :  { %2206 = vmatprep.subr.bf16.mxu1 %v2255_v9 }
  0x13   :  { %2159 = vmatpush3.bf16.msra.mxu0 %v2254_v8 }
  0x14   :  { %2207 = vmatpush3.bf16.msra.mxu1 %v2255_v9  ;;  %2160 = vmatprep.subr.bf16.mxu0 %v2256_v10 }
  0x15   :  { %2208 = vmatprep.subr.bf16.mxu1 %v2257_v12 }
  0x17   :  { %2161 = vmatpush3.bf16.msra.mxu0 %v2256_v10 }
  0x18   :  { %2209 = vmatpush3.bf16.msra.mxu1 %v2257_v12  ;;  %2162 = vmatprep.subr.bf16.mxu0 %v2258_v13 }
  0x19   :  { %2210 = vmatprep.subr.bf16.mxu1 %v2259_v14 }
  0x1b   :  { %2163 = vmatpush3.bf16.msra.mxu0 %v2258_v13 }
  0x1c   :  { %2211 = vmatpush3.bf16.msra.mxu1 %v2259_v14  ;;  %2164 = vmatprep.subr.bf16.mxu0 %v2260_v15 }
  0x1d   :  { %2212 = vmatprep.subr.bf16.mxu1 %v2261_v16 }
  0x1f   :  { %2165 = vmatpush3.bf16.msra.mxu0 %v2260_v15 }
  0x20   :  { %2213 = vmatpush3.bf16.msra.mxu1 %v2261_v16 }
  0x22   :  { %2167 = vmatmul.mubr.bf16.vlgmr.msra.gmra.mrb[0].mxu0 %v2263_v17 }
  0x23   :  { %2215 = vmatmul.mubr.bf16.vlgmr.msra.gmra.mrb[0].mxu1 %v2263_v17  ;;  %2170 = vmatprep.mubr.bf16.mxu0 %v2264_v18 }
  0x24   :  { %2218 = vmatprep.mubr.bf16.mxu1 %v2264_v18 }
  0x2a   :  { %2171 = vmatmul.mubr.bf16.gmra.mrb[4].mxu0 %v2265_v19 }
  0x2b   :  { %2219 = vmatmul.mubr.bf16.gmra.mrb[4].mxu1 %v2265_v19  ;;  %2174 = vmatprep.mubr.bf16.mxu0 %v2266_v20 }
  0x2c   :  { %2222 = vmatprep.mubr.bf16.mxu1 %v2266_v20 }
  0x32   :  { %2175 = vmatmul.mubr.bf16.gmra.mrb[8].mxu0 %v2267_v21 }
  0x33   :  { %2223 = vmatmul.mubr.bf16.gmra.mrb[8].mxu1 %v2267_v21  ;;  %2178 = vmatprep.mubr.bf16.mxu0 %v2268_v22 }
  0x34   :  { %2226 = vmatprep.mubr.bf16.mxu1 %v2268_v22 }
  0x3a   :  { %2179 = vmatmul.mubr.bf16.gmra.mrb[12].mxu0 %v2269_v23 }
  0x3b   :  { %2227 = vmatmul.mubr.bf16.gmra.mrb[12].mxu1 %v2269_v23  ;;  %2182 = vmatprep.mubr.bf16.mxu0 %v2270_v24 }
  0x3c   :  { %2230 = vmatprep.mubr.bf16.mxu1 %v2270_v24 }
  0x42   :  { %2183 = vmatmul.mubr.bf16.gmra.mrb[16].mxu0 %v2271_v25 }
  0x43   :  { %2231 = vmatmul.mubr.bf16.gmra.mrb[16].mxu1 %v2271_v25  ;;  %2186 = vmatprep.mubr.bf16.mxu0 %v2272_v26 }
  0x44   :  { %2234 = vmatprep.mubr.bf16.mxu1 %v2272_v26 }
  0x4a   :  { %2187 = vmatmul.mubr.bf16.gmra.mrb[20].mxu0 %v2273_v27 }
  0x4b   :  { %2235 = vmatmul.mubr.bf16.gmra.mrb[20].mxu1 %v2273_v27  ;;  %2190 = vmatprep.mubr.bf16.mxu0 %v2274_v28 }
  0x4c   :  { %2238 = vmatprep.mubr.bf16.mxu1 %v2274_v28 }
  0x52   :  { %2191 = vmatmul.mubr.bf16.gmra.mrb[24].mxu0 %v2275_v29 }
  0x53   :  { %2239 = vmatmul.mubr.bf16.gmra.mrb[24].mxu1 %v2275_v29  ;;  %2194 = vmatprep.mubr.bf16.mxu0 %v2276_v30 }
  0x54   :  { %2242 = vmatprep.mubr.bf16.mxu1 %v2276_v30 }
  0x5a   :  { %2195 = vmatmul.mubr.bf16.gmra.mrb[28].mxu0 %v2277_v31 }
  0x5b   :  { %2243 = vmatmul.mubr.bf16.gmra.mrb[28].mxu1 %v2277_v31  ;;  %1120 = vmatprep.mubr.bf16.mxu0 %v2280_v32 }
  0x5c   :  { %1281 = vmatprep.mubr.bf16.mxu1 %v2283_v33 }
  0xf5   :  { %v2501_v34 = vpop.f32.mrb[0].mxu0 }
  0xf6   :  { %v2503_v35 = vpop.f32.mrb[0].mxu1  ;;  %v248_v36 = vpop.f32.mrb[1].mxu0 }
  0xf7   :  { %v506_v37 = vpop.f32.mrb[1].mxu1  ;;  %v2505_v38 = vpop.f32.mrb[2].mxu0 }
  0xf8   :  { %v376_v39 = vpack.c.bf16 %v2505_v38, %v2501_v34  ;;  %v2509_v40 = vpop.f32.mrb[2].mxu1  ;;  %v251_v41 = vpop.f32.mrb[3].mxu0 }
  0xf9   :  { %v634_v42 = vpack.c.bf16 %v2509_v40, %v2503_v35  ;;  %v375_v43 = vpack.c.bf16 %v251_v41, %v248_v36  ;;  %v509_v44 = vpop.f32.mrb[3].mxu1 }
  0xfa   :  { %v633_v45 = vpack.c.bf16 %v509_v44, %v506_v37 }
  0xfd   :  { %v2513_v46 = vpop.f32.mrb[4].mxu0 }
  0xfe   :  { %v2515_v47 = vpop.f32.mrb[4].mxu1  ;;  %v2517_v48 = vpop.f32.mrb[5].mxu0 }
  0xff   :  { %v2519_v49 = vpop.f32.mrb[5].mxu1  ;;  %v2521_v50 = vpop.f32.mrb[6].mxu0 }
 0x100   :  { %v378_v51 = vpack.c.bf16 %v2521_v50, %v2513_v46  ;;  %v2525_v52 = vpop.f32.mrb[6].mxu1  ;;  %v2527_v53 = vpop.f32.mrb[7].mxu0 }
 0x101   :  { %v636_v54 = vpack.c.bf16 %v2525_v52, %v2515_v47  ;;  %v377_v55 = vpack.c.bf16 %v2527_v53, %v2517_v48  ;;  %v525_v56 = vpop.f32.mrb[7].mxu1 }
 0x102   :  { %v635_v57 = vpack.c.bf16 %v525_v56, %v2519_v49 }
 0x105   :  { %v2534_v58 = vpop.f32.mrb[8].mxu0 }
 0x106   :  { %v2536_v59 = vpop.f32.mrb[8].mxu1  ;;  %v2538_v60 = vpop.f32.mrb[9].mxu0 }
 0x107   :  { %v2540_v61 = vpop.f32.mrb[9].mxu1  ;;  %v2542_v62 = vpop.f32.mrb[10].mxu0 }
 0x108   :  { %v380_v63 = vpack.c.bf16 %v2542_v62, %v2534_v58  ;;  %v2546_v0 = vpop.f32.mrb[10].mxu1  ;;  %v2548_v1 = vpop.f32.mrb[11].mxu0  ;;  %v2278_v58 = vld [vmem:[%s2891_s0] ss:$16 sps:$4 sm:$0xff]   ;;  %v2284_v62 = vld [vmem:[%s2891_s0 + $0x24] ss:$16 sps:$4 sm:$0xff]  }
 0x109   :  { %v638_v2 = vpack.c.bf16 %v2546_v0, %v2536_v59  ;;  %v379_v3 = vpack.c.bf16 %v2548_v1, %v2538_v60  ;;  %v2554_v4 = vpop.f32.mrb[11].mxu1  ;;  %v2281_v59 = vld [vmem:[%s2891_s0 + $0x8] ss:$16 sps:$4 sm:$0xff]   ;;  %v2286_v0 = vld [vmem:[%s2891_s0 + $0x20] ss:$16 sps:$4 sm:$0xff]  }
 0x10a   :  { %v637_v5 = vpack.c.bf16 %v2554_v4, %v2540_v61  ;;  %v2290_v4 = vld [vmem:[%s2891_s0 + $0x44] ss:$16 sps:$4 sm:$0xff]  }
 0x10d   :  { %v2558_v6 = vpop.f32.mrb[12].mxu0 }
 0x10e   :  { %v2560_v7 = vpop.f32.mrb[12].mxu1  ;;  %v2562_v8 = vpop.f32.mrb[13].mxu0 }
 0x10f   :  { %v2564_v9 = vpop.f32.mrb[13].mxu1  ;;  %v2566_v10 = vpop.f32.mrb[14].mxu0 }
 0x110   :  { %v382_v11 = vpack.c.bf16 %v2566_v10, %v2558_v6  ;;  %v2570_v12 = vpop.f32.mrb[14].mxu1  ;;  %v2572_v13 = vpop.f32.mrb[15].mxu0  ;;  %v2292_v6 = vld [vmem:[%s2891_s0 + $0x40] ss:$16 sps:$4 sm:$0xff]  }
 0x111   :  { %v640_v14 = vpack.c.bf16 %v2570_v12, %v2560_v7  ;;  %v381_v15 = vpack.c.bf16 %v2572_v13, %v2562_v8  ;;  %v2578_v16 = vpop.f32.mrb[15].mxu1  ;;  %v2295_v7 = vld [vmem:[%s2891_s0 + $0x48] ss:$16 sps:$4 sm:$0xff]   ;;  %v2296_v8 = vld [vmem:[%s2891_s0 + $0x64] ss:$16 sps:$4 sm:$0xff]  }
 0x112   :  { %v639_v17 = vpack.c.bf16 %v2578_v16, %v2564_v9  ;;  %v2299_v9 = vld [vmem:[%s2891_s0 + $0x6c] ss:$16 sps:$4 sm:$0xff]   ;;  %v2298_v10 = vld [vmem:[%s2891_s0 + $0x60] ss:$16 sps:$4 sm:$0xff]   ;;  %v2302_v12 = vld [vmem:[%s2891_s0 + $0x84] ss:$16 sps:$4 sm:$0xff]  }
 0x113   :  { %v2305_v13 = vld [vmem:[%s2891_s0 + $0x8c] ss:$16 sps:$4 sm:$0xff]   ;;  %v2308_v16 = vld [vmem:[%s2891_s0 + $0xa4] ss:$16 sps:$4 sm:$0xff]  }
 0x115   :  { %v2184_v18 = vpop.f32.mrb[16].mxu0 }
 0x116   :  { %v2232_v19 = vpop.f32.mrb[16].mxu1  ;;  %v312_v20 = vpop.f32.mrb[17].mxu0 }
 0x117   :  { %v570_v21 = vpop.f32.mrb[17].mxu1  ;;  %v2185_v22 = vpop.f32.mrb[18].mxu0 }
 0x118   :  { %v384_v23 = vpack.c.bf16 %v2185_v22, %v2184_v18  ;;  %v2233_v24 = vpop.f32.mrb[18].mxu1  ;;  %v315_v25 = vpop.f32.mrb[19].mxu0  ;;  %v2310_v22 = vld [vmem:[%s2891_s0 + $0xa0] ss:$16 sps:$4 sm:$0xff]  }
 0x119   :  { %v642_v26 = vpack.c.bf16 %v2233_v24, %v2232_v19  ;;  %v383_v27 = vpack.c.bf16 %v315_v25, %v312_v20  ;;  %v573_v28 = vpop.f32.mrb[19].mxu1  ;;  %v2314_v24 = vld [vmem:[%s2891_s0 + $0xc4] ss:$16 sps:$4 sm:$0xff]   ;;  %v2317_v25 = vld [vmem:[%s2891_s0 + $0xcc] ss:$16 sps:$4 sm:$0xff]  }
 0x11a   :  { %v641_v29 = vpack.c.bf16 %v573_v28, %v570_v21  ;;  %v2320_v28 = vld [vmem:[%s2891_s0 + $0xe4] ss:$16 sps:$4 sm:$0xff]  }
 0x11b   :  { %1926 = vmatprep.subr.bf16.mxu0 %v383_v27  ;;  %v2319_v27 = vld [vmem:[%s2891_s0 + $0xc8] ss:$16 sps:$4 sm:$0xff]  }
 0x11c   :  { %2038 = vmatprep.subr.bf16.mxu1 %v641_v29  ;;  %1927 = vmatpush3.bf16.msra.mxu0 %v375_v43  ;;  %v2323_v29 = vld [vmem:[%s2891_s0 + $0xec] ss:$16 sps:$4 sm:$0xff]  }
 0x11d   :  { %2039 = vmatpush3.bf16.msra.mxu1 %v633_v45  ;;  %v2188_v30 = vpop.f32.mrb[20].mxu0  ;;  %1928 = vmatprep.subr.bf16.mxu0 %v384_v23  ;;  %v2313_v23 = vld [vmem:[%s2891_s0 + $0xa8] ss:$16 sps:$4 sm:$0xff]  }
 0x11e   :  { %v2236_v31 = vpop.f32.mrb[20].mxu1  ;;  %2040 = vmatprep.subr.bf16.mxu1 %v642_v26  ;;  %v328_v32 = vpop.f32.mrb[21].mxu0  ;;  %v2316_v26 = vld [vmem:[%s2891_s0 + $0xc0] ss:$16 sps:$4 sm:$0xff]  }
 0x11f   :  { %v586_v33 = vpop.f32.mrb[21].mxu1  ;;  %v2189_v36 = vpop.f32.mrb[22].mxu0 }
 0x120   :  { %v386_v37 = vpack.c.bf16 %v2189_v36, %v2188_v30  ;;  %v2237_v41 = vpop.f32.mrb[22].mxu1  ;;  %v331_v44 = vpop.f32.mrb[23].mxu0  ;;  %1929 = vmatpush3.bf16.msra.mxu0 %v376_v39  ;;  %v2322_v30 = vld [vmem:[%s2891_s0 + $0xe0] ss:$16 sps:$4 sm:$0xff]  }
 0x121   :  { %v644_v48 = vpack.c.bf16 %v2237_v41, %v2236_v31  ;;  %v385_v49 = vpack.c.bf16 %v331_v44, %v328_v32  ;;  %v589_v53 = vpop.f32.mrb[23].mxu1  ;;  %2041 = vmatpush3.bf16.msra.mxu1 %v634_v42  ;;  %v2325_v31 = vld [vmem:[%s2891_s0 + $0xe8] ss:$16 sps:$4 sm:$0xff]   ;;  %v2326_v32 = vld [vmem:[%s2891_s0 + $0x104] ss:$16 sps:$4 sm:$0xff]  }
 0x122   :  { %v643_v43 = vpack.c.bf16 %v589_v53, %v586_v33  ;;  %v2329_v33 = vld [vmem:[%s2891_s0 + $0x10c] ss:$16 sps:$4 sm:$0xff]   ;;  %v2328_v36 = vld [vmem:[%s2891_s0 + $0x100] ss:$16 sps:$4 sm:$0xff]   ;;  %v2332_v41 = vld [vmem:[%s2891_s0 + $0x124] ss:$16 sps:$4 sm:$0xff]  }
 0x123   :  { %1930 = vmatprep.subr.bf16.mxu0 %v385_v49  ;;  %v2335_v44 = vld [vmem:[%s2891_s0 + $0x12c] ss:$16 sps:$4 sm:$0xff]   ;;  %v2337_v49 = vld [vmem:[%s2891_s0 + $0x128] ss:$16 sps:$4 sm:$0xff]   ;;  %v2338_v53 = vld [vmem:[%s2891_s0 + $0x144] ss:$16 sps:$4 sm:$0xff]  }
 0x124   :  { %2042 = vmatprep.subr.bf16.mxu1 %v643_v43  ;;  %1931 = vmatpush3.bf16.msra.mxu0 %v377_v55  ;;  %v2341_v43 = vld [vmem:[%s2891_s0 + $0x14c] ss:$16 sps:$4 sm:$0xff]  }
 0x125   :  { %2043 = vmatpush3.bf16.msra.mxu1 %v635_v57  ;;  %v2192_v45 = vpop.f32.mrb[24].mxu0  ;;  %1932 = vmatprep.subr.bf16.mxu0 %v386_v37  ;;  %v2331_v37 = vld [vmem:[%s2891_s0 + $0x108] ss:$16 sps:$4 sm:$0xff]  }
 0x126   :  { %v2240_v56 = vpop.f32.mrb[24].mxu1  ;;  %v344_v18 = vpop.f32.mrb[25].mxu0  ;;  %2044 = vmatprep.subr.bf16.mxu1 %v644_v48  ;;  %v2334_v48 = vld [vmem:[%s2891_s0 + $0x120] ss:$16 sps:$4 sm:$0xff]  }
 0x127   :  { %v602_v19 = vpop.f32.mrb[25].mxu1  ;;  %v2193_v34 = vpop.f32.mrb[26].mxu0 }
 0x128   :  { %v388_v38 = vpack.c.bf16 %v2193_v34, %v2192_v45  ;;  %v2241_v39 = vpop.f32.mrb[26].mxu1  ;;  %v347_v20 = vpop.f32.mrb[27].mxu0  ;;  %1933 = vmatpush3.bf16.msra.mxu0 %v378_v51  ;;  %v2340_v45 = vld [vmem:[%s2891_s0 + $0x140] ss:$16 sps:$4 sm:$0xff]  }
 0x129   :  { %v646_v35 = vpack.c.bf16 %v2241_v39, %v2240_v56  ;;  %v387_v40 = vpack.c.bf16 %v347_v20, %v344_v18  ;;  %v605_v42 = vpop.f32.mrb[27].mxu1  ;;  %2045 = vmatpush3.bf16.msra.mxu1 %v636_v54  ;;  %v2343_v56 = vld [vmem:[%s2891_s0 + $0x148] ss:$16 sps:$4 sm:$0xff]   ;;  %v2344_v18 = vld [vmem:[%s2891_s0 + $0x164] ss:$16 sps:$4 sm:$0xff]  }
 0x12a   :  { %v645_v55 = vpack.c.bf16 %v605_v42, %v602_v19  ;;  %v2347_v19 = vld [vmem:[%s2891_s0 + $0x16c] ss:$16 sps:$4 sm:$0xff]   ;;  %v2346_v34 = vld [vmem:[%s2891_s0 + $0x160] ss:$16 sps:$4 sm:$0xff]   ;;  %v2350_v39 = vld [vmem:[%s2891_s0 + $0x184] ss:$16 sps:$4 sm:$0xff]  }
 0x12b   :  { %1934 = vmatprep.subr.bf16.mxu0 %v387_v40  ;;  %v2353_v20 = vld [vmem:[%s2891_s0 + $0x18c] ss:$16 sps:$4 sm:$0xff]   ;;  %v2355_v40 = vld [vmem:[%s2891_s0 + $0x188] ss:$16 sps:$4 sm:$0xff]   ;;  %v2356_v42 = vld [vmem:[%s2891_s0 + $0x1a4] ss:$16 sps:$4 sm:$0xff]  }
 0x12c   :  { %2046 = vmatprep.subr.bf16.mxu1 %v645_v55  ;;  %1935 = vmatpush3.bf16.msra.mxu0 %v379_v3  ;;  %v2359_v55 = vld [vmem:[%s2891_s0 + $0x1ac] ss:$16 sps:$4 sm:$0xff]  }
 0x12d   :  { %2047 = vmatpush3.bf16.msra.mxu1 %v637_v5  ;;  %v2196_v46 = vpop.f32.mrb[28].mxu0  ;;  %1936 = vmatprep.subr.bf16.mxu0 %v388_v38  ;;  %v2293_v5 = vld [vmem:[%s2891_s0 + $0x4c] ss:$16 sps:$4 sm:$0xff]   ;;  %v2349_v38 = vld [vmem:[%s2891_s0 + $0x168] ss:$16 sps:$4 sm:$0xff]  }
 0x12e   :  { %v2244_v50 = vpop.f32.mrb[28].mxu1  ;;  %v360_v51 = vpop.f32.mrb[29].mxu0  ;;  %2048 = vmatprep.subr.bf16.mxu1 %v646_v35  ;;  %v2352_v35 = vld [vmem:[%s2891_s0 + $0x180] ss:$16 sps:$4 sm:$0xff]  }
 0x12f   :  { %v618_v57 = vpop.f32.mrb[29].mxu1  ;;  %v2197_v21 = vpop.f32.mrb[30].mxu0 }
 0x130   :  { %v390_v47 = vpack.c.bf16 %v2197_v21, %v2196_v46  ;;  %v2245_v52 = vpop.f32.mrb[30].mxu1  ;;  %v363_v54 = vpop.f32.mrb[31].mxu0  ;;  %1937 = vmatpush3.bf16.msra.mxu0 %v380_v63  ;;  %v2287_v63 = vld [vmem:[%s2891_s0 + $0x2c] ss:$16 sps:$4 sm:$0xff]   ;;  %v2358_v46 = vld [vmem:[%s2891_s0 + $0x1a0] ss:$16 sps:$4 sm:$0xff]  }
 0x131   :  { %v648_v60 = vpack.c.bf16 %v2245_v52, %v2244_v50  ;;  %v389_v1 = vpack.c.bf16 %v363_v54, %v360_v51  ;;  %v621_v3 = vpop.f32.mrb[31].mxu1  ;;  %2049 = vmatpush3.bf16.msra.mxu1 %v638_v2  ;;  %v2289_v2 = vld [vmem:[%s2891_s0 + $0x28] ss:$16 sps:$4 sm:$0xff]   ;;  %v2362_v51 = vld [vmem:[%s2891_s0 + $0x1c4] ss:$16 sps:$4 sm:$0xff]  }
 0x132   :  { %v647_v61 = vpack.c.bf16 %v621_v3, %v618_v57  ;;  %v2361_v50 = vld [vmem:[%s2891_s0 + $0x1a8] ss:$16 sps:$4 sm:$0xff]   ;;  %v2365_v57 = vld [vmem:[%s2891_s0 + $0x1cc] ss:$16 sps:$4 sm:$0xff]   ;;  %v2364_v21 = vld [vmem:[%s2891_s0 + $0x1c0] ss:$16 sps:$4 sm:$0xff]  }
 0x133   :  { %1938 = vmatprep.subr.bf16.mxu0 %v389_v1  ;;  %v2368_v52 = vld [vmem:[%s2891_s0 + $0x1e4] ss:$16 sps:$4 sm:$0xff]   ;;  %v2371_v54 = vld [vmem:[%s2891_s0 + $0x1ec] ss:$16 sps:$4 sm:$0xff]   ;;  %v2373_v1 = vld [vmem:[%s2891_s0 + $0x1e8] ss:$16 sps:$4 sm:$0xff]  }
 0x134   :  { %2050 = vmatprep.subr.bf16.mxu1 %v647_v61  ;;  %1939 = vmatpush3.bf16.msra.mxu0 %v381_v15  ;;  %v2307_v15 = vld [vmem:[%s2891_s0 + $0x88] ss:$16 sps:$4 sm:$0xff]   ;;  %v2807_v61 = vld [vmem:[%s2892_s3] ss:$0 sm:$0xff] }
 0x135   :  { %2051 = vmatpush3.bf16.msra.mxu1 %v639_v17  ;;  %1940 = vmatprep.subr.bf16.mxu0 %v390_v47  ;;  %v2311_v17 = vld [vmem:[%s2891_s0 + $0xac] ss:$16 sps:$4 sm:$0xff]   ;;  %v2367_v47 = vld [vmem:[%s2891_s0 + $0x1c8] ss:$16 sps:$4 sm:$0xff]  }
 0x136   :  { %2052 = vmatprep.subr.bf16.mxu1 %v648_v60  ;;  %v2370_v60 = vld [vmem:[%s2891_s0 + $0x1e0] ss:$16 sps:$4 sm:$0xff]  }
 0x138   :  { %1941 = vmatpush3.bf16.msra.mxu0 %v382_v11  ;;  %v2301_v11 = vld [vmem:[%s2891_s0 + $0x68] ss:$16 sps:$4 sm:$0xff]  }
 0x139   :  { %2053 = vmatpush3.bf16.msra.mxu1 %v640_v14  ;;  %v2304_v14 = vld [vmem:[%s2891_s0 + $0x80] ss:$16 sps:$4 sm:$0xff]  }
 0x13b   :  { %1121 = vmatmul.mubr.bf16.vlgmr.msra.gmra.mrb[32].mxu0 %v2278_v58 }
 0x13c   :  { %1282 = vmatmul.mubr.bf16.vlgmr.msra.gmra.mrb[32].mxu1 %v2281_v59  ;;  %1128 = vmatprep.mubr.bf16.mxu0 %v2284_v62 }
 0x13d   :  { %1289 = vmatprep.mubr.bf16.mxu1 %v2287_v63 }
 0x143   :  { %1129 = vmatmul.mubr.bf16.gmra.mrb[36].mxu0 %v2286_v0 }
 0x144   :  { %1290 = vmatmul.mubr.bf16.gmra.mrb[36].mxu1 %v2289_v2  ;;  %1136 = vmatprep.mubr.bf16.mxu0 %v2290_v4 }
 0x145   :  { %1297 = vmatprep.mubr.bf16.mxu1 %v2293_v5 }
 0x14b   :  { %1137 = vmatmul.mubr.bf16.gmra.mrb[40].mxu0 %v2292_v6 }
 0x14c   :  { %1298 = vmatmul.mubr.bf16.gmra.mrb[40].mxu1 %v2295_v7  ;;  %1144 = vmatprep.mubr.bf16.mxu0 %v2296_v8 }
 0x14d   :  { %1305 = vmatprep.mubr.bf16.mxu1 %v2299_v9 }
 0x153   :  { %1145 = vmatmul.mubr.bf16.gmra.mrb[44].mxu0 %v2298_v10 }
 0x154   :  { %1306 = vmatmul.mubr.bf16.gmra.mrb[44].mxu1 %v2301_v11  ;;  %1152 = vmatprep.mubr.bf16.mxu0 %v2302_v12 }
 0x155   :  { %1313 = vmatprep.mubr.bf16.mxu1 %v2305_v13 }
 0x15b   :  { %1153 = vmatmul.mubr.bf16.gmra.mrb[48].mxu0 %v2304_v14 }
 0x15c   :  { %1314 = vmatmul.mubr.bf16.gmra.mrb[48].mxu1 %v2307_v15  ;;  %1160 = vmatprep.mubr.bf16.mxu0 %v2308_v16 }
 0x15d   :  { %1321 = vmatprep.mubr.bf16.mxu1 %v2311_v17 }
 0x163   :  { %1161 = vmatmul.mubr.bf16.gmra.mrb[52].mxu0 %v2310_v22 }
 0x164   :  { %1322 = vmatmul.mubr.bf16.gmra.mrb[52].mxu1 %v2313_v23  ;;  %1168 = vmatprep.mubr.bf16.mxu0 %v2314_v24 }
 0x165   :  { %1329 = vmatprep.mubr.bf16.mxu1 %v2317_v25 }
 0x16b   :  { %1169 = vmatmul.mubr.bf16.gmra.mrb[56].mxu0 %v2316_v26 }
 0x16c   :  { %1330 = vmatmul.mubr.bf16.gmra.mrb[56].mxu1 %v2319_v27  ;;  %1176 = vmatprep.mubr.bf16.mxu0 %v2320_v28 }
 0x16d   :  { %1337 = vmatprep.mubr.bf16.mxu1 %v2323_v29 }
 0x173   :  { %1177 = vmatmul.mubr.bf16.gmra.mrb[60].mxu0 %v2322_v30 }
 0x174   :  { %1338 = vmatmul.mubr.bf16.gmra.mrb[60].mxu1 %v2325_v31  ;;  %1184 = vmatprep.mubr.bf16.mxu0 %v2326_v32 }
 0x175   :  { %1345 = vmatprep.mubr.bf16.mxu1 %v2329_v33 }
 0x17b   :  { %1185 = vmatmul.mubr.bf16.gmra.mrb[64].mxu0 %v2328_v36 }
 0x17c   :  { %1346 = vmatmul.mubr.bf16.gmra.mrb[64].mxu1 %v2331_v37  ;;  %1192 = vmatprep.mubr.bf16.mxu0 %v2332_v41 }
 0x17d   :  { %1353 = vmatprep.mubr.bf16.mxu1 %v2335_v44 }
 0x183   :  { %1193 = vmatmul.mubr.bf16.gmra.mrb[68].mxu0 %v2334_v48 }
 0x184   :  { %1354 = vmatmul.mubr.bf16.gmra.mrb[68].mxu1 %v2337_v49  ;;  %1200 = vmatprep.mubr.bf16.mxu0 %v2338_v53 }
 0x185   :  { %1361 = vmatprep.mubr.bf16.mxu1 %v2341_v43 }
 0x18b   :  { %1201 = vmatmul.mubr.bf16.gmra.mrb[72].mxu0 %v2340_v45 }
 0x18c   :  { %1362 = vmatmul.mubr.bf16.gmra.mrb[72].mxu1 %v2343_v56  ;;  %1208 = vmatprep.mubr.bf16.mxu0 %v2344_v18 }
 0x18d   :  { %1369 = vmatprep.mubr.bf16.mxu1 %v2347_v19 }
 0x193   :  { %1209 = vmatmul.mubr.bf16.gmra.mrb[76].mxu0 %v2346_v34 }
 0x194   :  { %1370 = vmatmul.mubr.bf16.gmra.mrb[76].mxu1 %v2349_v38  ;;  %1216 = vmatprep.mubr.bf16.mxu0 %v2350_v39 }
 0x195   :  { %1377 = vmatprep.mubr.bf16.mxu1 %v2353_v20 }
 0x19b   :  { %1217 = vmatmul.mubr.bf16.gmra.mrb[80].mxu0 %v2352_v35 }
 0x19c   :  { %1378 = vmatmul.mubr.bf16.gmra.mrb[80].mxu1 %v2355_v40  ;;  %1224 = vmatprep.mubr.bf16.mxu0 %v2356_v42 }
 0x19d   :  { %1385 = vmatprep.mubr.bf16.mxu1 %v2359_v55 }
 0x1a3   :  { %1225 = vmatmul.mubr.bf16.gmra.mrb[84].mxu0 %v2358_v46 }
 0x1a4   :  { %1386 = vmatmul.mubr.bf16.gmra.mrb[84].mxu1 %v2361_v50  ;;  %1232 = vmatprep.mubr.bf16.mxu0 %v2362_v51 }
 0x1a5   :  { %1393 = vmatprep.mubr.bf16.mxu1 %v2365_v57 }
 0x1ab   :  { %1233 = vmatmul.mubr.bf16.gmra.mrb[88].mxu0 %v2364_v21 }
 0x1ac   :  { %1394 = vmatmul.mubr.bf16.gmra.mrb[88].mxu1 %v2367_v47  ;;  %1240 = vmatprep.mubr.bf16.mxu0 %v2368_v52 }
 0x1ad   :  { %1401 = vmatprep.mubr.bf16.mxu1 %v2371_v54 }
 0x1b3   :  { %1241 = vmatmul.mubr.bf16.gmra.mrb[92].mxu0 %v2370_v60 }
 0x1b4   :  { %1402 = vmatmul.mubr.bf16.gmra.mrb[92].mxu1 %v2373_v1 }
 0x20e   :  { %v1942_v3 = vpop.f32.mrb[32].mxu0 }
 0x20f   :  { %v1943_v58 = vpop.f32.mrb[33].mxu0  ;;  %v2054_v59 = vpop.f32.mrb[32].mxu1 }
 0x210   :  { %v1944_v62 = vadd.f32 %v1943_v58, %v1942_v3  ;;  %v1945_v63 = vpop.f32.mrb[34].mxu0  ;;  %v2055_v0 = vpop.f32.mrb[33].mxu1 }
 0x211   :  { %v1946_v2 = vpop.f32.mrb[35].mxu0  ;;  %v2056_v4 = vadd.f32 %v2055_v0, %v2054_v59  ;;  %v2057_v5 = vpop.f32.mrb[34].mxu1 }
 0x212   :  { %v1123_v6 = vadd.f32 %v1944_v62, %v2807_v61  ;;  %v1947_v7 = vadd.f32 %v1946_v2, %v1945_v63  ;;  %v2058_v8 = vpop.f32.mrb[35].mxu1 }
 0x213   :  { %v2059_v9 = vadd.f32 %v2058_v8, %v2057_v5 }
 0x214   :  { %v1126_v10 = vadd.f32 %v1947_v7, %v2807_v61  ;;  %v1284_v11 = vadd.f32 %v2056_v4, %v1123_v6 }
 0x216   :  { %v1287_v12 = vadd.f32 %v2059_v9, %v1126_v10  ;;  %v1948_v13 = vpop.f32.mrb[36].mxu0  ;;  %v1410_v16 = vmax.f32 %v1284_v11, 0.0 }
 0x217   :  { %v1949_v14 = vpop.f32.mrb[37].mxu0  ;;  %v2060_v15 = vpop.f32.mrb[36].mxu1 }
 0x218   :  { %v1411_v17 = vmax.f32 %v1287_v12, 0.0  ;;  %v1950_v22 = vadd.f32 %v1949_v14, %v1948_v13  ;;  %v1951_v23 = vpop.f32.mrb[38].mxu0  ;;  %v2061_v24 = vpop.f32.mrb[37].mxu1 }
 0x219   :  { %v1952_v25 = vpop.f32.mrb[39].mxu0  ;;  %v2062_v26 = vadd.f32 %v2061_v24, %v2060_v15  ;;  %v2063_v27 = vpop.f32.mrb[38].mxu1 }
 0x21a   :  { %v1786_v28 = vpack.c.bf16 %v1411_v17, %v1410_v16  ;;  %v1131_v29 = vadd.f32 %v1950_v22, %v2807_v61  ;;  %v1953_v30 = vadd.f32 %v1952_v25, %v1951_v23  ;;  %v2064_v31 = vpop.f32.mrb[39].mxu1 }
 0x21b   :  { %v2065_v32 = vadd.f32 %v2064_v31, %v2063_v27 }
 0x21c   :  { %1787 = vst [vmem:[%s2893_s4] sm:$0xff] %v1786_v28   ;;  %v1134_v33 = vadd.f32 %v1953_v30, %v2807_v61  ;;  %v1292_v36 = vadd.f32 %v2062_v26, %v1131_v29 }
 0x21e   :  { %v1295_v37 = vadd.f32 %v2065_v32, %v1134_v33  ;;  %v1954_v41 = vpop.f32.mrb[40].mxu0  ;;  %v1412_v49 = vmax.f32 %v1292_v36, 0.0 }
 0x21f   :  { %v1955_v44 = vpop.f32.mrb[41].mxu0  ;;  %v2066_v48 = vpop.f32.mrb[40].mxu1 }
 0x220   :  { %v1413_v53 = vmax.f32 %v1295_v37, 0.0  ;;  %v1956_v43 = vadd.f32 %v1955_v44, %v1954_v41  ;;  %v1957_v45 = vpop.f32.mrb[42].mxu0  ;;  %v2067_v56 = vpop.f32.mrb[41].mxu1 }
 0x221   :  { %v1958_v18 = vpop.f32.mrb[43].mxu0  ;;  %v2068_v19 = vadd.f32 %v2067_v56, %v2066_v48  ;;  %v2069_v34 = vpop.f32.mrb[42].mxu1 }
 0x222   :  { %v1791_v38 = vpack.c.bf16 %v1413_v53, %v1412_v49  ;;  %v1139_v39 = vadd.f32 %v1956_v43, %v2807_v61  ;;  %v1959_v20 = vadd.f32 %v1958_v18, %v1957_v45  ;;  %v2070_v35 = vpop.f32.mrb[43].mxu1 }
 0x223   :  { %v2071_v40 = vadd.f32 %v2070_v35, %v2069_v34 }
 0x224   :  { %1863 = vst [vmem:[%s2893_s4 + $0x8] sm:$0xff] %v1791_v38   ;;  %v1142_v42 = vadd.f32 %v1959_v20, %v2807_v61  ;;  %v1300_v55 = vadd.f32 %v2068_v19, %v1139_v39 }
 0x226   :  { %v1303_v46 = vadd.f32 %v2071_v40, %v1142_v42  ;;  %v1960_v50 = vpop.f32.mrb[44].mxu0  ;;  %v1414_v21 = vmax.f32 %v1300_v55, 0.0 }
 0x227   :  { %v1961_v51 = vpop.f32.mrb[45].mxu0  ;;  %v2072_v57 = vpop.f32.mrb[44].mxu1 }
 0x228   :  { %v1415_v47 = vmax.f32 %v1303_v46, 0.0  ;;  %v1962_v52 = vadd.f32 %v1961_v51, %v1960_v50  ;;  %v1963_v54 = vpop.f32.mrb[46].mxu0  ;;  %v2073_v60 = vpop.f32.mrb[45].mxu1 }
 0x229   :  { %v1964_v1 = vpop.f32.mrb[47].mxu0  ;;  %v2074_v3 = vadd.f32 %v2073_v60, %v2072_v57  ;;  %v2075_v58 = vpop.f32.mrb[46].mxu1 }
 0x22a   :  { %v1796_v59 = vpack.c.bf16 %v1415_v47, %v1414_v21  ;;  %v1147_v62 = vadd.f32 %v1962_v52, %v2807_v61  ;;  %v1965_v63 = vadd.f32 %v1964_v1, %v1963_v54  ;;  %v2076_v0 = vpop.f32.mrb[47].mxu1 }
 0x22b   :  { %v2077_v2 = vadd.f32 %v2076_v0, %v2075_v58 }
 0x22c   :  { %1864 = vst [vmem:[%s2893_s4 + $0x10] sm:$0xff] %v1796_v59   ;;  %v1150_v4 = vadd.f32 %v1965_v63, %v2807_v61  ;;  %v1308_v5 = vadd.f32 %v2074_v3, %v1147_v62 }
 0x22e   :  { %v1311_v6 = vadd.f32 %v2077_v2, %v1150_v4  ;;  %v1966_v7 = vpop.f32.mrb[48].mxu0  ;;  %v1416_v10 = vmax.f32 %v1308_v5, 0.0 }
 0x22f   :  { %v1967_v8 = vpop.f32.mrb[49].mxu0  ;;  %v2078_v9 = vpop.f32.mrb[48].mxu1 }
 0x230   :  { %v1417_v11 = vmax.f32 %v1311_v6, 0.0  ;;  %v1968_v12 = vadd.f32 %v1967_v8, %v1966_v7  ;;  %v1969_v13 = vpop.f32.mrb[50].mxu0  ;;  %v2079_v14 = vpop.f32.mrb[49].mxu1 }
 0x231   :  { %v1970_v15 = vpop.f32.mrb[51].mxu0  ;;  %v2080_v16 = vadd.f32 %v2079_v14, %v2078_v9  ;;  %v2081_v17 = vpop.f32.mrb[50].mxu1 }
 0x232   :  { %v1801_v22 = vpack.c.bf16 %v1417_v11, %v1416_v10  ;;  %v1155_v23 = vadd.f32 %v1968_v12, %v2807_v61  ;;  %v1971_v24 = vadd.f32 %v1970_v15, %v1969_v13  ;;  %v2082_v25 = vpop.f32.mrb[51].mxu1 }
 0x233   :  { %v2083_v26 = vadd.f32 %v2082_v25, %v2081_v17 }
 0x234   :  { %1865 = vst [vmem:[%s2893_s4 + $0x18] sm:$0xff] %v1801_v22   ;;  %v1158_v27 = vadd.f32 %v1971_v24, %v2807_v61  ;;  %v1316_v28 = vadd.f32 %v2080_v16, %v1155_v23 }
 0x236   :  { %v1319_v29 = vadd.f32 %v2083_v26, %v1158_v27  ;;  %v1972_v30 = vpop.f32.mrb[52].mxu0  ;;  %v1418_v33 = vmax.f32 %v1316_v28, 0.0 }
 0x237   :  { %v1973_v31 = vpop.f32.mrb[53].mxu0  ;;  %v2084_v32 = vpop.f32.mrb[52].mxu1 }
 0x238   :  { %v1419_v36 = vmax.f32 %v1319_v29, 0.0  ;;  %v1974_v37 = vadd.f32 %v1973_v31, %v1972_v30  ;;  %v1975_v41 = vpop.f32.mrb[54].mxu0  ;;  %v2085_v44 = vpop.f32.mrb[53].mxu1 }
 0x239   :  { %v1976_v48 = vpop.f32.mrb[55].mxu0  ;;  %v2086_v49 = vadd.f32 %v2085_v44, %v2084_v32  ;;  %v2087_v53 = vpop.f32.mrb[54].mxu1 }
 0x23a   :  { %v1806_v43 = vpack.c.bf16 %v1419_v36, %v1418_v33  ;;  %v1163_v45 = vadd.f32 %v1974_v37, %v2807_v61  ;;  %v1977_v56 = vadd.f32 %v1976_v48, %v1975_v41  ;;  %v2088_v18 = vpop.f32.mrb[55].mxu1 }
 0x23b   :  { %v2089_v19 = vadd.f32 %v2088_v18, %v2087_v53 }
 0x23c   :  { %1866 = vst [vmem:[%s2893_s4 + $0x20] sm:$0xff] %v1806_v43   ;;  %v1166_v34 = vadd.f32 %v1977_v56, %v2807_v61  ;;  %v1324_v38 = vadd.f32 %v2086_v49, %v1163_v45 }
 0x23e   :  { %v1327_v39 = vadd.f32 %v2089_v19, %v1166_v34  ;;  %v1978_v20 = vpop.f32.mrb[56].mxu0  ;;  %v1420_v42 = vmax.f32 %v1324_v38, 0.0 }
 0x23f   :  { %v1979_v35 = vpop.f32.mrb[57].mxu0  ;;  %v2090_v40 = vpop.f32.mrb[56].mxu1 }
 0x240   :  { %v1421_v55 = vmax.f32 %v1327_v39, 0.0  ;;  %v1980_v46 = vadd.f32 %v1979_v35, %v1978_v20  ;;  %v1981_v50 = vpop.f32.mrb[58].mxu0  ;;  %v2091_v51 = vpop.f32.mrb[57].mxu1 }
 0x241   :  { %v1982_v57 = vpop.f32.mrb[59].mxu0  ;;  %v2092_v21 = vadd.f32 %v2091_v51, %v2090_v40  ;;  %v2093_v47 = vpop.f32.mrb[58].mxu1 }
 0x242   :  { %v1811_v52 = vpack.c.bf16 %v1421_v55, %v1420_v42  ;;  %v1171_v54 = vadd.f32 %v1980_v46, %v2807_v61  ;;  %v1983_v60 = vadd.f32 %v1982_v57, %v1981_v50  ;;  %v2094_v1 = vpop.f32.mrb[59].mxu1 }
 0x243   :  { %v2095_v3 = vadd.f32 %v2094_v1, %v2093_v47 }
 0x244   :  { %1867 = vst [vmem:[%s2893_s4 + $0x28] sm:$0xff] %v1811_v52   ;;  %v1174_v58 = vadd.f32 %v1983_v60, %v2807_v61  ;;  %v1332_v59 = vadd.f32 %v2092_v21, %v1171_v54 }
 0x246   :  { %v1335_v62 = vadd.f32 %v2095_v3, %v1174_v58  ;;  %v1984_v63 = vpop.f32.mrb[60].mxu0  ;;  %v1422_v4 = vmax.f32 %v1332_v59, 0.0 }
 0x247   :  { %v1985_v0 = vpop.f32.mrb[61].mxu0  ;;  %v2096_v2 = vpop.f32.mrb[60].mxu1 }
 0x248   :  { %v1423_v5 = vmax.f32 %v1335_v62, 0.0  ;;  %v1986_v6 = vadd.f32 %v1985_v0, %v1984_v63  ;;  %v1987_v7 = vpop.f32.mrb[62].mxu0  ;;  %v2097_v8 = vpop.f32.mrb[61].mxu1 }
 0x249   :  { %v1988_v9 = vpop.f32.mrb[63].mxu0  ;;  %v2098_v10 = vadd.f32 %v2097_v8, %v2096_v2  ;;  %v2099_v11 = vpop.f32.mrb[62].mxu1 }
 0x24a   :  { %v1816_v12 = vpack.c.bf16 %v1423_v5, %v1422_v4  ;;  %v1179_v13 = vadd.f32 %v1986_v6, %v2807_v61  ;;  %v1989_v14 = vadd.f32 %v1988_v9, %v1987_v7  ;;  %v2100_v15 = vpop.f32.mrb[63].mxu1 }
 0x24b   :  { %v2101_v16 = vadd.f32 %v2100_v15, %v2099_v11 }
 0x24c   :  { %1868 = vst [vmem:[%s2893_s4 + $0x30] sm:$0xff] %v1816_v12   ;;  %v1182_v17 = vadd.f32 %v1989_v14, %v2807_v61  ;;  %v1340_v22 = vadd.f32 %v2098_v10, %v1179_v13 }
 0x24e   :  { %v1343_v23 = vadd.f32 %v2101_v16, %v1182_v17  ;;  %v1990_v24 = vpop.f32.mrb[64].mxu0  ;;  %v1424_v27 = vmax.f32 %v1340_v22, 0.0 }
 0x24f   :  { %v1991_v25 = vpop.f32.mrb[65].mxu0  ;;  %v2102_v26 = vpop.f32.mrb[64].mxu1 }
 0x250   :  { %v1425_v28 = vmax.f32 %v1343_v23, 0.0  ;;  %v1992_v29 = vadd.f32 %v1991_v25, %v1990_v24  ;;  %v1993_v30 = vpop.f32.mrb[66].mxu0  ;;  %v2103_v31 = vpop.f32.mrb[65].mxu1 }
 0x251   :  { %v1994_v32 = vpop.f32.mrb[67].mxu0  ;;  %v2104_v33 = vadd.f32 %v2103_v31, %v2102_v26  ;;  %v2105_v36 = vpop.f32.mrb[66].mxu1 }
 0x252   :  { %v1821_v37 = vpack.c.bf16 %v1425_v28, %v1424_v27  ;;  %v1187_v41 = vadd.f32 %v1992_v29, %v2807_v61  ;;  %v1995_v44 = vadd.f32 %v1994_v32, %v1993_v30  ;;  %v2106_v48 = vpop.f32.mrb[67].mxu1 }
 0x253   :  { %v2107_v49 = vadd.f32 %v2106_v48, %v2105_v36 }
 0x254   :  { %1869 = vst [vmem:[%s2893_s4 + $0x38] sm:$0xff] %v1821_v37   ;;  %v1190_v53 = vadd.f32 %v1995_v44, %v2807_v61  ;;  %v1348_v43 = vadd.f32 %v2104_v33, %v1187_v41 }
 0x256   :  { %v1351_v45 = vadd.f32 %v2107_v49, %v1190_v53  ;;  %v1996_v56 = vpop.f32.mrb[68].mxu0  ;;  %v1426_v34 = vmax.f32 %v1348_v43, 0.0 }
 0x257   :  { %v1997_v18 = vpop.f32.mrb[69].mxu0  ;;  %v2108_v19 = vpop.f32.mrb[68].mxu1 }
 0x258   :  { %v1427_v38 = vmax.f32 %v1351_v45, 0.0  ;;  %v1998_v39 = vadd.f32 %v1997_v18, %v1996_v56  ;;  %v1999_v20 = vpop.f32.mrb[70].mxu0  ;;  %v2109_v35 = vpop.f32.mrb[69].mxu1 }
 0x259   :  { %v2000_v40 = vpop.f32.mrb[71].mxu0  ;;  %v2110_v42 = vadd.f32 %v2109_v35, %v2108_v19  ;;  %v2111_v55 = vpop.f32.mrb[70].mxu1 }
 0x25a   :  { %v1826_v46 = vpack.c.bf16 %v1427_v38, %v1426_v34  ;;  %v1195_v50 = vadd.f32 %v1998_v39, %v2807_v61  ;;  %v2001_v51 = vadd.f32 %v2000_v40, %v1999_v20  ;;  %v2112_v57 = vpop.f32.mrb[71].mxu1 }
 0x25b   :  { %v2113_v21 = vadd.f32 %v2112_v57, %v2111_v55 }
 0x25c   :  { %1870 = vst [vmem:[%s2893_s4 + $0x40] sm:$0xff] %v1826_v46   ;;  %v1198_v47 = vadd.f32 %v2001_v51, %v2807_v61  ;;  %v1356_v52 = vadd.f32 %v2110_v42, %v1195_v50 }
 0x25e   :  { %v1359_v54 = vadd.f32 %v2113_v21, %v1198_v47  ;;  %v2002_v60 = vpop.f32.mrb[72].mxu0  ;;  %v1428_v58 = vmax.f32 %v1356_v52, 0.0 }
 0x25f   :  { %v2003_v1 = vpop.f32.mrb[73].mxu0  ;;  %v2114_v3 = vpop.f32.mrb[72].mxu1 }
 0x260   :  { %v1429_v59 = vmax.f32 %v1359_v54, 0.0  ;;  %v2004_v62 = vadd.f32 %v2003_v1, %v2002_v60  ;;  %v2005_v63 = vpop.f32.mrb[74].mxu0  ;;  %v2115_v0 = vpop.f32.mrb[73].mxu1 }
 0x261   :  { %v2006_v2 = vpop.f32.mrb[75].mxu0  ;;  %v2116_v4 = vadd.f32 %v2115_v0, %v2114_v3  ;;  %v2117_v5 = vpop.f32.mrb[74].mxu1 }
 0x262   :  { %v1831_v6 = vpack.c.bf16 %v1429_v59, %v1428_v58  ;;  %v1203_v7 = vadd.f32 %v2004_v62, %v2807_v61  ;;  %v2007_v8 = vadd.f32 %v2006_v2, %v2005_v63  ;;  %v2118_v9 = vpop.f32.mrb[75].mxu1 }
 0x263   :  { %v2119_v10 = vadd.f32 %v2118_v9, %v2117_v5 }
 0x264   :  { %1871 = vst [vmem:[%s2893_s4 + $0x48] sm:$0xff] %v1831_v6   ;;  %v1206_v11 = vadd.f32 %v2007_v8, %v2807_v61  ;;  %v1364_v12 = vadd.f32 %v2116_v4, %v1203_v7 }
 0x266   :  { %v1367_v13 = vadd.f32 %v2119_v10, %v1206_v11  ;;  %v2008_v14 = vpop.f32.mrb[76].mxu0  ;;  %v1430_v17 = vmax.f32 %v1364_v12, 0.0 }
 0x267   :  { %v2009_v15 = vpop.f32.mrb[77].mxu0  ;;  %v2120_v16 = vpop.f32.mrb[76].mxu1 }
 0x268   :  { %v1431_v22 = vmax.f32 %v1367_v13, 0.0  ;;  %v2010_v23 = vadd.f32 %v2009_v15, %v2008_v14  ;;  %v2011_v24 = vpop.f32.mrb[78].mxu0  ;;  %v2121_v25 = vpop.f32.mrb[77].mxu1 }
 0x269   :  { %v2012_v26 = vpop.f32.mrb[79].mxu0  ;;  %v2122_v27 = vadd.f32 %v2121_v25, %v2120_v16  ;;  %v2123_v28 = vpop.f32.mrb[78].mxu1 }
 0x26a   :  { %v1836_v29 = vpack.c.bf16 %v1431_v22, %v1430_v17  ;;  %v1211_v30 = vadd.f32 %v2010_v23, %v2807_v61  ;;  %v2013_v31 = vadd.f32 %v2012_v26, %v2011_v24  ;;  %v2124_v32 = vpop.f32.mrb[79].mxu1 }
 0x26b   :  { %v2125_v33 = vadd.f32 %v2124_v32, %v2123_v28 }
 0x26c   :  { %1872 = vst [vmem:[%s2893_s4 + $0x50] sm:$0xff] %v1836_v29   ;;  %v1214_v36 = vadd.f32 %v2013_v31, %v2807_v61  ;;  %v1372_v37 = vadd.f32 %v2122_v27, %v1211_v30 }
 0x26e   :  { %v1375_v41 = vadd.f32 %v2125_v33, %v1214_v36  ;;  %v2014_v44 = vpop.f32.mrb[80].mxu0  ;;  %v1432_v53 = vmax.f32 %v1372_v37, 0.0 }
 0x26f   :  { %v2015_v48 = vpop.f32.mrb[81].mxu0  ;;  %v2126_v49 = vpop.f32.mrb[80].mxu1 }
 0x270   :  { %v1433_v43 = vmax.f32 %v1375_v41, 0.0  ;;  %v2016_v45 = vadd.f32 %v2015_v48, %v2014_v44  ;;  %v2017_v56 = vpop.f32.mrb[82].mxu0  ;;  %v2127_v18 = vpop.f32.mrb[81].mxu1 }
 0x271   :  { %v2018_v19 = vpop.f32.mrb[83].mxu0  ;;  %v2128_v34 = vadd.f32 %v2127_v18, %v2126_v49  ;;  %v2129_v38 = vpop.f32.mrb[82].mxu1 }
 0x272   :  { %v1841_v39 = vpack.c.bf16 %v1433_v43, %v1432_v53  ;;  %v1219_v20 = vadd.f32 %v2016_v45, %v2807_v61  ;;  %v2019_v35 = vadd.f32 %v2018_v19, %v2017_v56  ;;  %v2130_v40 = vpop.f32.mrb[83].mxu1 }
 0x273   :  { %v2131_v42 = vadd.f32 %v2130_v40, %v2129_v38 }
 0x274   :  { %1873 = vst [vmem:[%s2893_s4 + $0x58] sm:$0xff] %v1841_v39   ;;  %v1222_v55 = vadd.f32 %v2019_v35, %v2807_v61  ;;  %v1380_v46 = vadd.f32 %v2128_v34, %v1219_v20 }
 0x276   :  { %v1383_v50 = vadd.f32 %v2131_v42, %v1222_v55  ;;  %v2020_v51 = vpop.f32.mrb[84].mxu0  ;;  %v1434_v47 = vmax.f32 %v1380_v46, 0.0 }
 0x277   :  { %v2021_v57 = vpop.f32.mrb[85].mxu0  ;;  %v2132_v21 = vpop.f32.mrb[84].mxu1 }
 0x278   :  { %v1435_v52 = vmax.f32 %v1383_v50, 0.0  ;;  %v2022_v54 = vadd.f32 %v2021_v57, %v2020_v51  ;;  %v2023_v60 = vpop.f32.mrb[86].mxu0  ;;  %v2133_v1 = vpop.f32.mrb[85].mxu1 }
 0x279   :  { %v2024_v3 = vpop.f32.mrb[87].mxu0  ;;  %v2134_v58 = vadd.f32 %v2133_v1, %v2132_v21  ;;  %v2135_v59 = vpop.f32.mrb[86].mxu1 }
 0x27a   :  { %v1846_v62 = vpack.c.bf16 %v1435_v52, %v1434_v47  ;;  %v1227_v63 = vadd.f32 %v2022_v54, %v2807_v61  ;;  %v2025_v0 = vadd.f32 %v2024_v3, %v2023_v60  ;;  %v2136_v2 = vpop.f32.mrb[87].mxu1 }
 0x27b   :  { %v2137_v4 = vadd.f32 %v2136_v2, %v2135_v59 }
 0x27c   :  { %1874 = vst [vmem:[%s2893_s4 + $0x60] sm:$0xff] %v1846_v62   ;;  %v1230_v5 = vadd.f32 %v2025_v0, %v2807_v61  ;;  %v1388_v6 = vadd.f32 %v2134_v58, %v1227_v63 }
 0x27e   :  { %v1391_v7 = vadd.f32 %v2137_v4, %v1230_v5  ;;  %v2026_v8 = vpop.f32.mrb[88].mxu0  ;;  %v1436_v11 = vmax.f32 %v1388_v6, 0.0 }
 0x27f   :  { %v2027_v9 = vpop.f32.mrb[89].mxu0  ;;  %v2138_v10 = vpop.f32.mrb[88].mxu1 }
 0x280   :  { %v1437_v12 = vmax.f32 %v1391_v7, 0.0  ;;  %v2028_v13 = vadd.f32 %v2027_v9, %v2026_v8  ;;  %v2029_v14 = vpop.f32.mrb[90].mxu0  ;;  %v2139_v15 = vpop.f32.mrb[89].mxu1 }
 0x281   :  { %v2030_v16 = vpop.f32.mrb[91].mxu0  ;;  %v2140_v17 = vadd.f32 %v2139_v15, %v2138_v10  ;;  %v2141_v22 = vpop.f32.mrb[90].mxu1 }
 0x282   :  { %v1851_v23 = vpack.c.bf16 %v1437_v12, %v1436_v11  ;;  %v1235_v24 = vadd.f32 %v2028_v13, %v2807_v61  ;;  %v2031_v25 = vadd.f32 %v2030_v16, %v2029_v14  ;;  %v2142_v26 = vpop.f32.mrb[91].mxu1 }
 0x283   :  { %v2143_v27 = vadd.f32 %v2142_v26, %v2141_v22 }
 0x284   :  { %1875 = vst [vmem:[%s2893_s4 + $0x68] sm:$0xff] %v1851_v23   ;;  %v1238_v28 = vadd.f32 %v2031_v25, %v2807_v61  ;;  %v1396_v29 = vadd.f32 %v2140_v17, %v1235_v24 }
 0x286   :  { %v1399_v30 = vadd.f32 %v2143_v27, %v1238_v28  ;;  %v2032_v31 = vpop.f32.mrb[92].mxu0  ;;  %v1438_v36 = vmax.f32 %v1396_v29, 0.0 }
 0x287   :  { %v2033_v32 = vpop.f32.mrb[93].mxu0  ;;  %v2144_v33 = vpop.f32.mrb[92].mxu1 }
 0x288   :  { %v1439_v37 = vmax.f32 %v1399_v30, 0.0  ;;  %v2034_v41 = vadd.f32 %v2033_v32, %v2032_v31  ;;  %v2035_v44 = vpop.f32.mrb[94].mxu0  ;;  %v2145_v48 = vpop.f32.mrb[93].mxu1 }
 0x289   :  { %v2036_v49 = vpop.f32.mrb[95].mxu0  ;;  %v2146_v53 = vadd.f32 %v2145_v48, %v2144_v33  ;;  %v2147_v43 = vpop.f32.mrb[94].mxu1 }
 0x28a   :  { %v1856_v45 = vpack.c.bf16 %v1439_v37, %v1438_v36  ;;  %v1243_v56 = vadd.f32 %v2034_v41, %v2807_v61  ;;  %v2037_v18 = vadd.f32 %v2036_v49, %v2035_v44  ;;  %v2148_v19 = vpop.f32.mrb[95].mxu1 }
 0x28b   :  { %v2149_v34 = vadd.f32 %v2148_v19, %v2147_v43 }
 0x28c   :  { %1876 = vst [vmem:[%s2893_s4 + $0x70] sm:$0xff] %v1856_v45   ;;  %v1246_v38 = vadd.f32 %v2037_v18, %v2807_v61  ;;  %v1404_v39 = vadd.f32 %v2146_v53, %v1243_v56 }
 0x28e   :  { %v1407_v20 = vadd.f32 %v2149_v34, %v1246_v38  ;;  %v1440_v35 = vmax.f32 %v1404_v39, 0.0 }
 0x290   :  { %v1441_v40 = vmax.f32 %v1407_v20, 0.0 }
 0x292   :  { %v1861_v42 = vpack.c.bf16 %v1441_v40, %v1440_v35 }
 0x294   :  { %1877 = vst [vmem:[%s2893_s4 + $0x78] sm:$0xff] %v1861_v42  }

// kernel: net_forward.4
= control target key start
LH: loop header
LB: loop body
LE: loop exit
PB: predicated region body
PF: predicated region fallthrough
CT: control target
= control target key end

     0   :  { %s2618_s2 = inlined_call_operand.vmem [shape: bf16[2,128,128], index: 2, kind: input, shape index: {}]   ;;  %s2619_s1 = inlined_call_operand.vmem [shape: bf16[256,128], index: 1, kind: input, shape index: {}]   ;;  %s2620_s0 = inlined_call_operand.vmem [shape: bf16[256,512], index: 0, kind: input, shape index: {}]   ;;  %s2621_s3 = inlined_call_operand.vmem [shape: f32[1,128], index: 3, kind: input, shape index: {}]   ;;  %s2622_s4 = inlined_call_operand.vmem [shape: f32[256,128], index: 4, kind: output, shape index: {}]  }
   0x1   :  { %v1927_v0 = vld [vmem:[%s2618_s2] sm:$0xff]   ;;  %v1929_v2 = vld [vmem:[%s2618_s2 + $0x8] sm:$0xff]   ;;  %v1931_v4 = vld [vmem:[%s2618_s2 + $0x10] sm:$0xff]  }
   0x2   :  { %v1928_v1 = vld [vmem:[%s2618_s2 + $0x40] sm:$0xff]   ;;  %1831 = vmatprep.subr.bf16.mxu0 %v1927_v0  ;;  %v1930_v3 = vld [vmem:[%s2618_s2 + $0x48] sm:$0xff]   ;;  %v1932_v5 = vld [vmem:[%s2618_s2 + $0x50] sm:$0xff]  }
   0x3   :  { %1879 = vmatprep.subr.bf16.mxu1 %v1928_v1  ;;  %1832 = vmatpush3.bf16.msra.mxu0 %v1927_v0  ;;  %v1933_v6 = vld [vmem:[%s2618_s2 + $0x18] sm:$0xff]   ;;  %v1935_v8 = vld [vmem:[%s2618_s2 + $0x20] sm:$0xff]   ;;  %v1937_v10 = vld [vmem:[%s2618_s2 + $0x28] sm:$0xff]  }
   0x4   :  { %1880 = vmatpush3.bf16.msra.mxu1 %v1928_v1  ;;  %1833 = vmatprep.subr.bf16.mxu0 %v1929_v2  ;;  %v1934_v7 = vld [vmem:[%s2618_s2 + $0x58] sm:$0xff]   ;;  %v1936_v9 = vld [vmem:[%s2618_s2 + $0x60] sm:$0xff]   ;;  %v1938_v12 = vld [vmem:[%s2618_s2 + $0x68] sm:$0xff]  }
   0x5   :  { %1881 = vmatprep.subr.bf16.mxu1 %v1930_v3  ;;  %v1943_v11 = vld [vmem:[%s2619_s1] sm:$0xff]   ;;  %v1939_v13 = vld [vmem:[%s2618_s2 + $0x30] sm:$0xff]   ;;  %v1941_v15 = vld [vmem:[%s2618_s2 + $0x38] sm:$0xff]  }
   0x6   :  { %1847 = vmatprep.mubr.bf16.mxu0 %v1943_v11  ;;  %1895 = vmatprep.mubr.bf16.mxu1 %v1943_v11  ;;  %v1940_v14 = vld [vmem:[%s2618_s2 + $0x70] sm:$0xff]   ;;  %v1942_v16 = vld [vmem:[%s2618_s2 + $0x78] sm:$0xff]   ;;  %v1944_v17 = vld [vmem:[%s2619_s1 + $0x8] sm:$0xff]  }
   0x7   :  { %1834 = vmatpush3.bf16.msra.mxu0 %v1929_v2  ;;  %v1945_v18 = vld [vmem:[%s2619_s1 + $0x10] sm:$0xff]   ;;  %v1946_v19 = vld [vmem:[%s2619_s1 + $0x18] sm:$0xff]   ;;  %v1947_v20 = vld [vmem:[%s2619_s1 + $0x20] sm:$0xff]  }
   0x8   :  { %1882 = vmatpush3.bf16.msra.mxu1 %v1930_v3  ;;  %1835 = vmatprep.subr.bf16.mxu0 %v1931_v4  ;;  %v1948_v21 = vld [vmem:[%s2619_s1 + $0x28] sm:$0xff]   ;;  %v1949_v22 = vld [vmem:[%s2619_s1 + $0x30] sm:$0xff]   ;;  %v1950_v23 = vld [vmem:[%s2619_s1 + $0x38] sm:$0xff]  }
   0x9   :  { %1883 = vmatprep.subr.bf16.mxu1 %v1932_v5  ;;  %v1951_v24 = vld [vmem:[%s2619_s1 + $0x40] sm:$0xff]   ;;  %v1952_v25 = vld [vmem:[%s2619_s1 + $0x48] sm:$0xff]   ;;  %v1953_v26 = vld [vmem:[%s2619_s1 + $0x50] sm:$0xff]  }
   0xa   :  { %v1954_v27 = vld [vmem:[%s2619_s1 + $0x58] sm:$0xff]   ;;  %v1955_v28 = vld [vmem:[%s2619_s1 + $0x60] sm:$0xff]   ;;  %v1956_v29 = vld [vmem:[%s2619_s1 + $0x68] sm:$0xff]  }
   0xb   :  { %1836 = vmatpush3.bf16.msra.mxu0 %v1931_v4  ;;  %v1957_v30 = vld [vmem:[%s2619_s1 + $0x70] sm:$0xff]   ;;  %v1958_v31 = vld [vmem:[%s2619_s1 + $0x78] sm:$0xff]  }
   0xc   :  { %1884 = vmatpush3.bf16.msra.mxu1 %v1932_v5  ;;  %1837 = vmatprep.subr.bf16.mxu0 %v1933_v6  ;;  %v1961_v32 = vld [vmem:[%s2620_s0 + $0x4] ss:$16 sps:$4 sm:$0xff]   ;;  %v1964_v33 = vld [vmem:[%s2620_s0 + $0xc] ss:$16 sps:$4 sm:$0xff]  }
   0xd   :  { %1885 = vmatprep.subr.bf16.mxu1 %v1934_v7 }
   0xf   :  { %1838 = vmatpush3.bf16.msra.mxu0 %v1933_v6 }
  0x10   :  { %1886 = vmatpush3.bf16.msra.mxu1 %v1934_v7  ;;  %1839 = vmatprep.subr.bf16.mxu0 %v1935_v8 }
  0x11   :  { %1887 = vmatprep.subr.bf16.mxu1 %v1936_v9 }
  0x13   :  { %1840 = vmatpush3.bf16.msra.mxu0 %v1935_v8 }
  0x14   :  { %1888 = vmatpush3.bf16.msra.mxu1 %v1936_v9  ;;  %1841 = vmatprep.subr.bf16.mxu0 %v1937_v10 }
  0x15   :  { %1889 = vmatprep.subr.bf16.mxu1 %v1938_v12 }
  0x17   :  { %1842 = vmatpush3.bf16.msra.mxu0 %v1937_v10 }
  0x18   :  { %1890 = vmatpush3.bf16.msra.mxu1 %v1938_v12  ;;  %1843 = vmatprep.subr.bf16.mxu0 %v1939_v13 }
  0x19   :  { %1891 = vmatprep.subr.bf16.mxu1 %v1940_v14 }
  0x1b   :  { %1844 = vmatpush3.bf16.msra.mxu0 %v1939_v13 }
  0x1c   :  { %1892 = vmatpush3.bf16.msra.mxu1 %v1940_v14  ;;  %1845 = vmatprep.subr.bf16.mxu0 %v1941_v15 }
  0x1d   :  { %1893 = vmatprep.subr.bf16.mxu1 %v1942_v16 }
  0x1f   :  { %1846 = vmatpush3.bf16.msra.mxu0 %v1941_v15 }
  0x20   :  { %1894 = vmatpush3.bf16.msra.mxu1 %v1942_v16 }
  0x22   :  { %1848 = vmatmul.mubr.bf16.vlgmr.msra.gmra.mrb[0].mxu0 %v1944_v17 }
  0x23   :  { %1896 = vmatmul.mubr.bf16.vlgmr.msra.gmra.mrb[0].mxu1 %v1944_v17  ;;  %1851 = vmatprep.mubr.bf16.mxu0 %v1945_v18 }
  0x24   :  { %1899 = vmatprep.mubr.bf16.mxu1 %v1945_v18 }
  0x2a   :  { %1852 = vmatmul.mubr.bf16.gmra.mrb[4].mxu0 %v1946_v19 }
  0x2b   :  { %1900 = vmatmul.mubr.bf16.gmra.mrb[4].mxu1 %v1946_v19  ;;  %1855 = vmatprep.mubr.bf16.mxu0 %v1947_v20 }
  0x2c   :  { %1903 = vmatprep.mubr.bf16.mxu1 %v1947_v20 }
  0x32   :  { %1856 = vmatmul.mubr.bf16.gmra.mrb[8].mxu0 %v1948_v21 }
  0x33   :  { %1904 = vmatmul.mubr.bf16.gmra.mrb[8].mxu1 %v1948_v21  ;;  %1859 = vmatprep.mubr.bf16.mxu0 %v1949_v22 }
  0x34   :  { %1907 = vmatprep.mubr.bf16.mxu1 %v1949_v22 }
  0x3a   :  { %1860 = vmatmul.mubr.bf16.gmra.mrb[12].mxu0 %v1950_v23 }
  0x3b   :  { %1908 = vmatmul.mubr.bf16.gmra.mrb[12].mxu1 %v1950_v23  ;;  %1863 = vmatprep.mubr.bf16.mxu0 %v1951_v24 }
  0x3c   :  { %1911 = vmatprep.mubr.bf16.mxu1 %v1951_v24 }
  0x42   :  { %1864 = vmatmul.mubr.bf16.gmra.mrb[16].mxu0 %v1952_v25 }
  0x43   :  { %1912 = vmatmul.mubr.bf16.gmra.mrb[16].mxu1 %v1952_v25  ;;  %1867 = vmatprep.mubr.bf16.mxu0 %v1953_v26 }
  0x44   :  { %1915 = vmatprep.mubr.bf16.mxu1 %v1953_v26 }
  0x4a   :  { %1868 = vmatmul.mubr.bf16.gmra.mrb[20].mxu0 %v1954_v27 }
  0x4b   :  { %1916 = vmatmul.mubr.bf16.gmra.mrb[20].mxu1 %v1954_v27  ;;  %1871 = vmatprep.mubr.bf16.mxu0 %v1955_v28 }
  0x4c   :  { %1919 = vmatprep.mubr.bf16.mxu1 %v1955_v28 }
  0x52   :  { %1872 = vmatmul.mubr.bf16.gmra.mrb[24].mxu0 %v1956_v29 }
  0x53   :  { %1920 = vmatmul.mubr.bf16.gmra.mrb[24].mxu1 %v1956_v29  ;;  %1875 = vmatprep.mubr.bf16.mxu0 %v1957_v30 }
  0x54   :  { %1923 = vmatprep.mubr.bf16.mxu1 %v1957_v30 }
  0x5a   :  { %1876 = vmatmul.mubr.bf16.gmra.mrb[28].mxu0 %v1958_v31 }
  0x5b   :  { %1924 = vmatmul.mubr.bf16.gmra.mrb[28].mxu1 %v1958_v31  ;;  %1120 = vmatprep.mubr.bf16.mxu0 %v1961_v32 }
  0x5c   :  { %1281 = vmatprep.mubr.bf16.mxu1 %v1964_v33 }
  0xf5   :  { %v2182_v34 = vpop.f32.mrb[0].mxu0 }
  0xf6   :  { %v2184_v35 = vpop.f32.mrb[0].mxu1  ;;  %v248_v36 = vpop.f32.mrb[1].mxu0 }
  0xf7   :  { %v506_v37 = vpop.f32.mrb[1].mxu1  ;;  %v2186_v38 = vpop.f32.mrb[2].mxu0 }
  0xf8   :  { %v376_v39 = vpack.c.bf16 %v2186_v38, %v2182_v34  ;;  %v2190_v40 = vpop.f32.mrb[2].mxu1  ;;  %v251_v41 = vpop.f32.mrb[3].mxu0 }
  0xf9   :  { %v634_v42 = vpack.c.bf16 %v2190_v40, %v2184_v35  ;;  %v375_v43 = vpack.c.bf16 %v251_v41, %v248_v36  ;;  %v509_v44 = vpop.f32.mrb[3].mxu1 }
  0xfa   :  { %v633_v45 = vpack.c.bf16 %v509_v44, %v506_v37 }
  0xfd   :  { %v2194_v46 = vpop.f32.mrb[4].mxu0 }
  0xfe   :  { %v2196_v47 = vpop.f32.mrb[4].mxu1  ;;  %v2198_v48 = vpop.f32.mrb[5].mxu0 }
  0xff   :  { %v2200_v49 = vpop.f32.mrb[5].mxu1  ;;  %v2202_v50 = vpop.f32.mrb[6].mxu0 }
 0x100   :  { %v378_v51 = vpack.c.bf16 %v2202_v50, %v2194_v46  ;;  %v2206_v52 = vpop.f32.mrb[6].mxu1  ;;  %v2208_v53 = vpop.f32.mrb[7].mxu0 }
 0x101   :  { %v636_v54 = vpack.c.bf16 %v2206_v52, %v2196_v47  ;;  %v377_v55 = vpack.c.bf16 %v2208_v53, %v2198_v48  ;;  %v525_v56 = vpop.f32.mrb[7].mxu1 }
 0x102   :  { %v635_v57 = vpack.c.bf16 %v525_v56, %v2200_v49 }
 0x105   :  { %v2215_v58 = vpop.f32.mrb[8].mxu0 }
 0x106   :  { %v2217_v59 = vpop.f32.mrb[8].mxu1  ;;  %v2219_v60 = vpop.f32.mrb[9].mxu0 }
 0x107   :  { %v2221_v61 = vpop.f32.mrb[9].mxu1  ;;  %v2223_v62 = vpop.f32.mrb[10].mxu0 }
 0x108   :  { %v380_v63 = vpack.c.bf16 %v2223_v62, %v2215_v58  ;;  %v2227_v0 = vpop.f32.mrb[10].mxu1  ;;  %v2229_v1 = vpop.f32.mrb[11].mxu0  ;;  %v1959_v58 = vld [vmem:[%s2620_s0] ss:$16 sps:$4 sm:$0xff]   ;;  %v1965_v62 = vld [vmem:[%s2620_s0 + $0x24] ss:$16 sps:$4 sm:$0xff]  }
 0x109   :  { %v638_v2 = vpack.c.bf16 %v2227_v0, %v2217_v59  ;;  %v379_v3 = vpack.c.bf16 %v2229_v1, %v2219_v60  ;;  %v2235_v4 = vpop.f32.mrb[11].mxu1  ;;  %v1962_v59 = vld [vmem:[%s2620_s0 + $0x8] ss:$16 sps:$4 sm:$0xff]   ;;  %v1967_v0 = vld [vmem:[%s2620_s0 + $0x20] ss:$16 sps:$4 sm:$0xff]  }
 0x10a   :  { %v637_v5 = vpack.c.bf16 %v2235_v4, %v2221_v61  ;;  %v1971_v4 = vld [vmem:[%s2620_s0 + $0x44] ss:$16 sps:$4 sm:$0xff]  }
 0x10d   :  { %v2239_v6 = vpop.f32.mrb[12].mxu0 }
 0x10e   :  { %v2241_v7 = vpop.f32.mrb[12].mxu1  ;;  %v2243_v8 = vpop.f32.mrb[13].mxu0 }
 0x10f   :  { %v2245_v9 = vpop.f32.mrb[13].mxu1  ;;  %v2247_v10 = vpop.f32.mrb[14].mxu0 }
 0x110   :  { %v382_v11 = vpack.c.bf16 %v2247_v10, %v2239_v6  ;;  %v2251_v12 = vpop.f32.mrb[14].mxu1  ;;  %v2253_v13 = vpop.f32.mrb[15].mxu0  ;;  %v1973_v6 = vld [vmem:[%s2620_s0 + $0x40] ss:$16 sps:$4 sm:$0xff]  }
 0x111   :  { %v640_v14 = vpack.c.bf16 %v2251_v12, %v2241_v7  ;;  %v381_v15 = vpack.c.bf16 %v2253_v13, %v2243_v8  ;;  %v2259_v16 = vpop.f32.mrb[15].mxu1  ;;  %v1976_v7 = vld [vmem:[%s2620_s0 + $0x48] ss:$16 sps:$4 sm:$0xff]   ;;  %v1977_v8 = vld [vmem:[%s2620_s0 + $0x64] ss:$16 sps:$4 sm:$0xff]  }
 0x112   :  { %v639_v17 = vpack.c.bf16 %v2259_v16, %v2245_v9  ;;  %v1980_v9 = vld [vmem:[%s2620_s0 + $0x6c] ss:$16 sps:$4 sm:$0xff]   ;;  %v1979_v10 = vld [vmem:[%s2620_s0 + $0x60] ss:$16 sps:$4 sm:$0xff]   ;;  %v1983_v12 = vld [vmem:[%s2620_s0 + $0x84] ss:$16 sps:$4 sm:$0xff]  }
 0x113   :  { %v1986_v13 = vld [vmem:[%s2620_s0 + $0x8c] ss:$16 sps:$4 sm:$0xff]   ;;  %v1989_v16 = vld [vmem:[%s2620_s0 + $0xa4] ss:$16 sps:$4 sm:$0xff]  }
 0x115   :  { %v1865_v18 = vpop.f32.mrb[16].mxu0 }
 0x116   :  { %v1913_v19 = vpop.f32.mrb[16].mxu1  ;;  %v312_v20 = vpop.f32.mrb[17].mxu0 }
 0x117   :  { %v570_v21 = vpop.f32.mrb[17].mxu1  ;;  %v1866_v22 = vpop.f32.mrb[18].mxu0 }
 0x118   :  { %v384_v23 = vpack.c.bf16 %v1866_v22, %v1865_v18  ;;  %v1914_v24 = vpop.f32.mrb[18].mxu1  ;;  %v315_v25 = vpop.f32.mrb[19].mxu0  ;;  %v1991_v22 = vld [vmem:[%s2620_s0 + $0xa0] ss:$16 sps:$4 sm:$0xff]  }
 0x119   :  { %v642_v26 = vpack.c.bf16 %v1914_v24, %v1913_v19  ;;  %v383_v27 = vpack.c.bf16 %v315_v25, %v312_v20  ;;  %v573_v28 = vpop.f32.mrb[19].mxu1  ;;  %v1995_v24 = vld [vmem:[%s2620_s0 + $0xc4] ss:$16 sps:$4 sm:$0xff]   ;;  %v1998_v25 = vld [vmem:[%s2620_s0 + $0xcc] ss:$16 sps:$4 sm:$0xff]  }
 0x11a   :  { %v641_v29 = vpack.c.bf16 %v573_v28, %v570_v21  ;;  %v2001_v28 = vld [vmem:[%s2620_s0 + $0xe4] ss:$16 sps:$4 sm:$0xff]  }
 0x11b   :  { %1607 = vmatprep.subr.bf16.mxu0 %v383_v27  ;;  %v2000_v27 = vld [vmem:[%s2620_s0 + $0xc8] ss:$16 sps:$4 sm:$0xff]  }
 0x11c   :  { %1719 = vmatprep.subr.bf16.mxu1 %v641_v29  ;;  %1608 = vmatpush3.bf16.msra.mxu0 %v375_v43  ;;  %v2004_v29 = vld [vmem:[%s2620_s0 + $0xec] ss:$16 sps:$4 sm:$0xff]  }
 0x11d   :  { %1720 = vmatpush3.bf16.msra.mxu1 %v633_v45  ;;  %v1869_v30 = vpop.f32.mrb[20].mxu0  ;;  %1609 = vmatprep.subr.bf16.mxu0 %v384_v23  ;;  %v1994_v23 = vld [vmem:[%s2620_s0 + $0xa8] ss:$16 sps:$4 sm:$0xff]  }
 0x11e   :  { %v1917_v31 = vpop.f32.mrb[20].mxu1  ;;  %1721 = vmatprep.subr.bf16.mxu1 %v642_v26  ;;  %v328_v32 = vpop.f32.mrb[21].mxu0  ;;  %v1997_v26 = vld [vmem:[%s2620_s0 + $0xc0] ss:$16 sps:$4 sm:$0xff]  }
 0x11f   :  { %v586_v33 = vpop.f32.mrb[21].mxu1  ;;  %v1870_v36 = vpop.f32.mrb[22].mxu0 }
 0x120   :  { %v386_v37 = vpack.c.bf16 %v1870_v36, %v1869_v30  ;;  %v1918_v41 = vpop.f32.mrb[22].mxu1  ;;  %v331_v44 = vpop.f32.mrb[23].mxu0  ;;  %1610 = vmatpush3.bf16.msra.mxu0 %v376_v39  ;;  %v2003_v30 = vld [vmem:[%s2620_s0 + $0xe0] ss:$16 sps:$4 sm:$0xff]  }
 0x121   :  { %v644_v48 = vpack.c.bf16 %v1918_v41, %v1917_v31  ;;  %v385_v49 = vpack.c.bf16 %v331_v44, %v328_v32  ;;  %v589_v53 = vpop.f32.mrb[23].mxu1  ;;  %1722 = vmatpush3.bf16.msra.mxu1 %v634_v42  ;;  %v2006_v31 = vld [vmem:[%s2620_s0 + $0xe8] ss:$16 sps:$4 sm:$0xff]   ;;  %v2007_v32 = vld [vmem:[%s2620_s0 + $0x104] ss:$16 sps:$4 sm:$0xff]  }
 0x122   :  { %v643_v43 = vpack.c.bf16 %v589_v53, %v586_v33  ;;  %v2010_v33 = vld [vmem:[%s2620_s0 + $0x10c] ss:$16 sps:$4 sm:$0xff]   ;;  %v2009_v36 = vld [vmem:[%s2620_s0 + $0x100] ss:$16 sps:$4 sm:$0xff]   ;;  %v2013_v41 = vld [vmem:[%s2620_s0 + $0x124] ss:$16 sps:$4 sm:$0xff]  }
 0x123   :  { %1611 = vmatprep.subr.bf16.mxu0 %v385_v49  ;;  %v2016_v44 = vld [vmem:[%s2620_s0 + $0x12c] ss:$16 sps:$4 sm:$0xff]   ;;  %v2018_v49 = vld [vmem:[%s2620_s0 + $0x128] ss:$16 sps:$4 sm:$0xff]   ;;  %v2019_v53 = vld [vmem:[%s2620_s0 + $0x144] ss:$16 sps:$4 sm:$0xff]  }
 0x124   :  { %1723 = vmatprep.subr.bf16.mxu1 %v643_v43  ;;  %1612 = vmatpush3.bf16.msra.mxu0 %v377_v55  ;;  %v2022_v43 = vld [vmem:[%s2620_s0 + $0x14c] ss:$16 sps:$4 sm:$0xff]  }
 0x125   :  { %1724 = vmatpush3.bf16.msra.mxu1 %v635_v57  ;;  %v1873_v45 = vpop.f32.mrb[24].mxu0  ;;  %1613 = vmatprep.subr.bf16.mxu0 %v386_v37  ;;  %v2012_v37 = vld [vmem:[%s2620_s0 + $0x108] ss:$16 sps:$4 sm:$0xff]  }
 0x126   :  { %v1921_v56 = vpop.f32.mrb[24].mxu1  ;;  %v344_v18 = vpop.f32.mrb[25].mxu0  ;;  %1725 = vmatprep.subr.bf16.mxu1 %v644_v48  ;;  %v2015_v48 = vld [vmem:[%s2620_s0 + $0x120] ss:$16 sps:$4 sm:$0xff]  }
 0x127   :  { %v602_v19 = vpop.f32.mrb[25].mxu1  ;;  %v1874_v34 = vpop.f32.mrb[26].mxu0 }
 0x128   :  { %v388_v38 = vpack.c.bf16 %v1874_v34, %v1873_v45  ;;  %v1922_v39 = vpop.f32.mrb[26].mxu1  ;;  %v347_v20 = vpop.f32.mrb[27].mxu0  ;;  %1614 = vmatpush3.bf16.msra.mxu0 %v378_v51  ;;  %v2021_v45 = vld [vmem:[%s2620_s0 + $0x140] ss:$16 sps:$4 sm:$0xff]  }
 0x129   :  { %v646_v35 = vpack.c.bf16 %v1922_v39, %v1921_v56  ;;  %v387_v40 = vpack.c.bf16 %v347_v20, %v344_v18  ;;  %v605_v42 = vpop.f32.mrb[27].mxu1  ;;  %1726 = vmatpush3.bf16.msra.mxu1 %v636_v54  ;;  %v2024_v56 = vld [vmem:[%s2620_s0 + $0x148] ss:$16 sps:$4 sm:$0xff]   ;;  %v2025_v18 = vld [vmem:[%s2620_s0 + $0x164] ss:$16 sps:$4 sm:$0xff]  }
 0x12a   :  { %v645_v55 = vpack.c.bf16 %v605_v42, %v602_v19  ;;  %v2028_v19 = vld [vmem:[%s2620_s0 + $0x16c] ss:$16 sps:$4 sm:$0xff]   ;;  %v2027_v34 = vld [vmem:[%s2620_s0 + $0x160] ss:$16 sps:$4 sm:$0xff]   ;;  %v2031_v39 = vld [vmem:[%s2620_s0 + $0x184] ss:$16 sps:$4 sm:$0xff]  }
 0x12b   :  { %1615 = vmatprep.subr.bf16.mxu0 %v387_v40  ;;  %v2034_v20 = vld [vmem:[%s2620_s0 + $0x18c] ss:$16 sps:$4 sm:$0xff]   ;;  %v2036_v40 = vld [vmem:[%s2620_s0 + $0x188] ss:$16 sps:$4 sm:$0xff]   ;;  %v2037_v42 = vld [vmem:[%s2620_s0 + $0x1a4] ss:$16 sps:$4 sm:$0xff]  }
 0x12c   :  { %1727 = vmatprep.subr.bf16.mxu1 %v645_v55  ;;  %1616 = vmatpush3.bf16.msra.mxu0 %v379_v3  ;;  %v2040_v55 = vld [vmem:[%s2620_s0 + $0x1ac] ss:$16 sps:$4 sm:$0xff]  }
 0x12d   :  { %1728 = vmatpush3.bf16.msra.mxu1 %v637_v5  ;;  %v1877_v46 = vpop.f32.mrb[28].mxu0  ;;  %1617 = vmatprep.subr.bf16.mxu0 %v388_v38  ;;  %v1974_v5 = vld [vmem:[%s2620_s0 + $0x4c] ss:$16 sps:$4 sm:$0xff]   ;;  %v2030_v38 = vld [vmem:[%s2620_s0 + $0x168] ss:$16 sps:$4 sm:$0xff]  }
 0x12e   :  { %v1925_v50 = vpop.f32.mrb[28].mxu1  ;;  %v360_v51 = vpop.f32.mrb[29].mxu0  ;;  %1729 = vmatprep.subr.bf16.mxu1 %v646_v35  ;;  %v2033_v35 = vld [vmem:[%s2620_s0 + $0x180] ss:$16 sps:$4 sm:$0xff]  }
 0x12f   :  { %v618_v57 = vpop.f32.mrb[29].mxu1  ;;  %v1878_v21 = vpop.f32.mrb[30].mxu0 }
 0x130   :  { %v390_v47 = vpack.c.bf16 %v1878_v21, %v1877_v46  ;;  %v1926_v52 = vpop.f32.mrb[30].mxu1  ;;  %v363_v54 = vpop.f32.mrb[31].mxu0  ;;  %1618 = vmatpush3.bf16.msra.mxu0 %v380_v63  ;;  %v1968_v63 = vld [vmem:[%s2620_s0 + $0x2c] ss:$16 sps:$4 sm:$0xff]   ;;  %v2039_v46 = vld [vmem:[%s2620_s0 + $0x1a0] ss:$16 sps:$4 sm:$0xff]  }
 0x131   :  { %v648_v60 = vpack.c.bf16 %v1926_v52, %v1925_v50  ;;  %v389_v1 = vpack.c.bf16 %v363_v54, %v360_v51  ;;  %v621_v3 = vpop.f32.mrb[31].mxu1  ;;  %1730 = vmatpush3.bf16.msra.mxu1 %v638_v2  ;;  %v1970_v2 = vld [vmem:[%s2620_s0 + $0x28] ss:$16 sps:$4 sm:$0xff]   ;;  %v2043_v51 = vld [vmem:[%s2620_s0 + $0x1c4] ss:$16 sps:$4 sm:$0xff]  }
 0x132   :  { %v647_v61 = vpack.c.bf16 %v621_v3, %v618_v57  ;;  %v2042_v50 = vld [vmem:[%s2620_s0 + $0x1a8] ss:$16 sps:$4 sm:$0xff]   ;;  %v2046_v57 = vld [vmem:[%s2620_s0 + $0x1cc] ss:$16 sps:$4 sm:$0xff]   ;;  %v2045_v21 = vld [vmem:[%s2620_s0 + $0x1c0] ss:$16 sps:$4 sm:$0xff]  }
 0x133   :  { %1619 = vmatprep.subr.bf16.mxu0 %v389_v1  ;;  %v2049_v52 = vld [vmem:[%s2620_s0 + $0x1e4] ss:$16 sps:$4 sm:$0xff]   ;;  %v2052_v54 = vld [vmem:[%s2620_s0 + $0x1ec] ss:$16 sps:$4 sm:$0xff]   ;;  %v2054_v1 = vld [vmem:[%s2620_s0 + $0x1e8] ss:$16 sps:$4 sm:$0xff]  }
 0x134   :  { %1731 = vmatprep.subr.bf16.mxu1 %v647_v61  ;;  %1620 = vmatpush3.bf16.msra.mxu0 %v381_v15  ;;  %v1988_v15 = vld [vmem:[%s2620_s0 + $0x88] ss:$16 sps:$4 sm:$0xff]   ;;  %v2488_v61 = vld [vmem:[%s2621_s3] ss:$0 sm:$0xff] }
 0x135   :  { %1732 = vmatpush3.bf16.msra.mxu1 %v639_v17  ;;  %1621 = vmatprep.subr.bf16.mxu0 %v390_v47  ;;  %v1992_v17 = vld [vmem:[%s2620_s0 + $0xac] ss:$16 sps:$4 sm:$0xff]   ;;  %v2048_v47 = vld [vmem:[%s2620_s0 + $0x1c8] ss:$16 sps:$4 sm:$0xff]  }
 0x136   :  { %1733 = vmatprep.subr.bf16.mxu1 %v648_v60  ;;  %v2051_v60 = vld [vmem:[%s2620_s0 + $0x1e0] ss:$16 sps:$4 sm:$0xff]  }
 0x138   :  { %1622 = vmatpush3.bf16.msra.mxu0 %v382_v11  ;;  %v1982_v11 = vld [vmem:[%s2620_s0 + $0x68] ss:$16 sps:$4 sm:$0xff]  }
 0x139   :  { %1734 = vmatpush3.bf16.msra.mxu1 %v640_v14  ;;  %v1985_v14 = vld [vmem:[%s2620_s0 + $0x80] ss:$16 sps:$4 sm:$0xff]  }
 0x13b   :  { %1121 = vmatmul.mubr.bf16.vlgmr.msra.gmra.mrb[32].mxu0 %v1959_v58 }
 0x13c   :  { %1282 = vmatmul.mubr.bf16.vlgmr.msra.gmra.mrb[32].mxu1 %v1962_v59  ;;  %1128 = vmatprep.mubr.bf16.mxu0 %v1965_v62 }
 0x13d   :  { %1289 = vmatprep.mubr.bf16.mxu1 %v1968_v63 }
 0x143   :  { %1129 = vmatmul.mubr.bf16.gmra.mrb[36].mxu0 %v1967_v0 }
 0x144   :  { %1290 = vmatmul.mubr.bf16.gmra.mrb[36].mxu1 %v1970_v2  ;;  %1136 = vmatprep.mubr.bf16.mxu0 %v1971_v4 }
 0x145   :  { %1297 = vmatprep.mubr.bf16.mxu1 %v1974_v5 }
 0x14b   :  { %1137 = vmatmul.mubr.bf16.gmra.mrb[40].mxu0 %v1973_v6 }
 0x14c   :  { %1298 = vmatmul.mubr.bf16.gmra.mrb[40].mxu1 %v1976_v7  ;;  %1144 = vmatprep.mubr.bf16.mxu0 %v1977_v8 }
 0x14d   :  { %1305 = vmatprep.mubr.bf16.mxu1 %v1980_v9 }
 0x153   :  { %1145 = vmatmul.mubr.bf16.gmra.mrb[44].mxu0 %v1979_v10 }
 0x154   :  { %1306 = vmatmul.mubr.bf16.gmra.mrb[44].mxu1 %v1982_v11  ;;  %1152 = vmatprep.mubr.bf16.mxu0 %v1983_v12 }
 0x155   :  { %1313 = vmatprep.mubr.bf16.mxu1 %v1986_v13 }
 0x15b   :  { %1153 = vmatmul.mubr.bf16.gmra.mrb[48].mxu0 %v1985_v14 }
 0x15c   :  { %1314 = vmatmul.mubr.bf16.gmra.mrb[48].mxu1 %v1988_v15  ;;  %1160 = vmatprep.mubr.bf16.mxu0 %v1989_v16 }
 0x15d   :  { %1321 = vmatprep.mubr.bf16.mxu1 %v1992_v17 }
 0x163   :  { %1161 = vmatmul.mubr.bf16.gmra.mrb[52].mxu0 %v1991_v22 }
 0x164   :  { %1322 = vmatmul.mubr.bf16.gmra.mrb[52].mxu1 %v1994_v23  ;;  %1168 = vmatprep.mubr.bf16.mxu0 %v1995_v24 }
 0x165   :  { %1329 = vmatprep.mubr.bf16.mxu1 %v1998_v25 }
 0x16b   :  { %1169 = vmatmul.mubr.bf16.gmra.mrb[56].mxu0 %v1997_v26 }
 0x16c   :  { %1330 = vmatmul.mubr.bf16.gmra.mrb[56].mxu1 %v2000_v27  ;;  %1176 = vmatprep.mubr.bf16.mxu0 %v2001_v28 }
 0x16d   :  { %1337 = vmatprep.mubr.bf16.mxu1 %v2004_v29 }
 0x173   :  { %1177 = vmatmul.mubr.bf16.gmra.mrb[60].mxu0 %v2003_v30 }
 0x174   :  { %1338 = vmatmul.mubr.bf16.gmra.mrb[60].mxu1 %v2006_v31  ;;  %1184 = vmatprep.mubr.bf16.mxu0 %v2007_v32 }
 0x175   :  { %1345 = vmatprep.mubr.bf16.mxu1 %v2010_v33 }
 0x17b   :  { %1185 = vmatmul.mubr.bf16.gmra.mrb[64].mxu0 %v2009_v36 }
 0x17c   :  { %1346 = vmatmul.mubr.bf16.gmra.mrb[64].mxu1 %v2012_v37  ;;  %1192 = vmatprep.mubr.bf16.mxu0 %v2013_v41 }
 0x17d   :  { %1353 = vmatprep.mubr.bf16.mxu1 %v2016_v44 }
 0x183   :  { %1193 = vmatmul.mubr.bf16.gmra.mrb[68].mxu0 %v2015_v48 }
 0x184   :  { %1354 = vmatmul.mubr.bf16.gmra.mrb[68].mxu1 %v2018_v49  ;;  %1200 = vmatprep.mubr.bf16.mxu0 %v2019_v53 }
 0x185   :  { %1361 = vmatprep.mubr.bf16.mxu1 %v2022_v43 }
 0x18b   :  { %1201 = vmatmul.mubr.bf16.gmra.mrb[72].mxu0 %v2021_v45 }
 0x18c   :  { %1362 = vmatmul.mubr.bf16.gmra.mrb[72].mxu1 %v2024_v56  ;;  %1208 = vmatprep.mubr.bf16.mxu0 %v2025_v18 }
 0x18d   :  { %1369 = vmatprep.mubr.bf16.mxu1 %v2028_v19 }
 0x193   :  { %1209 = vmatmul.mubr.bf16.gmra.mrb[76].mxu0 %v2027_v34 }
 0x194   :  { %1370 = vmatmul.mubr.bf16.gmra.mrb[76].mxu1 %v2030_v38  ;;  %1216 = vmatprep.mubr.bf16.mxu0 %v2031_v39 }
 0x195   :  { %1377 = vmatprep.mubr.bf16.mxu1 %v2034_v20 }
 0x19b   :  { %1217 = vmatmul.mubr.bf16.gmra.mrb[80].mxu0 %v2033_v35 }
 0x19c   :  { %1378 = vmatmul.mubr.bf16.gmra.mrb[80].mxu1 %v2036_v40  ;;  %1224 = vmatprep.mubr.bf16.mxu0 %v2037_v42 }
 0x19d   :  { %1385 = vmatprep.mubr.bf16.mxu1 %v2040_v55 }
 0x1a3   :  { %1225 = vmatmul.mubr.bf16.gmra.mrb[84].mxu0 %v2039_v46 }
 0x1a4   :  { %1386 = vmatmul.mubr.bf16.gmra.mrb[84].mxu1 %v2042_v50  ;;  %1232 = vmatprep.mubr.bf16.mxu0 %v2043_v51 }
 0x1a5   :  { %1393 = vmatprep.mubr.bf16.mxu1 %v2046_v57 }
 0x1ab   :  { %1233 = vmatmul.mubr.bf16.gmra.mrb[88].mxu0 %v2045_v21 }
 0x1ac   :  { %1394 = vmatmul.mubr.bf16.gmra.mrb[88].mxu1 %v2048_v47  ;;  %1240 = vmatprep.mubr.bf16.mxu0 %v2049_v52 }
 0x1ad   :  { %1401 = vmatprep.mubr.bf16.mxu1 %v2052_v54 }
 0x1b3   :  { %1241 = vmatmul.mubr.bf16.gmra.mrb[92].mxu0 %v2051_v60 }
 0x1b4   :  { %1402 = vmatmul.mubr.bf16.gmra.mrb[92].mxu1 %v2054_v1 }
 0x20e   :  { %v1623_v3 = vpop.f32.mrb[32].mxu0 }
 0x20f   :  { %v1624_v58 = vpop.f32.mrb[33].mxu0  ;;  %v1735_v59 = vpop.f32.mrb[32].mxu1 }
 0x210   :  { %v1625_v62 = vadd.f32 %v1624_v58, %v1623_v3  ;;  %v1626_v63 = vpop.f32.mrb[34].mxu0  ;;  %v1736_v0 = vpop.f32.mrb[33].mxu1 }
 0x211   :  { %v1627_v2 = vpop.f32.mrb[35].mxu0  ;;  %v1737_v4 = vadd.f32 %v1736_v0, %v1735_v59  ;;  %v1738_v5 = vpop.f32.mrb[34].mxu1 }
 0x212   :  { %v1123_v6 = vadd.f32 %v1625_v62, %v2488_v61  ;;  %v1628_v7 = vadd.f32 %v1627_v2, %v1626_v63  ;;  %v1739_v8 = vpop.f32.mrb[35].mxu1 }
 0x213   :  { %v1740_v9 = vadd.f32 %v1739_v8, %v1738_v5 }
 0x214   :  { %v1126_v10 = vadd.f32 %v1628_v7, %v2488_v61  ;;  %v1284_v11 = vadd.f32 %v1737_v4, %v1123_v6 }
 0x216   :  { %1410 = vst [vmem:[%s2622_s4] sm:$0xff] %v1284_v11  ;;  %v1287_v12 = vadd.f32 %v1740_v9, %v1126_v10  ;;  %v1629_v13 = vpop.f32.mrb[36].mxu0 }
 0x217   :  { %v1630_v14 = vpop.f32.mrb[37].mxu0  ;;  %v1741_v15 = vpop.f32.mrb[36].mxu1 }
 0x218   :  { %1411 = vst [vmem:[%s2622_s4 + $0x8] sm:$0xff] %v1287_v12  ;;  %v1631_v16 = vadd.f32 %v1630_v14, %v1629_v13  ;;  %v1632_v17 = vpop.f32.mrb[38].mxu0  ;;  %v1742_v22 = vpop.f32.mrb[37].mxu1 }
 0x219   :  { %v1633_v23 = vpop.f32.mrb[39].mxu0  ;;  %v1743_v24 = vadd.f32 %v1742_v22, %v1741_v15  ;;  %v1744_v25 = vpop.f32.mrb[38].mxu1 }
 0x21a   :  { %v1131_v26 = vadd.f32 %v1631_v16, %v2488_v61  ;;  %v1634_v27 = vadd.f32 %v1633_v23, %v1632_v17  ;;  %v1745_v28 = vpop.f32.mrb[39].mxu1 }
 0x21b   :  { %v1746_v29 = vadd.f32 %v1745_v28, %v1744_v25 }
 0x21c   :  { %v1134_v30 = vadd.f32 %v1634_v27, %v2488_v61  ;;  %v1292_v31 = vadd.f32 %v1743_v24, %v1131_v26 }
 0x21e   :  { %1412 = vst [vmem:[%s2622_s4 + $0x10] sm:$0xff] %v1292_v31  ;;  %v1295_v32 = vadd.f32 %v1746_v29, %v1134_v30  ;;  %v1635_v33 = vpop.f32.mrb[40].mxu0 }
 0x21f   :  { %v1636_v36 = vpop.f32.mrb[41].mxu0  ;;  %v1747_v37 = vpop.f32.mrb[40].mxu1 }
 0x220   :  { %1413 = vst [vmem:[%s2622_s4 + $0x18] sm:$0xff] %v1295_v32  ;;  %v1637_v41 = vadd.f32 %v1636_v36, %v1635_v33  ;;  %v1638_v44 = vpop.f32.mrb[42].mxu0  ;;  %v1748_v48 = vpop.f32.mrb[41].mxu1 }
 0x221   :  { %v1639_v49 = vpop.f32.mrb[43].mxu0  ;;  %v1749_v53 = vadd.f32 %v1748_v48, %v1747_v37  ;;  %v1750_v43 = vpop.f32.mrb[42].mxu1 }
 0x222   :  { %v1139_v45 = vadd.f32 %v1637_v41, %v2488_v61  ;;  %v1640_v56 = vadd.f32 %v1639_v49, %v1638_v44  ;;  %v1751_v18 = vpop.f32.mrb[43].mxu1 }
 0x223   :  { %v1752_v19 = vadd.f32 %v1751_v18, %v1750_v43 }
 0x224   :  { %v1142_v34 = vadd.f32 %v1640_v56, %v2488_v61  ;;  %v1300_v38 = vadd.f32 %v1749_v53, %v1139_v45 }
 0x226   :  { %1414 = vst [vmem:[%s2622_s4 + $0x20] sm:$0xff] %v1300_v38  ;;  %v1303_v39 = vadd.f32 %v1752_v19, %v1142_v34  ;;  %v1641_v20 = vpop.f32.mrb[44].mxu0 }
 0x227   :  { %v1642_v35 = vpop.f32.mrb[45].mxu0  ;;  %v1753_v40 = vpop.f32.mrb[44].mxu1 }
 0x228   :  { %1415 = vst [vmem:[%s2622_s4 + $0x28] sm:$0xff] %v1303_v39  ;;  %v1643_v42 = vadd.f32 %v1642_v35, %v1641_v20  ;;  %v1644_v55 = vpop.f32.mrb[46].mxu0  ;;  %v1754_v46 = vpop.f32.mrb[45].mxu1 }
 0x229   :  { %v1645_v50 = vpop.f32.mrb[47].mxu0  ;;  %v1755_v51 = vadd.f32 %v1754_v46, %v1753_v40  ;;  %v1756_v57 = vpop.f32.mrb[46].mxu1 }
 0x22a   :  { %v1147_v21 = vadd.f32 %v1643_v42, %v2488_v61  ;;  %v1646_v47 = vadd.f32 %v1645_v50, %v1644_v55  ;;  %v1757_v52 = vpop.f32.mrb[47].mxu1 }
 0x22b   :  { %v1758_v54 = vadd.f32 %v1757_v52, %v1756_v57 }
 0x22c   :  { %v1150_v60 = vadd.f32 %v1646_v47, %v2488_v61  ;;  %v1308_v1 = vadd.f32 %v1755_v51, %v1147_v21 }
 0x22e   :  { %1416 = vst [vmem:[%s2622_s4 + $0x30] sm:$0xff] %v1308_v1  ;;  %v1311_v3 = vadd.f32 %v1758_v54, %v1150_v60  ;;  %v1647_v58 = vpop.f32.mrb[48].mxu0 }
 0x22f   :  { %v1648_v59 = vpop.f32.mrb[49].mxu0  ;;  %v1759_v62 = vpop.f32.mrb[48].mxu1 }
 0x230   :  { %1417 = vst [vmem:[%s2622_s4 + $0x38] sm:$0xff] %v1311_v3  ;;  %v1649_v63 = vadd.f32 %v1648_v59, %v1647_v58  ;;  %v1650_v0 = vpop.f32.mrb[50].mxu0  ;;  %v1760_v2 = vpop.f32.mrb[49].mxu1 }
 0x231   :  { %v1651_v4 = vpop.f32.mrb[51].mxu0  ;;  %v1761_v5 = vadd.f32 %v1760_v2, %v1759_v62  ;;  %v1762_v6 = vpop.f32.mrb[50].mxu1 }
 0x232   :  { %v1155_v7 = vadd.f32 %v1649_v63, %v2488_v61  ;;  %v1652_v8 = vadd.f32 %v1651_v4, %v1650_v0  ;;  %v1763_v9 = vpop.f32.mrb[51].mxu1 }
 0x233   :  { %v1764_v10 = vadd.f32 %v1763_v9, %v1762_v6 }
 0x234   :  { %v1158_v11 = vadd.f32 %v1652_v8, %v2488_v61  ;;  %v1316_v12 = vadd.f32 %v1761_v5, %v1155_v7 }
 0x236   :  { %1418 = vst [vmem:[%s2622_s4 + $0x40] sm:$0xff] %v1316_v12  ;;  %v1319_v13 = vadd.f32 %v1764_v10, %v1158_v11  ;;  %v1653_v14 = vpop.f32.mrb[52].mxu0 }
 0x237   :  { %v1654_v15 = vpop.f32.mrb[53].mxu0  ;;  %v1765_v16 = vpop.f32.mrb[52].mxu1 }
 0x238   :  { %1419 = vst [vmem:[%s2622_s4 + $0x48] sm:$0xff] %v1319_v13  ;;  %v1655_v17 = vadd.f32 %v1654_v15, %v1653_v14  ;;  %v1656_v22 = vpop.f32.mrb[54].mxu0  ;;  %v1766_v23 = vpop.f32.mrb[53].mxu1 }
 0x239   :  { %v1657_v24 = vpop.f32.mrb[55].mxu0  ;;  %v1767_v25 = vadd.f32 %v1766_v23, %v1765_v16  ;;  %v1768_v26 = vpop.f32.mrb[54].mxu1 }
 0x23a   :  { %v1163_v27 = vadd.f32 %v1655_v17, %v2488_v61  ;;  %v1658_v28 = vadd.f32 %v1657_v24, %v1656_v22  ;;  %v1769_v29 = vpop.f32.mrb[55].mxu1 }
 0x23b   :  { %v1770_v30 = vadd.f32 %v1769_v29, %v1768_v26 }
 0x23c   :  { %v1166_v31 = vadd.f32 %v1658_v28, %v2488_v61  ;;  %v1324_v32 = vadd.f32 %v1767_v25, %v1163_v27 }
 0x23e   :  { %1420 = vst [vmem:[%s2622_s4 + $0x50] sm:$0xff] %v1324_v32  ;;  %v1327_v33 = vadd.f32 %v1770_v30, %v1166_v31  ;;  %v1659_v36 = vpop.f32.mrb[56].mxu0 }
 0x23f   :  { %v1660_v37 = vpop.f32.mrb[57].mxu0  ;;  %v1771_v41 = vpop.f32.mrb[56].mxu1 }
 0x240   :  { %1421 = vst [vmem:[%s2622_s4 + $0x58] sm:$0xff] %v1327_v33  ;;  %v1661_v44 = vadd.f32 %v1660_v37, %v1659_v36  ;;  %v1662_v48 = vpop.f32.mrb[58].mxu0  ;;  %v1772_v49 = vpop.f32.mrb[57].mxu1 }
 0x241   :  { %v1663_v53 = vpop.f32.mrb[59].mxu0  ;;  %v1773_v43 = vadd.f32 %v1772_v49, %v1771_v41  ;;  %v1774_v45 = vpop.f32.mrb[58].mxu1 }
 0x242   :  { %v1171_v56 = vadd.f32 %v1661_v44, %v2488_v61  ;;  %v1664_v18 = vadd.f32 %v1663_v53, %v1662_v48  ;;  %v1775_v19 = vpop.f32.mrb[59].mxu1 }
 0x243   :  { %v1776_v34 = vadd.f32 %v1775_v19, %v1774_v45 }
 0x244   :  { %v1174_v38 = vadd.f32 %v1664_v18, %v2488_v61  ;;  %v1332_v39 = vadd.f32 %v1773_v43, %v1171_v56 }
 0x246   :  { %1422 = vst [vmem:[%s2622_s4 + $0x60] sm:$0xff] %v1332_v39  ;;  %v1335_v20 = vadd.f32 %v1776_v34, %v1174_v38  ;;  %v1665_v35 = vpop.f32.mrb[60].mxu0 }
 0x247   :  { %v1666_v40 = vpop.f32.mrb[61].mxu0  ;;  %v1777_v42 = vpop.f32.mrb[60].mxu1 }
 0x248   :  { %1423 = vst [vmem:[%s2622_s4 + $0x68] sm:$0xff] %v1335_v20  ;;  %v1667_v55 = vadd.f32 %v1666_v40, %v1665_v35  ;;  %v1668_v46 = vpop.f32.mrb[62].mxu0  ;;  %v1778_v50 = vpop.f32.mrb[61].mxu1 }
 0x249   :  { %v1669_v51 = vpop.f32.mrb[63].mxu0  ;;  %v1779_v57 = vadd.f32 %v1778_v50, %v1777_v42  ;;  %v1780_v21 = vpop.f32.mrb[62].mxu1 }
 0x24a   :  { %v1179_v47 = vadd.f32 %v1667_v55, %v2488_v61  ;;  %v1670_v52 = vadd.f32 %v1669_v51, %v1668_v46  ;;  %v1781_v54 = vpop.f32.mrb[63].mxu1 }
 0x24b   :  { %v1782_v60 = vadd.f32 %v1781_v54, %v1780_v21 }
 0x24c   :  { %v1182_v1 = vadd.f32 %v1670_v52, %v2488_v61  ;;  %v1340_v3 = vadd.f32 %v1779_v57, %v1179_v47 }
 0x24e   :  { %1424 = vst [vmem:[%s2622_s4 + $0x70] sm:$0xff] %v1340_v3  ;;  %v1343_v58 = vadd.f32 %v1782_v60, %v1182_v1  ;;  %v1671_v59 = vpop.f32.mrb[64].mxu0 }
 0x24f   :  { %v1672_v62 = vpop.f32.mrb[65].mxu0  ;;  %v1783_v63 = vpop.f32.mrb[64].mxu1 }
 0x250   :  { %1425 = vst [vmem:[%s2622_s4 + $0x78] sm:$0xff] %v1343_v58  ;;  %v1673_v0 = vadd.f32 %v1672_v62, %v1671_v59  ;;  %v1674_v2 = vpop.f32.mrb[66].mxu0  ;;  %v1784_v4 = vpop.f32.mrb[65].mxu1 }
 0x251   :  { %v1675_v5 = vpop.f32.mrb[67].mxu0  ;;  %v1785_v6 = vadd.f32 %v1784_v4, %v1783_v63  ;;  %v1786_v7 = vpop.f32.mrb[66].mxu1 }
 0x252   :  { %v1187_v8 = vadd.f32 %v1673_v0, %v2488_v61  ;;  %v1676_v9 = vadd.f32 %v1675_v5, %v1674_v2  ;;  %v1787_v10 = vpop.f32.mrb[67].mxu1 }
 0x253   :  { %v1788_v11 = vadd.f32 %v1787_v10, %v1786_v7 }
 0x254   :  { %v1190_v12 = vadd.f32 %v1676_v9, %v2488_v61  ;;  %v1348_v13 = vadd.f32 %v1785_v6, %v1187_v8 }
 0x256   :  { %1426 = vst [vmem:[%s2622_s4 + $0x80] sm:$0xff] %v1348_v13  ;;  %v1351_v14 = vadd.f32 %v1788_v11, %v1190_v12  ;;  %v1677_v15 = vpop.f32.mrb[68].mxu0 }
 0x257   :  { %v1678_v16 = vpop.f32.mrb[69].mxu0  ;;  %v1789_v17 = vpop.f32.mrb[68].mxu1 }
 0x258   :  { %1427 = vst [vmem:[%s2622_s4 + $0x88] sm:$0xff] %v1351_v14  ;;  %v1679_v22 = vadd.f32 %v1678_v16, %v1677_v15  ;;  %v1680_v23 = vpop.f32.mrb[70].mxu0  ;;  %v1790_v24 = vpop.f32.mrb[69].mxu1 }
 0x259   :  { %v1681_v25 = vpop.f32.mrb[71].mxu0  ;;  %v1791_v26 = vadd.f32 %v1790_v24, %v1789_v17  ;;  %v1792_v27 = vpop.f32.mrb[70].mxu1 }
 0x25a   :  { %v1195_v28 = vadd.f32 %v1679_v22, %v2488_v61  ;;  %v1682_v29 = vadd.f32 %v1681_v25, %v1680_v23  ;;  %v1793_v30 = vpop.f32.mrb[71].mxu1 }
 0x25b   :  { %v1794_v31 = vadd.f32 %v1793_v30, %v1792_v27 }
 0x25c   :  { %v1198_v32 = vadd.f32 %v1682_v29, %v2488_v61  ;;  %v1356_v33 = vadd.f32 %v1791_v26, %v1195_v28 }
 0x25e   :  { %1428 = vst [vmem:[%s2622_s4 + $0x90] sm:$0xff] %v1356_v33  ;;  %v1359_v36 = vadd.f32 %v1794_v31, %v1198_v32  ;;  %v1683_v37 = vpop.f32.mrb[72].mxu0 }
 0x25f   :  { %v1684_v41 = vpop.f32.mrb[73].mxu0  ;;  %v1795_v44 = vpop.f32.mrb[72].mxu1 }
 0x260   :  { %1429 = vst [vmem:[%s2622_s4 + $0x98] sm:$0xff] %v1359_v36  ;;  %v1685_v48 = vadd.f32 %v1684_v41, %v1683_v37  ;;  %v1686_v49 = vpop.f32.mrb[74].mxu0  ;;  %v1796_v53 = vpop.f32.mrb[73].mxu1 }
 0x261   :  { %v1687_v43 = vpop.f32.mrb[75].mxu0  ;;  %v1797_v45 = vadd.f32 %v1796_v53, %v1795_v44  ;;  %v1798_v56 = vpop.f32.mrb[74].mxu1 }
 0x262   :  { %v1203_v18 = vadd.f32 %v1685_v48, %v2488_v61  ;;  %v1688_v19 = vadd.f32 %v1687_v43, %v1686_v49  ;;  %v1799_v34 = vpop.f32.mrb[75].mxu1 }
 0x263   :  { %v1800_v38 = vadd.f32 %v1799_v34, %v1798_v56 }
 0x264   :  { %v1206_v39 = vadd.f32 %v1688_v19, %v2488_v61  ;;  %v1364_v20 = vadd.f32 %v1797_v45, %v1203_v18 }
 0x266   :  { %1430 = vst [vmem:[%s2622_s4 + $0xa0] sm:$0xff] %v1364_v20  ;;  %v1367_v35 = vadd.f32 %v1800_v38, %v1206_v39  ;;  %v1689_v40 = vpop.f32.mrb[76].mxu0 }
 0x267   :  { %v1690_v42 = vpop.f32.mrb[77].mxu0  ;;  %v1801_v55 = vpop.f32.mrb[76].mxu1 }
 0x268   :  { %1431 = vst [vmem:[%s2622_s4 + $0xa8] sm:$0xff] %v1367_v35  ;;  %v1691_v46 = vadd.f32 %v1690_v42, %v1689_v40  ;;  %v1692_v50 = vpop.f32.mrb[78].mxu0  ;;  %v1802_v51 = vpop.f32.mrb[77].mxu1 }
 0x269   :  { %v1693_v57 = vpop.f32.mrb[79].mxu0  ;;  %v1803_v21 = vadd.f32 %v1802_v51, %v1801_v55  ;;  %v1804_v47 = vpop.f32.mrb[78].mxu1 }
 0x26a   :  { %v1211_v52 = vadd.f32 %v1691_v46, %v2488_v61  ;;  %v1694_v54 = vadd.f32 %v1693_v57, %v1692_v50  ;;  %v1805_v60 = vpop.f32.mrb[79].mxu1 }
 0x26b   :  { %v1806_v1 = vadd.f32 %v1805_v60, %v1804_v47 }
 0x26c   :  { %v1214_v3 = vadd.f32 %v1694_v54, %v2488_v61  ;;  %v1372_v58 = vadd.f32 %v1803_v21, %v1211_v52 }
 0x26e   :  { %1432 = vst [vmem:[%s2622_s4 + $0xb0] sm:$0xff] %v1372_v58  ;;  %v1375_v59 = vadd.f32 %v1806_v1, %v1214_v3  ;;  %v1695_v62 = vpop.f32.mrb[80].mxu0 }
 0x26f   :  { %v1696_v63 = vpop.f32.mrb[81].mxu0  ;;  %v1807_v0 = vpop.f32.mrb[80].mxu1 }
 0x270   :  { %1433 = vst [vmem:[%s2622_s4 + $0xb8] sm:$0xff] %v1375_v59  ;;  %v1697_v2 = vadd.f32 %v1696_v63, %v1695_v62  ;;  %v1698_v4 = vpop.f32.mrb[82].mxu0  ;;  %v1808_v5 = vpop.f32.mrb[81].mxu1 }
 0x271   :  { %v1699_v6 = vpop.f32.mrb[83].mxu0  ;;  %v1809_v7 = vadd.f32 %v1808_v5, %v1807_v0  ;;  %v1810_v8 = vpop.f32.mrb[82].mxu1 }
 0x272   :  { %v1219_v9 = vadd.f32 %v1697_v2, %v2488_v61  ;;  %v1700_v10 = vadd.f32 %v1699_v6, %v1698_v4  ;;  %v1811_v11 = vpop.f32.mrb[83].mxu1 }
 0x273   :  { %v1812_v12 = vadd.f32 %v1811_v11, %v1810_v8 }
 0x274   :  { %v1222_v13 = vadd.f32 %v1700_v10, %v2488_v61  ;;  %v1380_v14 = vadd.f32 %v1809_v7, %v1219_v9 }
 0x276   :  { %1434 = vst [vmem:[%s2622_s4 + $0xc0] sm:$0xff] %v1380_v14  ;;  %v1383_v15 = vadd.f32 %v1812_v12, %v1222_v13  ;;  %v1701_v16 = vpop.f32.mrb[84].mxu0 }
 0x277   :  { %v1702_v17 = vpop.f32.mrb[85].mxu0  ;;  %v1813_v22 = vpop.f32.mrb[84].mxu1 }
 0x278   :  { %1435 = vst [vmem:[%s2622_s4 + $0xc8] sm:$0xff] %v1383_v15  ;;  %v1703_v23 = vadd.f32 %v1702_v17, %v1701_v16  ;;  %v1704_v24 = vpop.f32.mrb[86].mxu0  ;;  %v1814_v25 = vpop.f32.mrb[85].mxu1 }
 0x279   :  { %v1705_v26 = vpop.f32.mrb[87].mxu0  ;;  %v1815_v27 = vadd.f32 %v1814_v25, %v1813_v22  ;;  %v1816_v28 = vpop.f32.mrb[86].mxu1 }
 0x27a   :  { %v1227_v29 = vadd.f32 %v1703_v23, %v2488_v61  ;;  %v1706_v30 = vadd.f32 %v1705_v26, %v1704_v24  ;;  %v1817_v31 = vpop.f32.mrb[87].mxu1 }
 0x27b   :  { %v1818_v32 = vadd.f32 %v1817_v31, %v1816_v28 }
 0x27c   :  { %v1230_v33 = vadd.f32 %v1706_v30, %v2488_v61  ;;  %v1388_v36 = vadd.f32 %v1815_v27, %v1227_v29 }
 0x27e   :  { %1436 = vst [vmem:[%s2622_s4 + $0xd0] sm:$0xff] %v1388_v36  ;;  %v1391_v37 = vadd.f32 %v1818_v32, %v1230_v33  ;;  %v1707_v41 = vpop.f32.mrb[88].mxu0 }
 0x27f   :  { %v1708_v44 = vpop.f32.mrb[89].mxu0  ;;  %v1819_v48 = vpop.f32.mrb[88].mxu1 }
 0x280   :  { %1437 = vst [vmem:[%s2622_s4 + $0xd8] sm:$0xff] %v1391_v37  ;;  %v1709_v49 = vadd.f32 %v1708_v44, %v1707_v41  ;;  %v1710_v53 = vpop.f32.mrb[90].mxu0  ;;  %v1820_v43 = vpop.f32.mrb[89].mxu1 }
 0x281   :  { %v1711_v45 = vpop.f32.mrb[91].mxu0  ;;  %v1821_v56 = vadd.f32 %v1820_v43, %v1819_v48  ;;  %v1822_v18 = vpop.f32.mrb[90].mxu1 }
 0x282   :  { %v1235_v19 = vadd.f32 %v1709_v49, %v2488_v61  ;;  %v1712_v34 = vadd.f32 %v1711_v45, %v1710_v53  ;;  %v1823_v38 = vpop.f32.mrb[91].mxu1 }
 0x283   :  { %v1824_v39 = vadd.f32 %v1823_v38, %v1822_v18 }
 0x284   :  { %v1238_v20 = vadd.f32 %v1712_v34, %v2488_v61  ;;  %v1396_v35 = vadd.f32 %v1821_v56, %v1235_v19 }
 0x286   :  { %1438 = vst [vmem:[%s2622_s4 + $0xe0] sm:$0xff] %v1396_v35  ;;  %v1399_v40 = vadd.f32 %v1824_v39, %v1238_v20  ;;  %v1713_v42 = vpop.f32.mrb[92].mxu0 }
 0x287   :  { %v1714_v55 = vpop.f32.mrb[93].mxu0  ;;  %v1825_v46 = vpop.f32.mrb[92].mxu1 }
 0x288   :  { %1439 = vst [vmem:[%s2622_s4 + $0xe8] sm:$0xff] %v1399_v40  ;;  %v1715_v50 = vadd.f32 %v1714_v55, %v1713_v42  ;;  %v1716_v51 = vpop.f32.mrb[94].mxu0  ;;  %v1826_v57 = vpop.f32.mrb[93].mxu1 }
 0x289   :  { %v1717_v21 = vpop.f32.mrb[95].mxu0  ;;  %v1827_v47 = vadd.f32 %v1826_v57, %v1825_v46  ;;  %v1828_v52 = vpop.f32.mrb[94].mxu1 }
 0x28a   :  { %v1243_v54 = vadd.f32 %v1715_v50, %v2488_v61  ;;  %v1718_v60 = vadd.f32 %v1717_v21, %v1716_v51  ;;  %v1829_v1 = vpop.f32.mrb[95].mxu1 }
 0x28b   :  { %v1830_v3 = vadd.f32 %v1829_v1, %v1828_v52 }
 0x28c   :  { %v1246_v58 = vadd.f32 %v1718_v60, %v2488_v61  ;;  %v1404_v59 = vadd.f32 %v1827_v47, %v1243_v54 }
 0x28e   :  { %1440 = vst [vmem:[%s2622_s4 + $0xf0] sm:$0xff] %v1404_v59  ;;  %v1407_v62 = vadd.f32 %v1830_v3, %v1246_v58 }
 0x290   :  { %1441 = vst [vmem:[%s2622_s4 + $0xf8] sm:$0xff] %v1407_v62 }

// kernel: net_forward.5
= control target key start
LH: loop header
LB: loop body
LE: loop exit
PB: predicated region body
PF: predicated region fallthrough
CT: control target
= control target key end

     0   :  { %v1416_v0 = vmov 0   ;;  %vm1201_vm0 = vcmask 1040384   ;;  %s2133_s2 = inlined_call_operand.vmem [shape: f32[256,1], index: 2, kind: input, shape index: {}]   ;;  %s2134_s0 = inlined_call_operand.vmem [shape: bf16[256,256], index: 0, kind: input, shape index: {}]   ;;  %s2135_s4 = inlined_call_operand.<no memory space> [shape: f32[1,1], index: 4, kind: input, shape index: {}]   ;;  %s2136_s1 = inlined_call_operand.vmem [shape: bf16[256,256], index: 1, kind: input, shape index: {}]   ;;  %s2137_s3 = inlined_call_operand.vmem [shape: f32[256,1], index: 3, kind: input, shape index: {}]   ;;  %s2138_s5 = inlined_call_operand.vmem [shape: f32[2,256], index: 5, kind: output, shape index: {}]  }
   0x1   :  { %1319 = vset.pattern.permute.xlu1 %v1416_v0  ;;  %1318 = vset.pattern.permute.xlu0 %v1416_v0  ;;  %v88_v1 = vld [vmem:[%s2133_s2 + $0x10] sm:$0xff]  ;;  %v86_v2 = vld [vmem:[%s2133_s2] sm:$0xff]  ;;  %v10_v3 = vstv %s2135_s4  ;;  %v89_v6 = vld [vmem:[%s2133_s2 + $0x18] sm:$0xff] }
   0x2   :  { %130 = vperm.xlu1 %1319, %v88_v1   ;;  %120 = vperm.xlu0 %1318, %v86_v2   ;;  %v1320_v4 = vld [vmem:[%s2134_s0 + $0x4] ss:$8 sps:$4 sm:$0xff]   ;;  %v1322_v5 = vld [vmem:[%s2134_s0] ss:$8 sps:$4 sm:$0xff]   ;;  %11 = vst [vmem:[#allocation2] sm:$0x1] %v10_v3 }
   0x3   :  { %v87_v7 = vld [vmem:[%s2133_s2 + $0x8] sm:$0xff]  ;;  %598 = vmatprep.subr.bf16.mxu0 %v1320_v4  ;;  %1285 = vmatprep.subr.bf16.mxu1 %v1320_v4  ;;  %v1323_v8 = vld [vmem:[%s2134_s0 + $0x14] ss:$8 sps:$4 sm:$0xff]   ;;  %v1325_v9 = vld [vmem:[%s2134_s0 + $0x10] ss:$8 sps:$4 sm:$0xff]  }
   0x4   :  { %599 = vmatpush1.bf16.msra.mxu0 %v1322_v5  ;;  %1301 = vmatpush1.bf16.msra.mxu1 %v1322_v5  ;;  %v91_v10 = vld [vmem:[%s2133_s2 + $0x28] sm:$0xff]  ;;  %v90_v11 = vld [vmem:[%s2133_s2 + $0x20] sm:$0xff]  ;;  %v93_v14 = vld [vmem:[%s2133_s2 + $0x38] sm:$0xff] }
   0x5   :  { %600 = vmatprep.subr.bf16.mxu0 %v1323_v8  ;;  %1286 = vmatprep.subr.bf16.mxu1 %v1323_v8  ;;  %v1326_v12 = vld [vmem:[%s2134_s0 + $0x24] ss:$8 sps:$4 sm:$0xff]   ;;  %v1328_v13 = vld [vmem:[%s2134_s0 + $0x20] ss:$8 sps:$4 sm:$0xff]   ;;  %v92_v15 = vld [vmem:[%s2133_s2 + $0x30] sm:$0xff] }
   0x6   :  { %135 = vperm.xlu1 %1319, %v89_v6   ;;  %125 = vperm.xlu0 %1318, %v87_v7   ;;  %v1329_v16 = vld [vmem:[%s2134_s0 + $0x34] ss:$8 sps:$4 sm:$0xff]   ;;  %v1331_v17 = vld [vmem:[%s2134_s0 + $0x30] ss:$8 sps:$4 sm:$0xff]   ;;  %v95_v18 = vld [vmem:[%s2133_s2 + $0x48] sm:$0xff] }
   0x7   :  { %v94_v19 = vld [vmem:[%s2133_s2 + $0x40] sm:$0xff]  ;;  %v97_v22 = vld [vmem:[%s2133_s2 + $0x58] sm:$0xff]  ;;  %v96_v23 = vld [vmem:[%s2133_s2 + $0x50] sm:$0xff] }
   0x8   :  { %601 = vmatpush1.bf16.msra.mxu0 %v1325_v9  ;;  %1302 = vmatpush1.bf16.msra.mxu1 %v1325_v9  ;;  %v1332_v20 = vld [vmem:[%s2134_s0 + $0x44] ss:$8 sps:$4 sm:$0xff]   ;;  %v1334_v21 = vld [vmem:[%s2134_s0 + $0x40] ss:$8 sps:$4 sm:$0xff]   ;;  %v1335_v24 = vld [vmem:[%s2134_s0 + $0x54] ss:$8 sps:$4 sm:$0xff]  }
   0x9   :  { %602 = vmatprep.subr.bf16.mxu0 %v1326_v12  ;;  %1287 = vmatprep.subr.bf16.mxu1 %v1326_v12  ;;  %v1337_v25 = vld [vmem:[%s2134_s0 + $0x50] ss:$8 sps:$4 sm:$0xff]   ;;  %v99_v26 = vld [vmem:[%s2133_s2 + $0x68] sm:$0xff]  ;;  %v98_v27 = vld [vmem:[%s2133_s2 + $0x60] sm:$0xff] }
   0xa   :  { %145 = vperm.xlu1 %1319, %v91_v10   ;;  %140 = vperm.xlu0 %1318, %v90_v11   ;;  %v1338_v28 = vld [vmem:[%s2134_s0 + $0x64] ss:$8 sps:$4 sm:$0xff]   ;;  %v1340_v29 = vld [vmem:[%s2134_s0 + $0x60] ss:$8 sps:$4 sm:$0xff]   ;;  %v101_v30 = vld [vmem:[%s2133_s2 + $0x78] sm:$0xff] }
   0xb   :  { %v100_v31 = vld [vmem:[%s2133_s2 + $0x70] sm:$0xff]  ;;  %v103_v34 = vld [vmem:[%s2133_s2 + $0x88] sm:$0xff]  ;;  %v102_v35 = vld [vmem:[%s2133_s2 + $0x80] sm:$0xff] }
   0xc   :  { %603 = vmatpush1.bf16.msra.mxu0 %v1328_v13  ;;  %1303 = vmatpush1.bf16.msra.mxu1 %v1328_v13  ;;  %v1341_v32 = vld [vmem:[%s2134_s0 + $0x74] ss:$8 sps:$4 sm:$0xff]   ;;  %v1343_v33 = vld [vmem:[%s2134_s0 + $0x70] ss:$8 sps:$4 sm:$0xff]   ;;  %v1344_v36 = vld [vmem:[%s2134_s0 + $0x84] ss:$8 sps:$4 sm:$0xff]  }
   0xd   :  { %604 = vmatprep.subr.bf16.mxu0 %v1329_v16  ;;  %1288 = vmatprep.subr.bf16.mxu1 %v1329_v16  ;;  %v1346_v37 = vld [vmem:[%s2134_s0 + $0x80] ss:$8 sps:$4 sm:$0xff]   ;;  %v105_v38 = vld [vmem:[%s2133_s2 + $0x98] sm:$0xff]  ;;  %v104_v39 = vld [vmem:[%s2133_s2 + $0x90] sm:$0xff] }
   0xe   :  { %155 = vperm.xlu1 %1319, %v93_v14   ;;  %150 = vperm.xlu0 %1318, %v92_v15   ;;  %v1370_v40 = vld [vmem:[%s2136_s1 + $0x4] ss:$8 sps:$4 sm:$0xff]   ;;  %v1347_v41 = vld [vmem:[%s2134_s0 + $0x94] ss:$8 sps:$4 sm:$0xff]   ;;  %v1349_v43 = vld [vmem:[%s2134_s0 + $0x90] ss:$8 sps:$4 sm:$0xff]  }
   0xf   :  { %630 = vmatprep.mubr.bf16.mxu0 %v1370_v40  ;;  %v1373_v42 = vld [vmem:[%s2136_s1 + $0x84] ss:$8 sps:$4 sm:$0xff]   ;;  %v1352_v47 = vld [vmem:[%s2134_s0 + $0xa0] ss:$8 sps:$4 sm:$0xff]   ;;  %v109_v48 = vld [vmem:[%s2133_s2 + $0xb8] sm:$0xff] }
  0x10   :  { %605 = vmatpush1.bf16.msra.mxu0 %v1331_v17  ;;  %1304 = vmatpush1.bf16.msra.mxu1 %v1331_v17  ;;  %v107_v44 = vld [vmem:[%s2133_s2 + $0xa8] sm:$0xff]  ;;  %v106_v45 = vld [vmem:[%s2133_s2 + $0xa0] sm:$0xff]  ;;  %v108_v49 = vld [vmem:[%s2133_s2 + $0xb0] sm:$0xff] }
  0x11   :  { %606 = vmatprep.subr.bf16.mxu0 %v1332_v20  ;;  %1289 = vmatprep.subr.bf16.mxu1 %v1332_v20  ;;  %v1350_v46 = vld [vmem:[%s2134_s0 + $0xa4] ss:$8 sps:$4 sm:$0xff]   ;;  %v1353_v50 = vld [vmem:[%s2134_s0 + $0xb4] ss:$8 sps:$4 sm:$0xff]   ;;  %v1355_v51 = vld [vmem:[%s2134_s0 + $0xb0] ss:$8 sps:$4 sm:$0xff]  }
  0x12   :  { %165 = vperm.xlu1 %1319, %v95_v18   ;;  %160 = vperm.xlu0 %1318, %v94_v19   ;;  %v111_v52 = vld [vmem:[%s2133_s2 + $0xc8] sm:$0xff]  ;;  %v110_v53 = vld [vmem:[%s2133_s2 + $0xc0] sm:$0xff]  ;;  %v113_v56 = vld [vmem:[%s2133_s2 + $0xd8] sm:$0xff] }
  0x13   :  { %710 = vmatprep.mubr.bf16.mxu1 %v1373_v42  ;;  %v1356_v54 = vld [vmem:[%s2134_s0 + $0xc4] ss:$8 sps:$4 sm:$0xff]   ;;  %v1358_v55 = vld [vmem:[%s2134_s0 + $0xc0] ss:$8 sps:$4 sm:$0xff]   ;;  %v112_v57 = vld [vmem:[%s2133_s2 + $0xd0] sm:$0xff] }
  0x14   :  { %607 = vmatpush1.bf16.msra.mxu0 %v1334_v21  ;;  %1305 = vmatpush1.bf16.msra.mxu1 %v1334_v21  ;;  %v1359_v58 = vld [vmem:[%s2134_s0 + $0xd4] ss:$8 sps:$4 sm:$0xff]   ;;  %v1361_v59 = vld [vmem:[%s2134_s0 + $0xd0] ss:$8 sps:$4 sm:$0xff]   ;;  %v856_v60 = vld [vmem:[%s2137_s3 + $0x8] sm:$0xff] }
  0x15   :  { %608 = vmatprep.subr.bf16.mxu0 %v1335_v24  ;;  %1290 = vmatprep.subr.bf16.mxu1 %v1335_v24  ;;  %v855_v61 = vld [vmem:[%s2137_s3] sm:$0xff]  ;;  %v858_v0 = vld [vmem:[%s2137_s3 + $0x18] sm:$0xff]  ;;  %v857_v1 = vld [vmem:[%s2137_s3 + $0x10] sm:$0xff] }
  0x16   :  { %175 = vperm.xlu1 %1319, %v97_v22   ;;  %170 = vperm.xlu0 %1318, %v96_v23   ;;  %v1362_v62 = vld [vmem:[%s2134_s0 + $0xe4] ss:$8 sps:$4 sm:$0xff]   ;;  %v1364_v63 = vld [vmem:[%s2134_s0 + $0xe0] ss:$8 sps:$4 sm:$0xff]   ;;  %v1365_v2 = vld [vmem:[%s2134_s0 + $0xf4] ss:$8 sps:$4 sm:$0xff]  }
  0x17   :  { %v1367_v3 = vld [vmem:[%s2134_s0 + $0xf0] ss:$8 sps:$4 sm:$0xff]   ;;  %v860_v4 = vld [vmem:[%s2137_s3 + $0x28] sm:$0xff]  ;;  %v859_v5 = vld [vmem:[%s2137_s3 + $0x20] sm:$0xff] }
  0x18   :  { %609 = vmatpush1.bf16.msra.mxu0 %v1337_v25  ;;  %1306 = vmatpush1.bf16.msra.mxu1 %v1337_v25  ;;  %v1368_v6 = vld [vmem:[%s2136_s1] ss:$8 sps:$4 sm:$0xff]   ;;  %v1374_v8 = vld [vmem:[%s2136_s1 + $0x14] ss:$8 sps:$4 sm:$0xff]   ;;  %v1378_v14 = vld [vmem:[%s2136_s1 + $0x10] ss:$8 sps:$4 sm:$0xff]  }
  0x19   :  { %610 = vmatprep.subr.bf16.mxu0 %v1338_v28  ;;  %1291 = vmatprep.subr.bf16.mxu1 %v1338_v28  ;;  %v1371_v7 = vld [vmem:[%s2136_s1 + $0x80] ss:$8 sps:$4 sm:$0xff]   ;;  %v1376_v9 = vld [vmem:[%s2136_s1 + $0x94] ss:$8 sps:$4 sm:$0xff]   ;;  %v1379_v15 = vld [vmem:[%s2136_s1 + $0x90] ss:$8 sps:$4 sm:$0xff]  }
  0x1a   :  { %185 = vperm.xlu1 %1319, %v99_v26   ;;  %180 = vperm.xlu0 %1318, %v98_v27   ;;  %v862_v10 = vld [vmem:[%s2137_s3 + $0x38] sm:$0xff]  ;;  %v861_v11 = vld [vmem:[%s2137_s3 + $0x30] sm:$0xff]  ;;  %v864_v12 = vld [vmem:[%s2137_s3 + $0x48] sm:$0xff] }
  0x1b   :  { %v863_v13 = vld [vmem:[%s2137_s3 + $0x40] sm:$0xff]  ;;  %v866_v18 = vld [vmem:[%s2137_s3 + $0x58] sm:$0xff]  ;;  %v865_v19 = vld [vmem:[%s2137_s3 + $0x50] sm:$0xff] }
  0x1c   :  { %611 = vmatpush1.bf16.msra.mxu0 %v1340_v29  ;;  %1307 = vmatpush1.bf16.msra.mxu1 %v1340_v29  ;;  %v1380_v16 = vld [vmem:[%s2136_s1 + $0x24] ss:$8 sps:$4 sm:$0xff]   ;;  %v1384_v22 = vld [vmem:[%s2136_s1 + $0x20] ss:$8 sps:$4 sm:$0xff]   ;;  %v1386_v24 = vld [vmem:[%s2136_s1 + $0x34] ss:$8 sps:$4 sm:$0xff]  }
  0x1d   :  { %612 = vmatprep.subr.bf16.mxu0 %v1341_v32  ;;  %1292 = vmatprep.subr.bf16.mxu1 %v1341_v32  ;;  %v1382_v17 = vld [vmem:[%s2136_s1 + $0xa4] ss:$8 sps:$4 sm:$0xff]   ;;  %v1385_v23 = vld [vmem:[%s2136_s1 + $0xa0] ss:$8 sps:$4 sm:$0xff]   ;;  %v1388_v25 = vld [vmem:[%s2136_s1 + $0xb4] ss:$8 sps:$4 sm:$0xff]  }
  0x1e   :  { %195 = vperm.xlu1 %1319, %v101_v30   ;;  %190 = vperm.xlu0 %1318, %v100_v31   ;;  %v868_v20 = vld [vmem:[%s2137_s3 + $0x68] sm:$0xff]  ;;  %v867_v21 = vld [vmem:[%s2137_s3 + $0x60] sm:$0xff]  ;;  %v870_v26 = vld [vmem:[%s2137_s3 + $0x78] sm:$0xff] }
  0x1f   :  { %v869_v27 = vld [vmem:[%s2137_s3 + $0x70] sm:$0xff]  ;;  %v872_v28 = vld [vmem:[%s2137_s3 + $0x88] sm:$0xff]  ;;  %v871_v29 = vld [vmem:[%s2137_s3 + $0x80] sm:$0xff] }
  0x20   :  { %613 = vmatpush1.bf16.msra.mxu0 %v1343_v33  ;;  %1308 = vmatpush1.bf16.msra.mxu1 %v1343_v33  ;;  %v1390_v30 = vld [vmem:[%s2136_s1 + $0x30] ss:$8 sps:$4 sm:$0xff]   ;;  %v1392_v32 = vld [vmem:[%s2136_s1 + $0x44] ss:$8 sps:$4 sm:$0xff]   ;;  %v1398_v40 = vld [vmem:[%s2136_s1 + $0x54] ss:$8 sps:$4 sm:$0xff]  }
  0x21   :  { %614 = vmatprep.subr.bf16.mxu0 %v1344_v36  ;;  %1293 = vmatprep.subr.bf16.mxu1 %v1344_v36  ;;  %v1391_v31 = vld [vmem:[%s2136_s1 + $0xb0] ss:$8 sps:$4 sm:$0xff]   ;;  %v1394_v33 = vld [vmem:[%s2136_s1 + $0xc4] ss:$8 sps:$4 sm:$0xff]  }
  0x22   :  { %205 = vperm.xlu1 %1319, %v103_v34   ;;  %200 = vperm.xlu0 %1318, %v102_v35   ;;  %v874_v34 = vld [vmem:[%s2137_s3 + $0x98] sm:$0xff]  ;;  %v873_v35 = vld [vmem:[%s2137_s3 + $0x90] sm:$0xff]  ;;  %v876_v36 = vld [vmem:[%s2137_s3 + $0xa8] sm:$0xff] }
  0x23   :  { %v878_v42 = vld [vmem:[%s2137_s3 + $0xb8] sm:$0xff] }
  0x24   :  { %615 = vmatpush1.bf16.msra.mxu0 %v1346_v37  ;;  %1309 = vmatpush1.bf16.msra.mxu1 %v1346_v37  ;;  %v875_v37 = vld [vmem:[%s2137_s3 + $0xa0] sm:$0xff] }
  0x25   :  { %616 = vmatprep.subr.bf16.mxu0 %v1347_v41  ;;  %1294 = vmatprep.subr.bf16.mxu1 %v1347_v41  ;;  %v1400_v41 = vld [vmem:[%s2136_s1 + $0xd4] ss:$8 sps:$4 sm:$0xff]  }
  0x26   :  { %215 = vperm.xlu1 %1319, %v105_v38   ;;  %210 = vperm.xlu0 %1318, %v104_v39   ;;  %v1396_v38 = vld [vmem:[%s2136_s1 + $0x40] ss:$8 sps:$4 sm:$0xff]  }
  0x27   :  { %v1397_v39 = vld [vmem:[%s2136_s1 + $0xc0] ss:$8 sps:$4 sm:$0xff]  }
  0x28   :  { %617 = vmatpush1.bf16.msra.mxu0 %v1349_v43  ;;  %1310 = vmatpush1.bf16.msra.mxu1 %v1349_v43  ;;  %v877_v43 = vld [vmem:[%s2137_s3 + $0xb0] sm:$0xff] }
  0x29   :  { %618 = vmatprep.subr.bf16.mxu0 %v1350_v46  ;;  %1295 = vmatprep.subr.bf16.mxu1 %v1350_v46  ;;  %v1402_v46 = vld [vmem:[%s2136_s1 + $0x50] ss:$8 sps:$4 sm:$0xff]  }
  0x2a   :  { %225 = vperm.xlu1 %1319, %v107_v44   ;;  %220 = vperm.xlu0 %1318, %v106_v45   ;;  %v880_v44 = vld [vmem:[%s2137_s3 + $0xc8] sm:$0xff]  ;;  %v879_v45 = vld [vmem:[%s2137_s3 + $0xc0] sm:$0xff] }
  0x2c   :  { %619 = vmatpush1.bf16.msra.mxu0 %v1352_v47  ;;  %1311 = vmatpush1.bf16.msra.mxu1 %v1352_v47  ;;  %v1403_v47 = vld [vmem:[%s2136_s1 + $0xd0] ss:$8 sps:$4 sm:$0xff]  }
  0x2d   :  { %620 = vmatprep.subr.bf16.mxu0 %v1353_v50  ;;  %1296 = vmatprep.subr.bf16.mxu1 %v1353_v50  ;;  %v881_v50 = vld [vmem:[%s2137_s3 + $0xd0] sm:$0xff] }
  0x2e   :  { %235 = vperm.xlu1 %1319, %v109_v48   ;;  %230 = vperm.xlu0 %1318, %v108_v49   ;;  %v1404_v48 = vld [vmem:[%s2136_s1 + $0x64] ss:$8 sps:$4 sm:$0xff]  }
  0x2f   :  { %v1406_v49 = vld [vmem:[%s2136_s1 + $0xe4] ss:$8 sps:$4 sm:$0xff]  }
  0x30   :  { %621 = vmatpush1.bf16.msra.mxu0 %v1355_v51  ;;  %1312 = vmatpush1.bf16.msra.mxu1 %v1355_v51  ;;  %v114_v51 = vld [vmem:[%s2133_s2 + $0xe0] sm:$0xff] }
  0x31   :  { %622 = vmatprep.subr.bf16.mxu0 %v1356_v54  ;;  %1297 = vmatprep.subr.bf16.mxu1 %v1356_v54  ;;  %v1408_v54 = vld [vmem:[%s2136_s1 + $0x60] ss:$8 sps:$4 sm:$0xff]  }
  0x32   :  { %245 = vperm.xlu1 %1319, %v111_v52   ;;  %240 = vperm.xlu0 %1318, %v110_v53   ;;  %v882_v52 = vld [vmem:[%s2137_s3 + $0xd8] sm:$0xff]  ;;  %v115_v53 = vld [vmem:[%s2133_s2 + $0xe8] sm:$0xff] }
  0x34   :  { %623 = vmatpush1.bf16.msra.mxu0 %v1358_v55  ;;  %1313 = vmatpush1.bf16.msra.mxu1 %v1358_v55  ;;  %v1409_v55 = vld [vmem:[%s2136_s1 + $0xe0] ss:$8 sps:$4 sm:$0xff]  }
  0x35   :  { %624 = vmatprep.subr.bf16.mxu0 %v1359_v58  ;;  %1298 = vmatprep.subr.bf16.mxu1 %v1359_v58  ;;  %v883_v58 = vld [vmem:[%s2137_s3 + $0xe0] sm:$0xff] }
  0x36   :  { %255 = vperm.xlu1 %1319, %v113_v56   ;;  %250 = vperm.xlu0 %1318, %v112_v57   ;;  %v1410_v56 = vld [vmem:[%s2136_s1 + $0x74] ss:$8 sps:$4 sm:$0xff]  }
  0x37   :  { %v1412_v57 = vld [vmem:[%s2136_s1 + $0xf4] ss:$8 sps:$4 sm:$0xff]  }
  0x38   :  { %625 = vmatpush1.bf16.msra.mxu0 %v1361_v59  ;;  %1314 = vmatpush1.bf16.msra.mxu1 %v1361_v59  ;;  %v116_v59 = vld [vmem:[%s2133_s2 + $0xf0] sm:$0xff] }
  0x39   :  { %626 = vmatprep.subr.bf16.mxu0 %v1362_v62  ;;  %1299 = vmatprep.subr.bf16.mxu1 %v1362_v62  ;;  %v1414_v62 = vld [vmem:[%s2136_s1 + $0x70] ss:$8 sps:$4 sm:$0xff]  }
  0x3a   :  { %894 = vperm.xlu1 %1319, %v856_v60   ;;  %889 = vperm.xlu0 %1318, %v855_v61   ;;  %v884_v60 = vld [vmem:[%s2137_s3 + $0xe8] sm:$0xff]  ;;  %v117_v61 = vld [vmem:[%s2133_s2 + $0xf8] sm:$0xff] }
  0x3c   :  { %627 = vmatpush1.bf16.msra.mxu0 %v1364_v63  ;;  %1315 = vmatpush1.bf16.msra.mxu1 %v1364_v63  ;;  %v1415_v63 = vld [vmem:[%s2136_s1 + $0xf0] ss:$8 sps:$4 sm:$0xff]  }
  0x3d   :  { %628 = vmatprep.subr.bf16.mxu0 %v1365_v2  ;;  %1300 = vmatprep.subr.bf16.mxu1 %v1365_v2  ;;  %v1187_v2 = vld [vmem:[#allocation2] sm:$0x1] }
  0x3e   :  { %904 = vperm.xlu1 %1319, %v858_v0   ;;  %899 = vperm.xlu0 %1318, %v857_v1   ;;  %v886_v0 = vld [vmem:[%s2137_s3 + $0xf8] sm:$0xff]  ;;  %v885_v1 = vld [vmem:[%s2137_s3 + $0xf0] sm:$0xff] }
  0x40   :  { %629 = vmatpush1.bf16.msra.mxu0 %v1367_v3  ;;  %1316 = vmatpush1.bf16.msra.mxu1 %v1367_v3 }
  0x42   :  { %914 = vperm.xlu1 %1319, %v860_v4   ;;  %909 = vperm.xlu0 %1318, %v859_v5  }
  0x43   :  { %631 = vmatmul.mubr.bf16.vlgmr.msra.gmra.mrb[0].mxu0 %v1368_v6  ;;  %711 = vmatmul.mubr.bf16.vlgmr.msra.gmra.mrb[0].mxu1 %v1371_v7 }
  0x44   :  { %640 = vmatprep.mubr.bf16.mxu0 %v1374_v8  ;;  %720 = vmatprep.mubr.bf16.mxu1 %v1376_v9 }
  0x46   :  { %924 = vperm.xlu1 %1319, %v862_v10   ;;  %919 = vperm.xlu0 %1318, %v861_v11  }
  0x4a   :  { %934 = vperm.xlu1 %1319, %v864_v12   ;;  %929 = vperm.xlu0 %1318, %v863_v13  }
  0x4b   :  { %641 = vmatmul.mubr.bf16.gmra.mrb[4].mxu0 %v1378_v14  ;;  %721 = vmatmul.mubr.bf16.gmra.mrb[4].mxu1 %v1379_v15 }
  0x4c   :  { %650 = vmatprep.mubr.bf16.mxu0 %v1380_v16  ;;  %730 = vmatprep.mubr.bf16.mxu1 %v1382_v17 }
  0x4e   :  { %944 = vperm.xlu1 %1319, %v866_v18   ;;  %939 = vperm.xlu0 %1318, %v865_v19  }
  0x52   :  { %954 = vperm.xlu1 %1319, %v868_v20   ;;  %949 = vperm.xlu0 %1318, %v867_v21  }
  0x53   :  { %651 = vmatmul.mubr.bf16.gmra.mrb[8].mxu0 %v1384_v22  ;;  %731 = vmatmul.mubr.bf16.gmra.mrb[8].mxu1 %v1385_v23 }
  0x54   :  { %660 = vmatprep.mubr.bf16.mxu0 %v1386_v24  ;;  %740 = vmatprep.mubr.bf16.mxu1 %v1388_v25 }
  0x56   :  { %964 = vperm.xlu1 %1319, %v870_v26   ;;  %959 = vperm.xlu0 %1318, %v869_v27  }
  0x5a   :  { %974 = vperm.xlu1 %1319, %v872_v28   ;;  %969 = vperm.xlu0 %1318, %v871_v29  }
  0x5b   :  { %661 = vmatmul.mubr.bf16.gmra.mrb[12].mxu0 %v1390_v30  ;;  %741 = vmatmul.mubr.bf16.gmra.mrb[12].mxu1 %v1391_v31 }
  0x5c   :  { %670 = vmatprep.mubr.bf16.mxu0 %v1392_v32  ;;  %750 = vmatprep.mubr.bf16.mxu1 %v1394_v33 }
  0x5e   :  { %984 = vperm.xlu1 %1319, %v874_v34   ;;  %979 = vperm.xlu0 %1318, %v873_v35  }
  0x62   :  { %994 = vperm.xlu1 %1319, %v876_v36   ;;  %989 = vperm.xlu0 %1318, %v875_v37  }
  0x63   :  { %671 = vmatmul.mubr.bf16.gmra.mrb[16].mxu0 %v1396_v38  ;;  %751 = vmatmul.mubr.bf16.gmra.mrb[16].mxu1 %v1397_v39 }
  0x64   :  { %680 = vmatprep.mubr.bf16.mxu0 %v1398_v40  ;;  %760 = vmatprep.mubr.bf16.mxu1 %v1400_v41 }
  0x66   :  { %1004 = vperm.xlu1 %1319, %v878_v42   ;;  %999 = vperm.xlu0 %1318, %v877_v43  }
  0x6a   :  { %1014 = vperm.xlu1 %1319, %v880_v44   ;;  %1009 = vperm.xlu0 %1318, %v879_v45  }
  0x6b   :  { %681 = vmatmul.mubr.bf16.gmra.mrb[20].mxu0 %v1402_v46  ;;  %761 = vmatmul.mubr.bf16.gmra.mrb[20].mxu1 %v1403_v47 }
  0x6c   :  { %690 = vmatprep.mubr.bf16.mxu0 %v1404_v48  ;;  %770 = vmatprep.mubr.bf16.mxu1 %v1406_v49 }
  0x6e   :  { %1019 = vperm.xlu1 %1319, %v881_v50   ;;  %260 = vperm.xlu0 %1318, %v114_v51  }
  0x72   :  { %1024 = vperm.xlu1 %1319, %v882_v52   ;;  %265 = vperm.xlu0 %1318, %v115_v53  }
  0x73   :  { %691 = vmatmul.mubr.bf16.gmra.mrb[24].mxu0 %v1408_v54  ;;  %771 = vmatmul.mubr.bf16.gmra.mrb[24].mxu1 %v1409_v55 }
  0x74   :  { %700 = vmatprep.mubr.bf16.mxu0 %v1410_v56  ;;  %780 = vmatprep.mubr.bf16.mxu1 %v1412_v57 }
  0x76   :  { %1029 = vperm.xlu1 %1319, %v883_v58   ;;  %270 = vperm.xlu0 %1318, %v116_v59  }
  0x7a   :  { %1034 = vperm.xlu1 %1319, %v884_v60   ;;  %275 = vperm.xlu0 %1318, %v117_v61  }
  0x7b   :  { %701 = vmatmul.mubr.bf16.gmra.mrb[28].mxu0 %v1414_v62  ;;  %781 = vmatmul.mubr.bf16.gmra.mrb[28].mxu1 %v1415_v63 }
  0x7e   :  { %1044 = vperm.xlu1 %1319, %v886_v0   ;;  %1039 = vperm.xlu0 %1318, %v885_v1  }
  0x81   :  { %v1834_v3 = vpop.permute.xlu1 %130  ;;  %v121_v4 = vpop.permute.xlu0 %120 }
  0x82   :  { %1190 = vperm.xlu0 %1318, %v1187_v2  }
  0x85   :  { %v1836_v5 = vpop.permute.xlu1 %135  ;;  %v126_v6 = vpop.permute.xlu0 %125 }
  0x89   :  { %v1838_v7 = vpop.permute.xlu1 %145  ;;  %v1840_v8 = vpop.permute.xlu0 %140 }
  0x8d   :  { %v1842_v9 = vpop.permute.xlu1 %155  ;;  %v1844_v10 = vpop.permute.xlu0 %150 }
  0x91   :  { %v1846_v11 = vpop.permute.xlu1 %165  ;;  %v1848_v12 = vpop.permute.xlu0 %160 }
  0x95   :  { %v1850_v13 = vpop.permute.xlu1 %175  ;;  %v1852_v14 = vpop.permute.xlu0 %170 }
  0x99   :  { %v1854_v15 = vpop.permute.xlu1 %185  ;;  %v1856_v16 = vpop.permute.xlu0 %180 }
  0x9d   :  { %v1858_v17 = vpop.permute.xlu1 %195  ;;  %v1860_v18 = vpop.permute.xlu0 %190 }
  0xa1   :  { %v1862_v19 = vpop.permute.xlu1 %205  ;;  %v1864_v20 = vpop.permute.xlu0 %200 }
  0xa5   :  { %v1866_v21 = vpop.permute.xlu1 %215  ;;  %v1868_v22 = vpop.permute.xlu0 %210 }
  0xa9   :  { %v1870_v23 = vpop.permute.xlu1 %225  ;;  %v1872_v24 = vpop.permute.xlu0 %220 }
  0xad   :  { %v1874_v25 = vpop.permute.xlu1 %235  ;;  %v1876_v26 = vpop.permute.xlu0 %230 }
  0xb1   :  { %v1878_v27 = vpop.permute.xlu1 %245  ;;  %v1880_v28 = vpop.permute.xlu0 %240 }
  0xb2   :  { %2142 = vst [vmem:[#allocation3_spill] sm:$0xff] %v1878_v27 }
  0xb5   :  { %v1882_v29 = vpop.permute.xlu1 %255  ;;  %v1884_v30 = vpop.permute.xlu0 %250 }
  0xb6   :  { %2143 = vst [vmem:[#allocation4_spill] sm:$0xff] %v1882_v29  ;;  %2144 = vst [vmem:[#allocation5_spill] sm:$0xff] %v1884_v30 }
  0xb9   :  { %v895_v31 = vpop.permute.xlu1 %894  ;;  %v890_v32 = vpop.permute.xlu0 %889 }
  0xbd   :  { %v905_v33 = vpop.permute.xlu1 %904  ;;  %v900_v34 = vpop.permute.xlu0 %899 }
  0xc1   :  { %v1886_v35 = vpop.permute.xlu1 %914  ;;  %v1888_v36 = vpop.permute.xlu0 %909 }
  0xc5   :  { %v1890_v37 = vpop.permute.xlu1 %924  ;;  %v1892_v38 = vpop.permute.xlu0 %919 }
  0xc9   :  { %v1894_v39 = vpop.permute.xlu1 %934  ;;  %v1896_v40 = vpop.permute.xlu0 %929 }
  0xcd   :  { %v1906_v57 = vpop.permute.xlu1 %944  ;;  %v1908_v58 = vpop.permute.xlu0 %939 }
 0x116   :  { %v632_v41 = vpop.f32.mrb[0].mxu0  ;;  %v1898_v42 = vpop.f32.mrb[0].mxu1 }
 0x117   :  { %v633_v43 = vadd.f32 %v632_v41, %v121_v4  ;;  %v634_v44 = vpop.f32.mrb[1].mxu0  ;;  %v1900_v45 = vpop.f32.mrb[1].mxu1 }
 0x118   :  { %v635_v46 = vadd.f32 %v634_v44, %v121_v4  ;;  %v636_v47 = vpop.f32.mrb[2].mxu0  ;;  %v1902_v48 = vpop.f32.mrb[2].mxu1 }
 0x119   :  { %v791_v49 = vmax.f32 %v633_v43, 0.0  ;;  %v637_v50 = vadd.f32 %v636_v47, %v126_v6  ;;  %v638_v51 = vpop.f32.mrb[3].mxu0  ;;  %v1904_v52 = vpop.f32.mrb[3].mxu1 }
 0x11a   :  { %v792_v53 = vmax.f32 %v635_v46, 0.0  ;;  %v639_v54 = vadd.f32 %v638_v51, %v126_v6 }
 0x11b   :  { %v793_v55 = vmax.f32 %v637_v50, 0.0  ;;  %v1047_v59 = vmul.f32 %v890_v32, %v791_v49 }
 0x11c   :  { %v794_v56 = vmax.f32 %v639_v54, 0.0  ;;  %v1048_v61 = vmul.f32 %v890_v32, %v792_v53 }
 0x11d   :  { %v1049_v60 = vmul.f32 %v895_v31, %v793_v55 }
 0x11e   :  { %v1050_v62 = vmul.f32 %v895_v31, %v794_v56  ;;  %v642_v63 = vpop.f32.mrb[4].mxu0  ;;  %v1910_v0 = vpop.f32.mrb[4].mxu1 }
 0x11f   :  { %v1111_v1 = vadd.f32 %v1049_v60, %v1047_v59  ;;  %v643_v2 = vadd.f32 %v642_v63, %v1834_v3  ;;  %v644_v4 = vpop.f32.mrb[5].mxu0  ;;  %v1913_v41 = vpop.f32.mrb[5].mxu1 }
 0x120   :  { %v1148_v6 = vadd.f32 %v1050_v62, %v1048_v61  ;;  %v645_v43 = vadd.f32 %v644_v4, %v1834_v3  ;;  %v646_v44 = vpop.f32.mrb[6].mxu0  ;;  %v1916_v46 = vpop.f32.mrb[6].mxu1 }
 0x121   :  { %v795_v47 = vmax.f32 %v643_v2, 0.0  ;;  %v647_v49 = vadd.f32 %v646_v44, %v1836_v5  ;;  %v648_v32 = vpop.f32.mrb[7].mxu0  ;;  %v1919_v31 = vpop.f32.mrb[7].mxu1 }
 0x122   :  { %v796_v50 = vmax.f32 %v645_v43, 0.0  ;;  %v649_v51 = vadd.f32 %v648_v32, %v1836_v5  ;;  %v1922_v59 = vpop.permute.xlu1 %954  ;;  %v1924_v60 = vpop.permute.xlu0 %949 }
 0x123   :  { %v1051_v53 = vmul.f32 %v900_v34, %v795_v47  ;;  %v797_v54 = vmax.f32 %v647_v49, 0.0 }
 0x124   :  { %v1052_v55 = vmul.f32 %v900_v34, %v796_v50  ;;  %v798_v56 = vmax.f32 %v649_v51, 0.0 }
 0x125   :  { %v1112_v3 = vadd.f32 %v1111_v1, %v1051_v53  ;;  %v1053_v61 = vmul.f32 %v905_v33, %v797_v54 }
 0x126   :  { %v1149_v62 = vadd.f32 %v1148_v6, %v1052_v55  ;;  %v1054_v63 = vmul.f32 %v905_v33, %v798_v56  ;;  %v652_v2 = vpop.f32.mrb[8].mxu0  ;;  %v1926_v4 = vpop.f32.mrb[8].mxu1 }
 0x127   :  { %v1113_v44 = vadd.f32 %v1112_v3, %v1053_v61  ;;  %v653_v43 = vadd.f32 %v652_v2, %v1840_v8  ;;  %v654_v29 = vpop.f32.mrb[9].mxu0  ;;  %v1929_v5 = vpop.f32.mrb[9].mxu1 }
 0x128   :  { %v1150_v47 = vadd.f32 %v1149_v62, %v1054_v63  ;;  %v655_v34 = vadd.f32 %v654_v29, %v1840_v8  ;;  %v656_v49 = vpop.f32.mrb[10].mxu0  ;;  %v1932_v32 = vpop.f32.mrb[10].mxu1 }
 0x129   :  { %v799_v50 = vmax.f32 %v653_v43, 0.0  ;;  %v657_v1 = vadd.f32 %v656_v49, %v1838_v7  ;;  %v658_v6 = vpop.f32.mrb[11].mxu0  ;;  %v1935_v33 = vpop.f32.mrb[11].mxu1 }
 0x12a   :  { %v800_v51 = vmax.f32 %v655_v34, 0.0  ;;  %v659_v53 = vadd.f32 %v658_v6, %v1838_v7  ;;  %v1940_v61 = vpop.permute.xlu1 %964  ;;  %v1942_v8 = vpop.permute.xlu0 %959 }
 0x12b   :  { %v1055_v54 = vmul.f32 %v1888_v36, %v799_v50  ;;  %v801_v55 = vmax.f32 %v657_v1, 0.0 }
 0x12c   :  { %v1056_v56 = vmul.f32 %v1888_v36, %v800_v51  ;;  %v802_v3 = vmax.f32 %v659_v53, 0.0 }
 0x12d   :  { %v1114_v29 = vadd.f32 %v1113_v44, %v1055_v54  ;;  %v1057_v62 = vmul.f32 %v1886_v35, %v801_v55 }
 0x12e   :  { %v1151_v63 = vadd.f32 %v1150_v47, %v1056_v56  ;;  %v1058_v2 = vmul.f32 %v1886_v35, %v802_v3  ;;  %v662_v43 = vpop.f32.mrb[12].mxu0  ;;  %v1946_v34 = vpop.f32.mrb[12].mxu1 }
 0x12f   :  { %v1115_v7 = vadd.f32 %v1114_v29, %v1057_v62  ;;  %v663_v49 = vadd.f32 %v662_v43, %v1844_v10  ;;  %v664_v50 = vpop.f32.mrb[13].mxu0  ;;  %v1949_v1 = vpop.f32.mrb[13].mxu1 }
 0x130   :  { %v1152_v36 = vadd.f32 %v1151_v63, %v1058_v2  ;;  %v665_v6 = vadd.f32 %v664_v50, %v1844_v10  ;;  %v666_v51 = vpop.f32.mrb[14].mxu0  ;;  %v1952_v53 = vpop.f32.mrb[14].mxu1 }
 0x131   :  { %v803_v44 = vmax.f32 %v663_v49, 0.0  ;;  %v667_v47 = vadd.f32 %v666_v51, %v1842_v9  ;;  %v668_v54 = vpop.f32.mrb[15].mxu0  ;;  %v1955_v35 = vpop.f32.mrb[15].mxu1 }
 0x132   :  { %v804_v55 = vmax.f32 %v665_v6, 0.0  ;;  %v669_v56 = vadd.f32 %v668_v54, %v1842_v9  ;;  %v1960_v2 = vpop.permute.xlu1 %974  ;;  %v1962_v10 = vpop.permute.xlu0 %969 }
 0x133   :  { %v1059_v3 = vmul.f32 %v1892_v38, %v803_v44  ;;  %v805_v29 = vmax.f32 %v667_v47, 0.0 }
 0x134   :  { %v1060_v62 = vmul.f32 %v1892_v38, %v804_v55  ;;  %v806_v63 = vmax.f32 %v669_v56, 0.0 }
 0x135   :  { %v1116_v43 = vadd.f32 %v1115_v7, %v1059_v3  ;;  %v1061_v49 = vmul.f32 %v1890_v37, %v805_v29 }
 0x136   :  { %v1153_v50 = vadd.f32 %v1152_v36, %v1060_v62  ;;  %v1062_v51 = vmul.f32 %v1890_v37, %v806_v63  ;;  %v672_v30 = vpop.f32.mrb[16].mxu0  ;;  %v1966_v6 = vpop.f32.mrb[16].mxu1 }
 0x137   :  { %v1117_v9 = vadd.f32 %v1116_v43, %v1061_v49  ;;  %v673_v44 = vadd.f32 %v672_v30, %v1848_v12  ;;  %v674_v47 = vpop.f32.mrb[17].mxu0  ;;  %v1969_v54 = vpop.f32.mrb[17].mxu1 }
 0x138   :  { %v1154_v38 = vadd.f32 %v1153_v50, %v1062_v51  ;;  %v675_v55 = vadd.f32 %v674_v47, %v1848_v12  ;;  %v676_v56 = vpop.f32.mrb[18].mxu0  ;;  %v1972_v27 = vpop.f32.mrb[18].mxu1 }
 0x139   :  { %2145 = vst [vmem:[#allocation6_spill] sm:$0xff] %v1972_v27  ;;  %v807_v7 = vmax.f32 %v673_v44, 0.0  ;;  %v677_v36 = vadd.f32 %v676_v56, %v1846_v11  ;;  %v678_v3 = vpop.f32.mrb[19].mxu0  ;;  %v1975_v37 = vpop.f32.mrb[19].mxu1 }
 0x13a   :  { %2146 = vst [vmem:[#allocation7_spill] sm:$0xff] %v1975_v37  ;;  %v808_v29 = vmax.f32 %v675_v55, 0.0  ;;  %v679_v62 = vadd.f32 %v678_v3, %v1846_v11  ;;  %v1980_v50 = vpop.permute.xlu1 %984  ;;  %v1982_v12 = vpop.permute.xlu0 %979 }
 0x13b   :  { %v1063_v30 = vmul.f32 %v1896_v40, %v807_v7  ;;  %v809_v63 = vmax.f32 %v677_v36, 0.0 }
 0x13c   :  { %v1064_v43 = vmul.f32 %v1896_v40, %v808_v29  ;;  %v810_v49 = vmax.f32 %v679_v62, 0.0 }
 0x13d   :  { %v1118_v51 = vadd.f32 %v1117_v9, %v1063_v30  ;;  %v1065_v44 = vmul.f32 %v1894_v39, %v809_v63 }
 0x13e   :  { %v1155_v47 = vadd.f32 %v1154_v38, %v1064_v43  ;;  %v1066_v56 = vmul.f32 %v1894_v39, %v810_v49  ;;  %v682_v37 = vpop.f32.mrb[20].mxu0  ;;  %v1986_v55 = vpop.f32.mrb[20].mxu1 }
 0x13f   :  { %v1119_v11 = vadd.f32 %v1118_v51, %v1065_v44  ;;  %v683_v7 = vadd.f32 %v682_v37, %v1852_v14  ;;  %v684_v36 = vpop.f32.mrb[21].mxu0  ;;  %v1989_v3 = vpop.f32.mrb[21].mxu1 }
 0x140   :  { %v1156_v40 = vadd.f32 %v1155_v47, %v1066_v56  ;;  %v685_v29 = vadd.f32 %v684_v36, %v1852_v14  ;;  %v686_v62 = vpop.f32.mrb[22].mxu0  ;;  %v1992_v27 = vpop.f32.mrb[22].mxu1 }
 0x141   :  { %2147 = vst [vmem:[#allocation8_spill] sm:$0xff] %v1992_v27  ;;  %v811_v9 = vmax.f32 %v683_v7, 0.0  ;;  %v687_v38 = vadd.f32 %v686_v62, %v1850_v13  ;;  %v688_v30 = vpop.f32.mrb[23].mxu0  ;;  %v1995_v39 = vpop.f32.mrb[23].mxu1 }
 0x142   :  { %2148 = vst [vmem:[#allocation9_spill] sm:$0xff] %v1995_v39  ;;  %v812_v63 = vmax.f32 %v685_v29, 0.0  ;;  %v689_v43 = vadd.f32 %v688_v30, %v1850_v13  ;;  %v2000_v47 = vpop.permute.xlu1 %994  ;;  %v2002_v14 = vpop.permute.xlu0 %989 }
 0x143   :  { %v1067_v37 = vmul.f32 %v1908_v58, %v811_v9  ;;  %v813_v49 = vmax.f32 %v687_v38, 0.0 }
 0x144   :  { %v1068_v51 = vmul.f32 %v1908_v58, %v812_v63  ;;  %v814_v44 = vmax.f32 %v689_v43, 0.0 }
 0x145   :  { %v1120_v56 = vadd.f32 %v1119_v11, %v1067_v37  ;;  %v1069_v7 = vmul.f32 %v1906_v57, %v813_v49 }
 0x146   :  { %v1157_v36 = vadd.f32 %v1156_v40, %v1068_v51  ;;  %v1070_v62 = vmul.f32 %v1906_v57, %v814_v44  ;;  %v692_v39 = vpop.f32.mrb[24].mxu0  ;;  %v2006_v29 = vpop.f32.mrb[24].mxu1 }
 0x147   :  { %v1121_v13 = vadd.f32 %v1120_v56, %v1069_v7  ;;  %v693_v9 = vadd.f32 %v692_v39, %v1856_v16  ;;  %v694_v38 = vpop.f32.mrb[25].mxu0  ;;  %v2009_v30 = vpop.f32.mrb[25].mxu1 }
 0x148   :  { %v1158_v58 = vadd.f32 %v1157_v36, %v1070_v62  ;;  %v695_v63 = vadd.f32 %v694_v38, %v1856_v16  ;;  %v696_v43 = vpop.f32.mrb[26].mxu0  ;;  %v2012_v27 = vpop.f32.mrb[26].mxu1 }
 0x149   :  { %v815_v11 = vmax.f32 %v693_v9, 0.0  ;;  %v697_v40 = vadd.f32 %v696_v43, %v1854_v15  ;;  %v698_v37 = vpop.f32.mrb[27].mxu0  ;;  %v2015_v57 = vpop.f32.mrb[27].mxu1 }
 0x14a   :  { %2149 = vst [vmem:[#allocation10_spill] sm:$0xff] %v2015_v57  ;;  %v816_v49 = vmax.f32 %v695_v63, 0.0  ;;  %v699_v51 = vadd.f32 %v698_v37, %v1854_v15  ;;  %v2020_v36 = vpop.permute.xlu1 %1004  ;;  %v2022_v16 = vpop.permute.xlu0 %999  ;;  %v713_v15 = vadd.f32 %v1898_v42, %v1864_v20 }
 0x14b   :  { %v1071_v39 = vmul.f32 %v1924_v60, %v815_v11  ;;  %v817_v44 = vmax.f32 %v697_v40, 0.0 }
 0x14c   :  { %v1072_v56 = vmul.f32 %v1924_v60, %v816_v49  ;;  %v818_v7 = vmax.f32 %v699_v51, 0.0 }
 0x14d   :  { %v1122_v62 = vadd.f32 %v1121_v13, %v1071_v39  ;;  %v1073_v9 = vmul.f32 %v1922_v59, %v817_v44  ;;  %v715_v13 = vadd.f32 %v1900_v45, %v1864_v20  ;;  %v717_v39 = vadd.f32 %v1902_v48, %v1862_v19 }
 0x14e   :  { %v1159_v38 = vadd.f32 %v1158_v58, %v1072_v56  ;;  %v1074_v43 = vmul.f32 %v1922_v59, %v818_v7  ;;  %v702_v57 = vpop.f32.mrb[28].mxu0  ;;  %v2026_v63 = vpop.f32.mrb[28].mxu1  ;;  %v719_v7 = vadd.f32 %v1904_v52, %v1862_v19  ;;  %v823_v45 = vmax.f32 %v713_v15, 0.0 }
 0x14f   :  { %v1123_v11 = vadd.f32 %v1122_v62, %v1073_v9  ;;  %v703_v60 = vadd.f32 %v702_v57, %v1860_v18  ;;  %v704_v40 = vpop.f32.mrb[29].mxu0  ;;  %v2031_v37 = vpop.f32.mrb[29].mxu1  ;;  %v825_v19 = vmax.f32 %v717_v39, 0.0 }
 0x150   :  { %v1160_v49 = vadd.f32 %v1159_v38, %v1074_v43  ;;  %v705_v58 = vadd.f32 %v704_v40, %v1860_v18  ;;  %v706_v51 = vpop.f32.mrb[30].mxu0  ;;  %v2036_v59 = vpop.f32.mrb[30].mxu1  ;;  %v723_v18 = vadd.f32 %v1910_v0, %v1868_v22  ;;  %v824_v43 = vmax.f32 %v715_v13, 0.0 }
 0x151   :  { %v819_v44 = vmax.f32 %v703_v60, 0.0  ;;  %v707_v42 = vadd.f32 %v706_v51, %v1858_v17  ;;  %v708_v56 = vpop.f32.mrb[31].mxu0  ;;  %v2041_v57 = vpop.f32.mrb[31].mxu1  ;;  %v725_v60 = vadd.f32 %v1913_v41, %v1868_v22  ;;  %v1079_v22 = vmul.f32 %v1962_v10, %v823_v45 }
 0x152   :  { %v820_v62 = vmax.f32 %v705_v58, 0.0  ;;  %v709_v20 = vadd.f32 %v708_v56, %v1858_v17  ;;  %v2049_v48 = vpop.permute.xlu0 %1009  ;;  %v727_v17 = vadd.f32 %v1916_v46, %v1866_v21  ;;  %v2057_v0 = vpop.permute.xlu1 %1014  ;;  %v826_v58 = vmax.f32 %v719_v7, 0.0 }
 0x153   :  { %v1075_v9 = vmul.f32 %v1942_v8, %v819_v44  ;;  %v821_v38 = vmax.f32 %v707_v42, 0.0  ;;  %v729_v44 = vadd.f32 %v1919_v31, %v1866_v21  ;;  %v827_v41 = vmax.f32 %v723_v18, 0.0 }
 0x154   :  { %v1076_v40 = vmul.f32 %v1942_v8, %v820_v62  ;;  %v822_v51 = vmax.f32 %v709_v20, 0.0  ;;  %v733_v8 = vadd.f32 %v1926_v4, %v1872_v24  ;;  %v1080_v46 = vmul.f32 %v1962_v10, %v824_v43 }
 0x155   :  { %v1124_v52 = vadd.f32 %v1123_v11, %v1075_v9  ;;  %v1077_v15 = vmul.f32 %v1940_v61, %v821_v38  ;;  %v828_v11 = vmax.f32 %v725_v60, 0.0  ;;  %v735_v56 = vadd.f32 %v1929_v5, %v1872_v24 }
 0x156   :  { %v1161_v13 = vadd.f32 %v1160_v49, %v1076_v40  ;;  %v1078_v42 = vmul.f32 %v1940_v61, %v822_v51  ;;  %v1081_v62 = vmul.f32 %v1960_v2, %v825_v19  ;;  %v829_v21 = vmax.f32 %v727_v17, 0.0  ;;  %v2071_v49 = vpop.permute.xlu0 %260  ;;  %v2079_v38 = vpop.permute.xlu1 %1019 }
 0x157   :  { %v1125_v39 = vadd.f32 %v1124_v52, %v1077_v15  ;;  %v737_v31 = vadd.f32 %v1932_v32, %v1870_v23  ;;  %v1082_v20 = vmul.f32 %v1960_v2, %v826_v58  ;;  %v830_v4 = vmax.f32 %v729_v44, 0.0 }
 0x158   :  { %v1162_v7 = vadd.f32 %v1161_v13, %v1078_v42  ;;  %v739_v10 = vadd.f32 %v1935_v33, %v1870_v23  ;;  %v1083_v18 = vmul.f32 %v1982_v12, %v827_v41  ;;  %v831_v24 = vmax.f32 %v733_v8, 0.0 }
 0x159   :  { %v1126_v61 = vadd.f32 %v1125_v39, %v1079_v22  ;;  %v743_v5 = vadd.f32 %v1946_v34, %v1876_v26  ;;  %v1084_v32 = vmul.f32 %v1982_v12, %v828_v11  ;;  %v832_v43 = vmax.f32 %v735_v56, 0.0  ;;  %v2152_v11 = vld [vmem:[#allocation7_spill] sm:$0xff] }
 0x15a   :  { %v1163_v45 = vadd.f32 %v1162_v7, %v1080_v46  ;;  %v745_v2 = vadd.f32 %v1949_v1, %v1876_v26  ;;  %v1085_v40 = vmul.f32 %v1980_v50, %v829_v21  ;;  %v833_v23 = vmax.f32 %v737_v31, 0.0  ;;  %v266_v58 = vpop.permute.xlu0 %265  ;;  %v1025_v39 = vpop.permute.xlu1 %1024 }
 0x15b   :  { %v1127_v9 = vadd.f32 %v1126_v61, %v1081_v62  ;;  %v747_v33 = vadd.f32 %v1952_v53, %v1874_v25  ;;  %v1086_v19 = vmul.f32 %v1980_v50, %v830_v4  ;;  %v834_v34 = vmax.f32 %v739_v10, 0.0 }
 0x15c   :  { %v1164_v60 = vadd.f32 %v1163_v45, %v1082_v20  ;;  %v749_v17 = vadd.f32 %v1955_v35, %v1874_v25  ;;  %v1087_v12 = vmul.f32 %v2002_v14, %v831_v24  ;;  %v835_v15 = vmax.f32 %v743_v5, 0.0  ;;  %v2150_v25 = vld [vmem:[#allocation3_spill] sm:$0xff]  ;;  %v2151_v35 = vld [vmem:[#allocation6_spill] sm:$0xff]  ;;  %v2154_v45 = vld [vmem:[#allocation4_spill] sm:$0xff] }
 0x15d   :  { %v1128_v51 = vadd.f32 %v1127_v9, %v1083_v18  ;;  %v753_v26 = vadd.f32 %v1966_v6, %v1880_v28  ;;  %v1088_v44 = vmul.f32 %v2002_v14, %v832_v43  ;;  %v836_v13 = vmax.f32 %v745_v2, 0.0  ;;  %v2155_v18 = vld [vmem:[#allocation8_spill] sm:$0xff] }
 0x15e   :  { %v1165_v52 = vadd.f32 %v1164_v60, %v1084_v32  ;;  %v755_v53 = vadd.f32 %v1969_v54, %v1880_v28  ;;  %v1089_v42 = vmul.f32 %v2000_v47, %v833_v23  ;;  %v837_v22 = vmax.f32 %v747_v33, 0.0  ;;  %v2153_v28 = vld [vmem:[#allocation5_spill] sm:$0xff]  ;;  %v271_v9 = vpop.permute.xlu0 %270  ;;  %v1030_v33 = vpop.permute.xlu1 %1029 }
 0x15f   :  { %v1129_v1 = vadd.f32 %v1128_v51, %v1085_v40  ;;  %v757_v41 = vadd.f32 %v2151_v35, %v2150_v25  ;;  %v1090_v46 = vmul.f32 %v2000_v47, %v834_v34  ;;  %v838_v6 = vmax.f32 %v749_v17, 0.0 }
 0x160   :  { %v1166_v50 = vadd.f32 %v1165_v52, %v1086_v19  ;;  %v759_v56 = vadd.f32 %v2152_v11, %v2150_v25  ;;  %v1091_v7 = vmul.f32 %v2022_v16, %v835_v15  ;;  %v839_v62 = vmax.f32 %v753_v26, 0.0 }
 0x161   :  { %v1130_v8 = vadd.f32 %v1129_v1, %v1087_v12  ;;  %v763_v54 = vadd.f32 %v1986_v55, %v2153_v28  ;;  %v1092_v31 = vmul.f32 %v2022_v16, %v836_v13  ;;  %v840_v61 = vmax.f32 %v755_v53, 0.0  ;;  %v2156_v55 = vld [vmem:[#allocation9_spill] sm:$0xff] }
 0x162   :  { %v1167_v14 = vadd.f32 %v1166_v50, %v1088_v44  ;;  %v765_v20 = vadd.f32 %v1989_v3, %v2153_v28  ;;  %v1093_v47 = vmul.f32 %v2020_v36, %v837_v22  ;;  %v841_v10 = vmax.f32 %v757_v41, 0.0  ;;  %v2157_v44 = vld [vmem:[#allocation10_spill] sm:$0xff] }
 0x163   :  { %v1131_v21 = vadd.f32 %v1130_v8, %v1089_v42  ;;  %v767_v24 = vadd.f32 %v2155_v18, %v2154_v45  ;;  %v1094_v32 = vmul.f32 %v2020_v36, %v838_v6  ;;  %v842_v43 = vmax.f32 %v759_v56, 0.0 }
 0x164   :  { %v1168_v4 = vadd.f32 %v1167_v14, %v1090_v46  ;;  %v769_v2 = vadd.f32 %v2156_v55, %v2154_v45  ;;  %v1095_v60 = vmul.f32 %v2049_v48, %v839_v62  ;;  %v843_v40 = vmax.f32 %v763_v54, 0.0 }
 0x165   :  { %v1132_v5 = vadd.f32 %v1131_v21, %v1091_v7  ;;  %v773_v3 = vadd.f32 %v2006_v29, %v2071_v49  ;;  %v1096_v51 = vmul.f32 %v2049_v48, %v840_v61  ;;  %v844_v19 = vmax.f32 %v765_v20, 0.0 }
 0x166   :  { %v1169_v16 = vadd.f32 %v1168_v4, %v1092_v31  ;;  %v775_v34 = vadd.f32 %v2009_v30, %v2071_v49  ;;  %v1097_v17 = vmul.f32 %v2057_v0, %v841_v10  ;;  %v845_v52 = vmax.f32 %v767_v24, 0.0  ;;  %v276_v30 = vpop.permute.xlu0 %275 }
 0x167   :  { %v1133_v23 = vadd.f32 %v1132_v5, %v1093_v47  ;;  %v777_v12 = vadd.f32 %v2012_v27, %v266_v58  ;;  %v1098_v26 = vmul.f32 %v2057_v0, %v842_v43  ;;  %v846_v1 = vmax.f32 %v769_v2, 0.0 }
 0x168   :  { %v1170_v36 = vadd.f32 %v1169_v16, %v1094_v32  ;;  %v779_v29 = vadd.f32 %v2157_v44, %v266_v58  ;;  %v1099_v53 = vmul.f32 %v2079_v38, %v843_v40  ;;  %v847_v48 = vmax.f32 %v773_v3, 0.0  ;;  %v1035_v58 = vpop.permute.xlu1 %1034 }
 0x169   :  { %v1134_v15 = vadd.f32 %v1133_v23, %v1095_v60  ;;  %v783_v50 = vadd.f32 %v2026_v63, %v271_v9  ;;  %v1100_v49 = vmul.f32 %v2079_v38, %v844_v19  ;;  %v848_v22 = vmax.f32 %v775_v34, 0.0 }
 0x16a   :  { %v1171_v13 = vadd.f32 %v1170_v36, %v1096_v51  ;;  %v785_v25 = vadd.f32 %v2031_v37, %v271_v9  ;;  %v1101_v35 = vmul.f32 %v1025_v39, %v845_v52  ;;  %v849_v41 = vmax.f32 %v777_v12, 0.0  ;;  %v1040_v31 = vpop.permute.xlu0 %1039 }
 0x16b   :  { %v1135_v42 = vadd.f32 %v1134_v15, %v1097_v17  ;;  %v787_v0 = vadd.f32 %v2036_v59, %v276_v30  ;;  %v1102_v46 = vmul.f32 %v1025_v39, %v846_v1  ;;  %v850_v6 = vmax.f32 %v779_v29, 0.0 }
 0x16c   :  { %v1172_v27 = vadd.f32 %v1171_v13, %v1098_v26  ;;  %v789_v11 = vadd.f32 %v2041_v57, %v276_v30  ;;  %v1103_v63 = vmul.f32 %v1030_v33, %v847_v48  ;;  %v851_v14 = vmax.f32 %v783_v50, 0.0  ;;  %v1045_v39 = vpop.permute.xlu1 %1044 }
 0x16d   :  { %v1136_v8 = vadd.f32 %v1135_v42, %v1099_v53  ;;  %v1104_v62 = vmul.f32 %v1030_v33, %v848_v22  ;;  %v852_v38 = vmax.f32 %v785_v25, 0.0  ;;  %v1105_v54 = vmul.f32 %v1035_v58, %v849_v41 }
 0x16e   :  { %v1173_v56 = vadd.f32 %v1172_v27, %v1100_v49  ;;  %v853_v37 = vmax.f32 %v787_v0, 0.0  ;;  %v1106_v61 = vmul.f32 %v1035_v58, %v850_v6  ;;  %v854_v20 = vmax.f32 %v789_v11, 0.0  ;;  %v1191_v36 = vpop.permute.xlu0 %1190 }
 0x16f   :  { %v1137_v7 = vadd.f32 %v1136_v8, %v1101_v35  ;;  %v1107_v4 = vmul.f32 %v1040_v31, %v851_v14  ;;  %v1108_v10 = vmul.f32 %v1040_v31, %v852_v38  ;;  %v1193_v43 = vlaneseq }
 0x170   :  { %v1174_v28 = vadd.f32 %v1173_v56, %v1102_v46  ;;  %v1109_v57 = vmul.f32 %v1045_v39, %v853_v37  ;;  %v1110_v24 = vmul.f32 %v1045_v39, %v854_v20 }
 0x171   :  { %v1138_v21 = vadd.f32 %v1137_v7, %v1103_v63  ;;  %v1194_v40 = vshrl.u32 %v1193_v43, 7 }
 0x172   :  { %v1175_v59 = vadd.f32 %v1174_v28, %v1104_v62 }
 0x173   :  { %v1139_v47 = vadd.f32 %v1138_v21, %v1105_v54  ;;  %v1195_v19 = vsub.s32 0, %v1194_v40 }
 0x174   :  { %v1176_v45 = vadd.f32 %v1175_v59, %v1106_v61 }
 0x175   :  { %v1140_v18 = vadd.f32 %v1139_v47, %v1107_v4  ;;  %v1196_v15 = vrot.slane %v1191_v36, %v1195_v19 }
 0x176   :  { %v1177_v5 = vadd.f32 %v1176_v45, %v1108_v10 }
 0x177   :  { %v1141_v9 = vadd.f32 %v1140_v18, %v1109_v57 }
 0x178   :  { %v1178_v32 = vadd.f32 %v1177_v5, %v1110_v24 }
 0x179   :  { %v1142_v55 = vrot.slane %v1141_v9, 4 }
 0x17a   :  { %v1179_v2 = vrot.slane %v1178_v32, 4 }
 0x17b   :  { %v1143_v16 = vadd.f32 %v1142_v55, %v1141_v9 }
 0x17c   :  { %v1180_v60 = vadd.f32 %v1179_v2, %v1178_v32 }
 0x17d   :  { %v1144_v3 = vrot.slane %v1143_v16, 2 }
 0x17e   :  { %v1181_v23 = vrot.slane %v1180_v60, 2 }
 0x17f   :  { %v1145_v33 = vadd.f32 %v1144_v3, %v1143_v16 }
 0x180   :  { %v1182_v51 = vadd.f32 %v1181_v23, %v1180_v60 }
 0x181   :  { %v1146_v34 = vrot.slane %v1145_v33, 1 }
 0x182   :  { %v1183_v17 = vrot.slane %v1182_v51, 1 }
 0x183   :  { %v1147_v52 = vadd.f32 %v1146_v34, %v1145_v33 }
 0x184   :  { %v1184_v12 = vadd.f32 %v1183_v17, %v1182_v51 }
 0x185   :  { %v1185_v26 = vmul.f32 0.5, %v1147_v52 }
 0x186   :  { %v1186_v1 = vmul.f32 0.5, %v1184_v12 }
 0x187   :  { %v1197_v44 = vadd.f32 %v1196_v15, %v1185_v26 }
 0x188   :  { %v1198_v29 = vadd.f32 %v1196_v15, %v1186_v1 }
 0x189   :  { %v1199_v13 = vsub.f32 0.0, %v1197_v44 }
 0x18a   :  { %v1200_v53 = vsub.f32 0.0, %v1198_v29 }
 0x18b   :  { %v1202_v48 = vsel %vm1201_vm0, %v1199_v13, %v1197_v44 }
 0x18c   :  { %v1203_v50 = vsel %vm1201_vm0, %v1200_v53, %v1198_v29 }
 0x18d   :  { %v1206_v42 = vcombine.low %v1202_v48, %v1203_v50 }
 0x18f   :  { %1284 = vst.sshfl [vmem:[%s2138_s5] sm:$0x33 pattern:$0x76325410] %v1206_v42 }

</bundles_post_ra>
